<compile_context>
chip_gen: v7x
topology: tpu7x:2x2x1
jax: 0.10.0
libtpu: 0.0.40
codegen_flags: <defaults>
</compile_context>

<pallas_src>
import numpy as np
import jax
import jax.numpy as jnp
from jax.experimental import pallas as pl
from jax.experimental.pallas import tpu as pltpu

# ----------------------------- model config ---------------------------------
IN_NODES = 16
CONV_CONFIG = [4, 'M', 8]
DENSE_CONFIG = [32]
OUT_NODES = 2
CONV_K = 3
CONV_S = 1
MAXPOOL_K = 2
MAXPOOL_S = 2
BN_EPS = 1e-5


def _out_size(h, k, s):
    return (h - k) // s + 1


C1, C2 = [v for v in CONV_CONFIG if v != 'M']   # 4, 8
H1 = _out_size(IN_NODES, CONV_K, CONV_S)        # 14 (after conv1)
HP = _out_size(H1, MAXPOOL_K, MAXPOOL_S)        # 7  (after maxpool)
H2 = _out_size(HP, CONV_K, CONV_S)              # 5  (after conv2)
D1 = DENSE_CONFIG[0]                            # 32


# ----------------------------- fused Pallas kernel ---------------------------

def _fused_forward_kernel(x_ref, w1_ref, ep1_ref, w2_ref, ep2_ref,
                          wfc1_ref, bfc1_ref, wfc2_ref, bfc2_ref, o_ref):
    """Entire forward pass for one batch element; all operands VMEM-resident.

    In-kernel activation layout is (H, W, C): W on sublanes, channels on lanes.
    Small spatial rows are kept as Python lists of 2-D tiles so no unaligned
    concatenate / reshape / transpose is ever needed.
    """
    x = x_ref[0]                                            # (IN, IN, 1)

    # ---------------- conv1 (1->C1, 3x3, valid) + ReLU + BN(eval) ----------
    acc1 = jnp.zeros((H1, H1, C1), jnp.float32)
    for kh in range(CONV_K):
        for kw in range(CONV_K):
            patch = x[kh:kh + H1, kw:kw + H1, :]            # (H1, H1, 1)
            acc1 = acc1 + patch * w1_ref[kh, kw]            # (1, C1) lane bcast
    b1, s1, t1 = ep1_ref[0:1, :], ep1_ref[1:2, :], ep1_ref[2:3, :]
    y1 = jnp.maximum(acc1 + b1, 0.0) * s1 + t1              # (H1, H1, C1)

    # ---------------- maxpool 2x2 stride 2 (pure elementwise max) ----------
    row_ids = jax.lax.broadcasted_iota(jnp.int32, (HP, 1), 0)
    pool_rows = []                                          # HP tiles of (HP, C1)
    for i in range(HP):
        a = jnp.maximum(y1[2 * i], y1[2 * i + 1])           # (H1, C1): max over H
        r = jnp.zeros((HP, C1), jnp.float32)
        for j in range(HP):
            v = jnp.maximum(a[2 * j:2 * j + 1, :],
                            a[2 * j + 1:2 * j + 2, :])      # (1, C1): max over W
            r = jnp.where(row_ids == j, v, r)               # place into row j
        pool_rows.append(r)

    # ---------------- conv2 (C1->C2, 3x3, valid) + ReLU + BN(eval) ---------
    w2_taps = [[w2_ref[kh, kw] for kw in range(CONV_K)] for kh in range(CONV_K)]
    b2, s2, t2 = ep2_ref[0:1, :], ep2_ref[1:2, :], ep2_ref[2:3, :]
    y2_rows = []                                            # H2 tiles of (H2, C2)
    for i in range(H2):
        acc2 = jnp.zeros((H2, C2), jnp.float32)
        for kh in range(CONV_K):
            prow = pool_rows[i + kh]                        # (HP, C1)
            for kw in range(CONV_K):
                acc2 = acc2 + jnp.dot(prow[kw:kw + H2, :], w2_taps[kh][kw],
                                      preferred_element_type=jnp.float32)
        y2_rows.append(jnp.maximum(acc2 + b2, 0.0) * s2 + t2)

    # ---------------- fc1 + ReLU (torch.flatten(NCHW) baked into wfc1) -----
    h = bfc1_ref[...]                                       # (1, D1)
    for i in range(H2):
        yi = y2_rows[i]
        for j in range(H2):
            h = h + jnp.dot(yi[j:j + 1, :], wfc1_ref[i, j],
                            preferred_element_type=jnp.float32)
    h = jnp.maximum(h, 0.0)
    # nn.Dropout(p=0.5) is the identity at inference time.

    # ---------------- fc2 + log_softmax ------------------------------------
    logits = jnp.dot(h, wfc2_ref[...],
                     preferred_element_type=jnp.float32) + bfc2_ref[...]
    m = jnp.max(logits, axis=1, keepdims=True)
    s = logits - m
    lse = jnp.log(jnp.sum(jnp.exp(s), axis=1, keepdims=True))
    o_ref[0] = (s - lse).astype(o_ref.dtype)


# ----------------------------- wrapper ---------------------------------------

@jax.jit
def forward(x_nchw, kp):
    B = x_nchw.shape[0]
    # NCHW with C=1 -> (B, H, W, 1): pure reshape, no data movement.
    x = x_nchw.astype(jnp.float32).reshape(B, IN_NODES, IN_NODES, 1)
    out = pl.pallas_call(
        _fused_forward_kernel,
        out_shape=jax.ShapeDtypeStruct((B, 1, OUT_NODES), jnp.float32),
        grid=(B,),
        in_specs=[
            pl.BlockSpec((1, IN_NODES, IN_NODES, 1), lambda b: (b, 0, 0, 0)),  # x
            pl.BlockSpec((CONV_K, CONV_K, 1, C1), lambda b: (0, 0, 0, 0)),     # w1
            pl.BlockSpec((3, C1), lambda b: (0, 0)),                           # ep1
            pl.BlockSpec((CONV_K, CONV_K, C1, C2), lambda b: (0, 0, 0, 0)),    # w2
            pl.BlockSpec((3, C2), lambda b: (0, 0)),                           # ep2
            pl.BlockSpec((H2, H2, C2, D1), lambda b: (0, 0, 0, 0)),            # wfc1
            pl.BlockSpec((1, D1), lambda b: (0, 0)),                           # bfc1
            pl.BlockSpec((D1, OUT_NODES), lambda b: (0, 0)),                   # wfc2
            pl.BlockSpec((1, OUT_NODES), lambda b: (0, 0)),                    # bfc2
        ],
        out_specs=pl.BlockSpec((1, 1, OUT_NODES), lambda b: (b, 0, 0)),
        compiler_params=pltpu.CompilerParams(
            dimension_semantics=("parallel",)),
    )(x, kp["w1"], kp["ep1"], kp["w2"], kp["ep2"],
      kp["wfc1"], kp["bfc1"], kp["wfc2"], kp["bfc2"])
    return out.reshape(B, OUT_NODES // 2, 2)


# ----------------------------- parameters ------------------------------------

def init_params(key):
    """Deterministic synthetic parameters matching InteractionNet.__initialize_weights."""
    params = {"conv_w": [], "conv_b": [], "bn_scale": [], "bn_shift": [],
              "fc_w": [], "fc_b": []}
    in_ch, h = 1, IN_NODES
    for v in CONV_CONFIG:
        if v == 'M':
            h = _out_size(h, MAXPOOL_K, MAXPOOL_S)
            continue
        key, sub = jax.random.split(key)
        fan_out = v * CONV_K * CONV_K                       # kaiming_normal fan_out/relu
        std = float(np.sqrt(2.0 / fan_out))
        params["conv_w"].append(
            jax.random.normal(sub, (CONV_K, CONV_K, in_ch, v), jnp.float32) * std)
        params["conv_b"].append(jnp.zeros((1, v), jnp.float32))
        # BatchNorm2d eval mode: gamma=1, beta=0, running_mean=0, running_var=1
        params["bn_scale"].append(
            jnp.full((1, v), 1.0 / np.sqrt(1.0 + BN_EPS), jnp.float32))
        params["bn_shift"].append(jnp.zeros((1, v), jnp.float32))
        h = _out_size(h, CONV_K, CONV_S)
        in_ch = v
    in_nodes = in_ch * h * h
    for n in DENSE_CONFIG + [OUT_NODES]:
        key, sub = jax.random.split(key)
        params["fc_w"].append(
            jax.random.normal(sub, (in_nodes, n), jnp.float32) * 0.01)  # normal(0, 0.01)
        params["fc_b"].append(jnp.zeros((1, n), jnp.float32))
        in_nodes = n
    return params


def prepare_kernel_params(params):
    """One-time layout prep (outside the hot path): fold conv epilogues into
    (bias, bn_scale, bn_shift) tables and bake the torch.flatten(NCHW) ordering
    into the fc1 weight so no runtime transpose/flatten is needed."""
    ep1 = jnp.concatenate([params["conv_b"][0], params["bn_scale"][0],
                           params["bn_shift"][0]], axis=0)               # (3, C1)
    ep2 = jnp.concatenate([params["conv_b"][1], params["bn_scale"][1],
                           params["bn_shift"][1]], axis=0)               # (3, C2)
    # flatten index of the (C2, H2, H2) conv output is c*H2*H2 + i*H2 + j;
    # rearrange fc1 weight rows to (i, j, c, n) so the kernel contracts per pixel.
    wfc1 = jnp.transpose(params["fc_w"][0].reshape(C2, H2, H2, D1), (1, 2, 0, 3))
    return {
        "w1": params["conv_w"][0],      # (K, K, 1, C1)
        "ep1": ep1,                     # (3, C1)
        "w2": params["conv_w"][1],      # (K, K, C1, C2)
        "ep2": ep2,                     # (3, C2)
        "wfc1": wfc1,                   # (H2, H2, C2, D1)
        "bfc1": params["fc_b"][0],      # (1, D1)
        "wfc2": params["fc_w"][1],      # (D1, OUT_NODES)
        "bfc2": params["fc_b"][1],      # (1, OUT_NODES)
    }


# ----------------------------- reference (plain JAX) --------------------------

def reference_forward(x_nchw, params):
    y = x_nchw.astype(jnp.float32)
    ci = 0
    for v in CONV_CONFIG:
        if v == 'M':
            y = jax.lax.reduce_window(y, -jnp.inf, jax.lax.max,
                                      (1, 1, 2, 2), (1, 1, 2, 2), "VALID")
        else:
            w = jnp.transpose(params["conv_w"][ci], (3, 2, 0, 1))  # HWIO -> OIHW
            y = jax.lax.conv_general_dilated(
                y, w, (1, 1), "VALID", dimension_numbers=("NCHW", "OIHW", "NCHW"))
            y = y + params["conv_b"][ci].reshape(1, -1, 1, 1)
            y = jnp.maximum(y, 0.0)
            y = (y * params["bn_scale"][ci].reshape(1, -1, 1, 1)
                 + params["bn_shift"][ci].reshape(1, -1, 1, 1))
            ci += 1
    y = y.reshape(y.shape[0], -1)
    n_fc = len(params["fc_w"])
    for li in range(n_fc):
        y = y @ params["fc_w"][li] + params["fc_b"][li]
        if li != n_fc - 1:
            y = jnp.maximum(y, 0.0)
    y = jax.nn.log_softmax(y, axis=1)
    return y.reshape(-1, OUT_NODES // 2, 2)


# ----------------------------- main -------------------------------------------

if __name__ == "__main__":
    key = jax.random.PRNGKey(0)
    kx, kparam = jax.random.split(key)
    x = jax.random.normal(kx, (2, 1, IN_NODES, IN_NODES), dtype=jnp.float32)

    params = init_params(kparam)
    kparams = prepare_kernel_params(params)

    out = jax.block_until_ready(forward(x, kparams))
    assert out.shape == (2, OUT_NODES // 2, 2), out.shape

    ref = reference_forward(x, params)
    np.testing.assert_allclose(np.asarray(out), np.asarray(ref), rtol=2e-3, atol=2e-3)

    print("KERNEL_OK")
</pallas_src>

<mosaic_0001>
module attributes {stable_mosaic.version = 11 : i64} {
  func.func @_fused_forward_kernel(%arg0: i32, %arg1: memref<1x16x16x1xf32, #tpu.memory_space<vmem>>, %arg2: memref<3x3x1x4xf32, #tpu.memory_space<vmem>>, %arg3: memref<3x4xf32, #tpu.memory_space<vmem>>, %arg4: memref<3x3x4x8xf32, #tpu.memory_space<vmem>>, %arg5: memref<3x8xf32, #tpu.memory_space<vmem>>, %arg6: memref<5x5x8x32xf32, #tpu.memory_space<vmem>>, %arg7: memref<1x32xf32, #tpu.memory_space<vmem>>, %arg8: memref<32x2xf32, #tpu.memory_space<vmem>>, %arg9: memref<1x2xf32, #tpu.memory_space<vmem>>, %arg10: memref<1x1x2xf32, #tpu.memory_space<vmem>>) attributes {dimension_semantics = [#tpu.dimension_semantics<parallel>], iteration_bounds = array<i64: 2>, scalar_prefetch = 0 : i64, scratch_operands = 0 : i64, tpu.core_type = #tpu.core_type<tc>, window_params = [{transform_indices = @transform_0, window_bounds = array<i64: 1, 16, 16, 1>}, {pipeline_mode = #tpu.pipeline_mode<synchronous>, transform_indices = @transform_1, window_bounds = array<i64: 3, 3, 1, 4>}, {pipeline_mode = #tpu.pipeline_mode<synchronous>, transform_indices = @transform_2, window_bounds = array<i64: 3, 4>}, {pipeline_mode = #tpu.pipeline_mode<synchronous>, transform_indices = @transform_3, window_bounds = array<i64: 3, 3, 4, 8>}, {pipeline_mode = #tpu.pipeline_mode<synchronous>, transform_indices = @transform_4, window_bounds = array<i64: 3, 8>}, {pipeline_mode = #tpu.pipeline_mode<synchronous>, transform_indices = @transform_5, window_bounds = array<i64: 5, 5, 8, 32>}, {pipeline_mode = #tpu.pipeline_mode<synchronous>, transform_indices = @transform_6, window_bounds = array<i64: 1, 32>}, {pipeline_mode = #tpu.pipeline_mode<synchronous>, transform_indices = @transform_7, window_bounds = array<i64: 32, 2>}, {pipeline_mode = #tpu.pipeline_mode<synchronous>, transform_indices = @transform_8, window_bounds = array<i64: 1, 2>}, {transform_indices = @transform_9, window_bounds = array<i64: 1, 1, 2>}]} {
    %c0 = arith.constant 0 : index
    %c0_0 = arith.constant 0 : index
    %c0_1 = arith.constant 0 : index
    %c0_2 = arith.constant 0 : index
    %0 = vector.load %arg1[%c0, %c0_0, %c0_1, %c0_2] : memref<1x16x16x1xf32, #tpu.memory_space<vmem>>, vector<1x16x16x1xf32>
    %1 = vector.shape_cast %0 : vector<1x16x16x1xf32> to vector<16x16x1xf32>
    %cst = arith.constant 0.000000e+00 : f32
    %2 = vector.broadcast %cst : f32 to vector<14x14x4xf32>
    %3 = vector.extract_strided_slice %1 {offsets = [0, 0, 0], sizes = [14, 14, 1], strides = [1, 1, 1]} : vector<16x16x1xf32> to vector<14x14x1xf32>
    %c0_3 = arith.constant 0 : index
    %c0_4 = arith.constant 0 : index
    %c0_5 = arith.constant 0 : index
    %c0_6 = arith.constant 0 : index
    %4 = vector.load %arg2[%c0_3, %c0_4, %c0_5, %c0_6] : memref<3x3x1x4xf32, #tpu.memory_space<vmem>>, vector<1x1x1x4xf32>
    %5 = vector.shape_cast %4 : vector<1x1x1x4xf32> to vector<1x4xf32>
    %6 = vector.shape_cast %5 : vector<1x4xf32> to vector<1x1x4xf32>
    %7 = vector.broadcast %3 : vector<14x14x1xf32> to vector<14x14x4xf32>
    %8 = vector.broadcast %6 : vector<1x1x4xf32> to vector<14x14x4xf32>
    %9 = arith.mulf %7, %8 : vector<14x14x4xf32>
    %10 = arith.addf %2, %9 : vector<14x14x4xf32>
    %11 = vector.extract_strided_slice %1 {offsets = [0, 1, 0], sizes = [14, 14, 1], strides = [1, 1, 1]} : vector<16x16x1xf32> to vector<14x14x1xf32>
    %c0_7 = arith.constant 0 : index
    %c1 = arith.constant 1 : index
    %c0_8 = arith.constant 0 : index
    %c0_9 = arith.constant 0 : index
    %12 = vector.load %arg2[%c0_7, %c1, %c0_8, %c0_9] : memref<3x3x1x4xf32, #tpu.memory_space<vmem>>, vector<1x1x1x4xf32>
    %13 = vector.shape_cast %12 : vector<1x1x1x4xf32> to vector<1x4xf32>
    %14 = vector.shape_cast %13 : vector<1x4xf32> to vector<1x1x4xf32>
    %15 = vector.broadcast %11 : vector<14x14x1xf32> to vector<14x14x4xf32>
    %16 = vector.broadcast %14 : vector<1x1x4xf32> to vector<14x14x4xf32>
    %17 = arith.mulf %15, %16 : vector<14x14x4xf32>
    %18 = arith.addf %10, %17 : vector<14x14x4xf32>
    %19 = vector.extract_strided_slice %1 {offsets = [0, 2, 0], sizes = [14, 14, 1], strides = [1, 1, 1]} : vector<16x16x1xf32> to vector<14x14x1xf32>
    %c0_10 = arith.constant 0 : index
    %c2 = arith.constant 2 : index
    %c0_11 = arith.constant 0 : index
    %c0_12 = arith.constant 0 : index
    %20 = vector.load %arg2[%c0_10, %c2, %c0_11, %c0_12] : memref<3x3x1x4xf32, #tpu.memory_space<vmem>>, vector<1x1x1x4xf32>
    %21 = vector.shape_cast %20 : vector<1x1x1x4xf32> to vector<1x4xf32>
    %22 = vector.shape_cast %21 : vector<1x4xf32> to vector<1x1x4xf32>
    %23 = vector.broadcast %19 : vector<14x14x1xf32> to vector<14x14x4xf32>
    %24 = vector.broadcast %22 : vector<1x1x4xf32> to vector<14x14x4xf32>
    %25 = arith.mulf %23, %24 : vector<14x14x4xf32>
    %26 = arith.addf %18, %25 : vector<14x14x4xf32>
    %27 = vector.extract_strided_slice %1 {offsets = [1, 0, 0], sizes = [14, 14, 1], strides = [1, 1, 1]} : vector<16x16x1xf32> to vector<14x14x1xf32>
    %c1_13 = arith.constant 1 : index
    %c0_14 = arith.constant 0 : index
    %c0_15 = arith.constant 0 : index
    %c0_16 = arith.constant 0 : index
    %28 = vector.load %arg2[%c1_13, %c0_14, %c0_15, %c0_16] : memref<3x3x1x4xf32, #tpu.memory_space<vmem>>, vector<1x1x1x4xf32>
    %29 = vector.shape_cast %28 : vector<1x1x1x4xf32> to vector<1x4xf32>
    %30 = vector.shape_cast %29 : vector<1x4xf32> to vector<1x1x4xf32>
    %31 = vector.broadcast %27 : vector<14x14x1xf32> to vector<14x14x4xf32>
    %32 = vector.broadcast %30 : vector<1x1x4xf32> to vector<14x14x4xf32>
    %33 = arith.mulf %31, %32 : vector<14x14x4xf32>
    %34 = arith.addf %26, %33 : vector<14x14x4xf32>
    %35 = vector.extract_strided_slice %1 {offsets = [1, 1, 0], sizes = [14, 14, 1], strides = [1, 1, 1]} : vector<16x16x1xf32> to vector<14x14x1xf32>
    %c1_17 = arith.constant 1 : index
    %c1_18 = arith.constant 1 : index
    %c0_19 = arith.constant 0 : index
    %c0_20 = arith.constant 0 : index
    %36 = vector.load %arg2[%c1_17, %c1_18, %c0_19, %c0_20] : memref<3x3x1x4xf32, #tpu.memory_space<vmem>>, vector<1x1x1x4xf32>
    %37 = vector.shape_cast %36 : vector<1x1x1x4xf32> to vector<1x4xf32>
    %38 = vector.shape_cast %37 : vector<1x4xf32> to vector<1x1x4xf32>
    %39 = vector.broadcast %35 : vector<14x14x1xf32> to vector<14x14x4xf32>
    %40 = vector.broadcast %38 : vector<1x1x4xf32> to vector<14x14x4xf32>
    %41 = arith.mulf %39, %40 : vector<14x14x4xf32>
    %42 = arith.addf %34, %41 : vector<14x14x4xf32>
    %43 = vector.extract_strided_slice %1 {offsets = [1, 2, 0], sizes = [14, 14, 1], strides = [1, 1, 1]} : vector<16x16x1xf32> to vector<14x14x1xf32>
    %c1_21 = arith.constant 1 : index
    %c2_22 = arith.constant 2 : index
    %c0_23 = arith.constant 0 : index
    %c0_24 = arith.constant 0 : index
    %44 = vector.load %arg2[%c1_21, %c2_22, %c0_23, %c0_24] : memref<3x3x1x4xf32, #tpu.memory_space<vmem>>, vector<1x1x1x4xf32>
    %45 = vector.shape_cast %44 : vector<1x1x1x4xf32> to vector<1x4xf32>
    %46 = vector.shape_cast %45 : vector<1x4xf32> to vector<1x1x4xf32>
    %47 = vector.broadcast %43 : vector<14x14x1xf32> to vector<14x14x4xf32>
    %48 = vector.broadcast %46 : vector<1x1x4xf32> to vector<14x14x4xf32>
    %49 = arith.mulf %47, %48 : vector<14x14x4xf32>
    %50 = arith.addf %42, %49 : vector<14x14x4xf32>
    %51 = vector.extract_strided_slice %1 {offsets = [2, 0, 0], sizes = [14, 14, 1], strides = [1, 1, 1]} : vector<16x16x1xf32> to vector<14x14x1xf32>
    %c2_25 = arith.constant 2 : index
    %c0_26 = arith.constant 0 : index
    %c0_27 = arith.constant 0 : index
    %c0_28 = arith.constant 0 : index
    %52 = vector.load %arg2[%c2_25, %c0_26, %c0_27, %c0_28] : memref<3x3x1x4xf32, #tpu.memory_space<vmem>>, vector<1x1x1x4xf32>
    %53 = vector.shape_cast %52 : vector<1x1x1x4xf32> to vector<1x4xf32>
    %54 = vector.shape_cast %53 : vector<1x4xf32> to vector<1x1x4xf32>
    %55 = vector.broadcast %51 : vector<14x14x1xf32> to vector<14x14x4xf32>
    %56 = vector.broadcast %54 : vector<1x1x4xf32> to vector<14x14x4xf32>
    %57 = arith.mulf %55, %56 : vector<14x14x4xf32>
    %58 = arith.addf %50, %57 : vector<14x14x4xf32>
    %59 = vector.extract_strided_slice %1 {offsets = [2, 1, 0], sizes = [14, 14, 1], strides = [1, 1, 1]} : vector<16x16x1xf32> to vector<14x14x1xf32>
    %c2_29 = arith.constant 2 : index
    %c1_30 = arith.constant 1 : index
    %c0_31 = arith.constant 0 : index
    %c0_32 = arith.constant 0 : index
    %60 = vector.load %arg2[%c2_29, %c1_30, %c0_31, %c0_32] : memref<3x3x1x4xf32, #tpu.memory_space<vmem>>, vector<1x1x1x4xf32>
    %61 = vector.shape_cast %60 : vector<1x1x1x4xf32> to vector<1x4xf32>
    %62 = vector.shape_cast %61 : vector<1x4xf32> to vector<1x1x4xf32>
    %63 = vector.broadcast %59 : vector<14x14x1xf32> to vector<14x14x4xf32>
    %64 = vector.broadcast %62 : vector<1x1x4xf32> to vector<14x14x4xf32>
    %65 = arith.mulf %63, %64 : vector<14x14x4xf32>
    %66 = arith.addf %58, %65 : vector<14x14x4xf32>
    %67 = vector.extract_strided_slice %1 {offsets = [2, 2, 0], sizes = [14, 14, 1], strides = [1, 1, 1]} : vector<16x16x1xf32> to vector<14x14x1xf32>
    %c2_33 = arith.constant 2 : index
    %c2_34 = arith.constant 2 : index
    %c0_35 = arith.constant 0 : index
    %c0_36 = arith.constant 0 : index
    %68 = vector.load %arg2[%c2_33, %c2_34, %c0_35, %c0_36] : memref<3x3x1x4xf32, #tpu.memory_space<vmem>>, vector<1x1x1x4xf32>
    %69 = vector.shape_cast %68 : vector<1x1x1x4xf32> to vector<1x4xf32>
    %70 = vector.shape_cast %69 : vector<1x4xf32> to vector<1x1x4xf32>
    %71 = vector.broadcast %67 : vector<14x14x1xf32> to vector<14x14x4xf32>
    %72 = vector.broadcast %70 : vector<1x1x4xf32> to vector<14x14x4xf32>
    %73 = arith.mulf %71, %72 : vector<14x14x4xf32>
    %74 = arith.addf %66, %73 : vector<14x14x4xf32>
    %c0_37 = arith.constant 0 : index
    %c0_38 = arith.constant 0 : index
    %75 = vector.load %arg3[%c0_37, %c0_38] : memref<3x4xf32, #tpu.memory_space<vmem>>, vector<1x4xf32>
    %c1_39 = arith.constant 1 : index
    %c0_40 = arith.constant 0 : index
    %76 = vector.load %arg3[%c1_39, %c0_40] : memref<3x4xf32, #tpu.memory_space<vmem>>, vector<1x4xf32>
    %c2_41 = arith.constant 2 : index
    %c0_42 = arith.constant 0 : index
    %77 = vector.load %arg3[%c2_41, %c0_42] : memref<3x4xf32, #tpu.memory_space<vmem>>, vector<1x4xf32>
    %78 = vector.shape_cast %75 : vector<1x4xf32> to vector<1x1x4xf32>
    %79 = vector.broadcast %78 : vector<1x1x4xf32> to vector<14x14x4xf32>
    %80 = arith.addf %74, %79 : vector<14x14x4xf32>
    %cst_43 = arith.constant 0.000000e+00 : f32
    %81 = vector.broadcast %cst_43 : f32 to vector<14x14x4xf32>
    %82 = arith.maximumf %80, %81 : vector<14x14x4xf32>
    %83 = vector.shape_cast %76 : vector<1x4xf32> to vector<1x1x4xf32>
    %84 = vector.broadcast %83 : vector<1x1x4xf32> to vector<14x14x4xf32>
    %85 = arith.mulf %82, %84 : vector<14x14x4xf32>
    %86 = vector.shape_cast %77 : vector<1x4xf32> to vector<1x1x4xf32>
    %87 = vector.broadcast %86 : vector<1x1x4xf32> to vector<14x14x4xf32>
    %88 = arith.addf %85, %87 : vector<14x14x4xf32>
    %89 = tpu.iota {dimensions = array<i32: 0>} : vector<7x1xi32>
    %90 = vector.extract_strided_slice %88 {offsets = [0, 0, 0], sizes = [1, 14, 4], strides = [1, 1, 1]} : vector<14x14x4xf32> to vector<1x14x4xf32>
    %91 = vector.shape_cast %90 : vector<1x14x4xf32> to vector<14x4xf32>
    %92 = vector.extract_strided_slice %88 {offsets = [1, 0, 0], sizes = [1, 14, 4], strides = [1, 1, 1]} : vector<14x14x4xf32> to vector<1x14x4xf32>
    %93 = vector.shape_cast %92 : vector<1x14x4xf32> to vector<14x4xf32>
    %94 = arith.maximumf %91, %93 : vector<14x4xf32>
    %cst_44 = arith.constant 0.000000e+00 : f32
    %95 = vector.broadcast %cst_44 : f32 to vector<7x4xf32>
    %96 = vector.extract_strided_slice %94 {offsets = [0, 0], sizes = [1, 4], strides = [1, 1]} : vector<14x4xf32> to vector<1x4xf32>
    %97 = vector.extract_strided_slice %94 {offsets = [1, 0], sizes = [1, 4], strides = [1, 1]} : vector<14x4xf32> to vector<1x4xf32>
    %98 = arith.maximumf %96, %97 : vector<1x4xf32>
    %c0_i32 = arith.constant 0 : i32
    %99 = vector.broadcast %c0_i32 : i32 to vector<7x1xi32>
    %100 = arith.cmpi eq, %89, %99 : vector<7x1xi32>
    %101 = vector.shape_cast %100 : vector<7x1xi1> to vector<7x1xi1>
    %102 = vector.broadcast %101 : vector<7x1xi1> to vector<7x4xi1>
    %103 = vector.shape_cast %98 : vector<1x4xf32> to vector<1x4xf32>
    %104 = vector.broadcast %103 : vector<1x4xf32> to vector<7x4xf32>
    %105 = arith.select %102, %104, %95 : vector<7x4xi1>, vector<7x4xf32>
    %106 = vector.extract_strided_slice %94 {offsets = [2, 0], sizes = [1, 4], strides = [1, 1]} : vector<14x4xf32> to vector<1x4xf32>
    %107 = vector.extract_strided_slice %94 {offsets = [3, 0], sizes = [1, 4], strides = [1, 1]} : vector<14x4xf32> to vector<1x4xf32>
    %108 = arith.maximumf %106, %107 : vector<1x4xf32>
    %c1_i32 = arith.constant 1 : i32
    %109 = vector.broadcast %c1_i32 : i32 to vector<7x1xi32>
    %110 = arith.cmpi eq, %89, %109 : vector<7x1xi32>
    %111 = vector.shape_cast %110 : vector<7x1xi1> to vector<7x1xi1>
    %112 = vector.broadcast %111 : vector<7x1xi1> to vector<7x4xi1>
    %113 = vector.shape_cast %108 : vector<1x4xf32> to vector<1x4xf32>
    %114 = vector.broadcast %113 : vector<1x4xf32> to vector<7x4xf32>
    %115 = arith.select %112, %114, %105 : vector<7x4xi1>, vector<7x4xf32>
    %116 = vector.extract_strided_slice %94 {offsets = [4, 0], sizes = [1, 4], strides = [1, 1]} : vector<14x4xf32> to vector<1x4xf32>
    %117 = vector.extract_strided_slice %94 {offsets = [5, 0], sizes = [1, 4], strides = [1, 1]} : vector<14x4xf32> to vector<1x4xf32>
    %118 = arith.maximumf %116, %117 : vector<1x4xf32>
    %c2_i32 = arith.constant 2 : i32
    %119 = vector.broadcast %c2_i32 : i32 to vector<7x1xi32>
    %120 = arith.cmpi eq, %89, %119 : vector<7x1xi32>
    %121 = vector.shape_cast %120 : vector<7x1xi1> to vector<7x1xi1>
    %122 = vector.broadcast %121 : vector<7x1xi1> to vector<7x4xi1>
    %123 = vector.shape_cast %118 : vector<1x4xf32> to vector<1x4xf32>
    %124 = vector.broadcast %123 : vector<1x4xf32> to vector<7x4xf32>
    %125 = arith.select %122, %124, %115 : vector<7x4xi1>, vector<7x4xf32>
    %126 = vector.extract_strided_slice %94 {offsets = [6, 0], sizes = [1, 4], strides = [1, 1]} : vector<14x4xf32> to vector<1x4xf32>
    %127 = vector.extract_strided_slice %94 {offsets = [7, 0], sizes = [1, 4], strides = [1, 1]} : vector<14x4xf32> to vector<1x4xf32>
    %128 = arith.maximumf %126, %127 : vector<1x4xf32>
    %c3_i32 = arith.constant 3 : i32
    %129 = vector.broadcast %c3_i32 : i32 to vector<7x1xi32>
    %130 = arith.cmpi eq, %89, %129 : vector<7x1xi32>
    %131 = vector.shape_cast %130 : vector<7x1xi1> to vector<7x1xi1>
    %132 = vector.broadcast %131 : vector<7x1xi1> to vector<7x4xi1>
    %133 = vector.shape_cast %128 : vector<1x4xf32> to vector<1x4xf32>
    %134 = vector.broadcast %133 : vector<1x4xf32> to vector<7x4xf32>
    %135 = arith.select %132, %134, %125 : vector<7x4xi1>, vector<7x4xf32>
    %136 = vector.extract_strided_slice %94 {offsets = [8, 0], sizes = [1, 4], strides = [1, 1]} : vector<14x4xf32> to vector<1x4xf32>
    %137 = vector.extract_strided_slice %94 {offsets = [9, 0], sizes = [1, 4], strides = [1, 1]} : vector<14x4xf32> to vector<1x4xf32>
    %138 = arith.maximumf %136, %137 : vector<1x4xf32>
    %c4_i32 = arith.constant 4 : i32
    %139 = vector.broadcast %c4_i32 : i32 to vector<7x1xi32>
    %140 = arith.cmpi eq, %89, %139 : vector<7x1xi32>
    %141 = vector.shape_cast %140 : vector<7x1xi1> to vector<7x1xi1>
    %142 = vector.broadcast %141 : vector<7x1xi1> to vector<7x4xi1>
    %143 = vector.shape_cast %138 : vector<1x4xf32> to vector<1x4xf32>
    %144 = vector.broadcast %143 : vector<1x4xf32> to vector<7x4xf32>
    %145 = arith.select %142, %144, %135 : vector<7x4xi1>, vector<7x4xf32>
    %146 = vector.extract_strided_slice %94 {offsets = [10, 0], sizes = [1, 4], strides = [1, 1]} : vector<14x4xf32> to vector<1x4xf32>
    %147 = vector.extract_strided_slice %94 {offsets = [11, 0], sizes = [1, 4], strides = [1, 1]} : vector<14x4xf32> to vector<1x4xf32>
    %148 = arith.maximumf %146, %147 : vector<1x4xf32>
    %c5_i32 = arith.constant 5 : i32
    %149 = vector.broadcast %c5_i32 : i32 to vector<7x1xi32>
    %150 = arith.cmpi eq, %89, %149 : vector<7x1xi32>
    %151 = vector.shape_cast %150 : vector<7x1xi1> to vector<7x1xi1>
    %152 = vector.broadcast %151 : vector<7x1xi1> to vector<7x4xi1>
    %153 = vector.shape_cast %148 : vector<1x4xf32> to vector<1x4xf32>
    %154 = vector.broadcast %153 : vector<1x4xf32> to vector<7x4xf32>
    %155 = arith.select %152, %154, %145 : vector<7x4xi1>, vector<7x4xf32>
    %156 = vector.extract_strided_slice %94 {offsets = [12, 0], sizes = [1, 4], strides = [1, 1]} : vector<14x4xf32> to vector<1x4xf32>
    %157 = vector.extract_strided_slice %94 {offsets = [13, 0], sizes = [1, 4], strides = [1, 1]} : vector<14x4xf32> to vector<1x4xf32>
    %158 = arith.maximumf %156, %157 : vector<1x4xf32>
    %c6_i32 = arith.constant 6 : i32
    %159 = vector.broadcast %c6_i32 : i32 to vector<7x1xi32>
    %160 = arith.cmpi eq, %89, %159 : vector<7x1xi32>
    %161 = vector.shape_cast %160 : vector<7x1xi1> to vector<7x1xi1>
    %162 = vector.broadcast %161 : vector<7x1xi1> to vector<7x4xi1>
    %163 = vector.shape_cast %158 : vector<1x4xf32> to vector<1x4xf32>
    %164 = vector.broadcast %163 : vector<1x4xf32> to vector<7x4xf32>
    %165 = arith.select %162, %164, %155 : vector<7x4xi1>, vector<7x4xf32>
    %166 = vector.extract_strided_slice %88 {offsets = [2, 0, 0], sizes = [1, 14, 4], strides = [1, 1, 1]} : vector<14x14x4xf32> to vector<1x14x4xf32>
    %167 = vector.shape_cast %166 : vector<1x14x4xf32> to vector<14x4xf32>
    %168 = vector.extract_strided_slice %88 {offsets = [3, 0, 0], sizes = [1, 14, 4], strides = [1, 1, 1]} : vector<14x14x4xf32> to vector<1x14x4xf32>
    %169 = vector.shape_cast %168 : vector<1x14x4xf32> to vector<14x4xf32>
    %170 = arith.maximumf %167, %169 : vector<14x4xf32>
    %cst_45 = arith.constant 0.000000e+00 : f32
    %171 = vector.broadcast %cst_45 : f32 to vector<7x4xf32>
    %172 = vector.extract_strided_slice %170 {offsets = [0, 0], sizes = [1, 4], strides = [1, 1]} : vector<14x4xf32> to vector<1x4xf32>
    %173 = vector.extract_strided_slice %170 {offsets = [1, 0], sizes = [1, 4], strides = [1, 1]} : vector<14x4xf32> to vector<1x4xf32>
    %174 = arith.maximumf %172, %173 : vector<1x4xf32>
    %c0_i32_46 = arith.constant 0 : i32
    %175 = vector.broadcast %c0_i32_46 : i32 to vector<7x1xi32>
    %176 = arith.cmpi eq, %89, %175 : vector<7x1xi32>
    %177 = vector.shape_cast %176 : vector<7x1xi1> to vector<7x1xi1>
    %178 = vector.broadcast %177 : vector<7x1xi1> to vector<7x4xi1>
    %179 = vector.shape_cast %174 : vector<1x4xf32> to vector<1x4xf32>
    %180 = vector.broadcast %179 : vector<1x4xf32> to vector<7x4xf32>
    %181 = arith.select %178, %180, %171 : vector<7x4xi1>, vector<7x4xf32>
    %182 = vector.extract_strided_slice %170 {offsets = [2, 0], sizes = [1, 4], strides = [1, 1]} : vector<14x4xf32> to vector<1x4xf32>
    %183 = vector.extract_strided_slice %170 {offsets = [3, 0], sizes = [1, 4], strides = [1, 1]} : vector<14x4xf32> to vector<1x4xf32>
    %184 = arith.maximumf %182, %183 : vector<1x4xf32>
    %c1_i32_47 = arith.constant 1 : i32
    %185 = vector.broadcast %c1_i32_47 : i32 to vector<7x1xi32>
    %186 = arith.cmpi eq, %89, %185 : vector<7x1xi32>
    %187 = vector.shape_cast %186 : vector<7x1xi1> to vector<7x1xi1>
    %188 = vector.broadcast %187 : vector<7x1xi1> to vector<7x4xi1>
    %189 = vector.shape_cast %184 : vector<1x4xf32> to vector<1x4xf32>
    %190 = vector.broadcast %189 : vector<1x4xf32> to vector<7x4xf32>
    %191 = arith.select %188, %190, %181 : vector<7x4xi1>, vector<7x4xf32>
    %192 = vector.extract_strided_slice %170 {offsets = [4, 0], sizes = [1, 4], strides = [1, 1]} : vector<14x4xf32> to vector<1x4xf32>
    %193 = vector.extract_strided_slice %170 {offsets = [5, 0], sizes = [1, 4], strides = [1, 1]} : vector<14x4xf32> to vector<1x4xf32>
    %194 = arith.maximumf %192, %193 : vector<1x4xf32>
    %c2_i32_48 = arith.constant 2 : i32
    %195 = vector.broadcast %c2_i32_48 : i32 to vector<7x1xi32>
    %196 = arith.cmpi eq, %89, %195 : vector<7x1xi32>
    %197 = vector.shape_cast %196 : vector<7x1xi1> to vector<7x1xi1>
    %198 = vector.broadcast %197 : vector<7x1xi1> to vector<7x4xi1>
    %199 = vector.shape_cast %194 : vector<1x4xf32> to vector<1x4xf32>
    %200 = vector.broadcast %199 : vector<1x4xf32> to vector<7x4xf32>
    %201 = arith.select %198, %200, %191 : vector<7x4xi1>, vector<7x4xf32>
    %202 = vector.extract_strided_slice %170 {offsets = [6, 0], sizes = [1, 4], strides = [1, 1]} : vector<14x4xf32> to vector<1x4xf32>
    %203 = vector.extract_strided_slice %170 {offsets = [7, 0], sizes = [1, 4], strides = [1, 1]} : vector<14x4xf32> to vector<1x4xf32>
    %204 = arith.maximumf %202, %203 : vector<1x4xf32>
    %c3_i32_49 = arith.constant 3 : i32
    %205 = vector.broadcast %c3_i32_49 : i32 to vector<7x1xi32>
    %206 = arith.cmpi eq, %89, %205 : vector<7x1xi32>
    %207 = vector.shape_cast %206 : vector<7x1xi1> to vector<7x1xi1>
    %208 = vector.broadcast %207 : vector<7x1xi1> to vector<7x4xi1>
    %209 = vector.shape_cast %204 : vector<1x4xf32> to vector<1x4xf32>
    %210 = vector.broadcast %209 : vector<1x4xf32> to vector<7x4xf32>
    %211 = arith.select %208, %210, %201 : vector<7x4xi1>, vector<7x4xf32>
    %212 = vector.extract_strided_slice %170 {offsets = [8, 0], sizes = [1, 4], strides = [1, 1]} : vector<14x4xf32> to vector<1x4xf32>
    %213 = vector.extract_strided_slice %170 {offsets = [9, 0], sizes = [1, 4], strides = [1, 1]} : vector<14x4xf32> to vector<1x4xf32>
    %214 = arith.maximumf %212, %213 : vector<1x4xf32>
    %c4_i32_50 = arith.constant 4 : i32
    %215 = vector.broadcast %c4_i32_50 : i32 to vector<7x1xi32>
    %216 = arith.cmpi eq, %89, %215 : vector<7x1xi32>
    %217 = vector.shape_cast %216 : vector<7x1xi1> to vector<7x1xi1>
    %218 = vector.broadcast %217 : vector<7x1xi1> to vector<7x4xi1>
    %219 = vector.shape_cast %214 : vector<1x4xf32> to vector<1x4xf32>
    %220 = vector.broadcast %219 : vector<1x4xf32> to vector<7x4xf32>
    %221 = arith.select %218, %220, %211 : vector<7x4xi1>, vector<7x4xf32>
    %222 = vector.extract_strided_slice %170 {offsets = [10, 0], sizes = [1, 4], strides = [1, 1]} : vector<14x4xf32> to vector<1x4xf32>
    %223 = vector.extract_strided_slice %170 {offsets = [11, 0], sizes = [1, 4], strides = [1, 1]} : vector<14x4xf32> to vector<1x4xf32>
    %224 = arith.maximumf %222, %223 : vector<1x4xf32>
    %c5_i32_51 = arith.constant 5 : i32
    %225 = vector.broadcast %c5_i32_51 : i32 to vector<7x1xi32>
    %226 = arith.cmpi eq, %89, %225 : vector<7x1xi32>
    %227 = vector.shape_cast %226 : vector<7x1xi1> to vector<7x1xi1>
    %228 = vector.broadcast %227 : vector<7x1xi1> to vector<7x4xi1>
    %229 = vector.shape_cast %224 : vector<1x4xf32> to vector<1x4xf32>
    %230 = vector.broadcast %229 : vector<1x4xf32> to vector<7x4xf32>
    %231 = arith.select %228, %230, %221 : vector<7x4xi1>, vector<7x4xf32>
    %232 = vector.extract_strided_slice %170 {offsets = [12, 0], sizes = [1, 4], strides = [1, 1]} : vector<14x4xf32> to vector<1x4xf32>
    %233 = vector.extract_strided_slice %170 {offsets = [13, 0], sizes = [1, 4], strides = [1, 1]} : vector<14x4xf32> to vector<1x4xf32>
    %234 = arith.maximumf %232, %233 : vector<1x4xf32>
    %c6_i32_52 = arith.constant 6 : i32
    %235 = vector.broadcast %c6_i32_52 : i32 to vector<7x1xi32>
    %236 = arith.cmpi eq, %89, %235 : vector<7x1xi32>
    %237 = vector.shape_cast %236 : vector<7x1xi1> to vector<7x1xi1>
    %238 = vector.broadcast %237 : vector<7x1xi1> to vector<7x4xi1>
    %239 = vector.shape_cast %234 : vector<1x4xf32> to vector<1x4xf32>
    %240 = vector.broadcast %239 : vector<1x4xf32> to vector<7x4xf32>
    %241 = arith.select %238, %240, %231 : vector<7x4xi1>, vector<7x4xf32>
    %242 = vector.extract_strided_slice %88 {offsets = [4, 0, 0], sizes = [1, 14, 4], strides = [1, 1, 1]} : vector<14x14x4xf32> to vector<1x14x4xf32>
    %243 = vector.shape_cast %242 : vector<1x14x4xf32> to vector<14x4xf32>
    %244 = vector.extract_strided_slice %88 {offsets = [5, 0, 0], sizes = [1, 14, 4], strides = [1, 1, 1]} : vector<14x14x4xf32> to vector<1x14x4xf32>
    %245 = vector.shape_cast %244 : vector<1x14x4xf32> to vector<14x4xf32>
    %246 = arith.maximumf %243, %245 : vector<14x4xf32>
    %cst_53 = arith.constant 0.000000e+00 : f32
    %247 = vector.broadcast %cst_53 : f32 to vector<7x4xf32>
    %248 = vector.extract_strided_slice %246 {offsets = [0, 0], sizes = [1, 4], strides = [1, 1]} : vector<14x4xf32> to vector<1x4xf32>
    %249 = vector.extract_strided_slice %246 {offsets = [1, 0], sizes = [1, 4], strides = [1, 1]} : vector<14x4xf32> to vector<1x4xf32>
    %250 = arith.maximumf %248, %249 : vector<1x4xf32>
    %c0_i32_54 = arith.constant 0 : i32
    %251 = vector.broadcast %c0_i32_54 : i32 to vector<7x1xi32>
    %252 = arith.cmpi eq, %89, %251 : vector<7x1xi32>
    %253 = vector.shape_cast %252 : vector<7x1xi1> to vector<7x1xi1>
    %254 = vector.broadcast %253 : vector<7x1xi1> to vector<7x4xi1>
    %255 = vector.shape_cast %250 : vector<1x4xf32> to vector<1x4xf32>
    %256 = vector.broadcast %255 : vector<1x4xf32> to vector<7x4xf32>
    %257 = arith.select %254, %256, %247 : vector<7x4xi1>, vector<7x4xf32>
    %258 = vector.extract_strided_slice %246 {offsets = [2, 0], sizes = [1, 4], strides = [1, 1]} : vector<14x4xf32> to vector<1x4xf32>
    %259 = vector.extract_strided_slice %246 {offsets = [3, 0], sizes = [1, 4], strides = [1, 1]} : vector<14x4xf32> to vector<1x4xf32>
    %260 = arith.maximumf %258, %259 : vector<1x4xf32>
    %c1_i32_55 = arith.constant 1 : i32
    %261 = vector.broadcast %c1_i32_55 : i32 to vector<7x1xi32>
    %262 = arith.cmpi eq, %89, %261 : vector<7x1xi32>
    %263 = vector.shape_cast %262 : vector<7x1xi1> to vector<7x1xi1>
    %264 = vector.broadcast %263 : vector<7x1xi1> to vector<7x4xi1>
    %265 = vector.shape_cast %260 : vector<1x4xf32> to vector<1x4xf32>
    %266 = vector.broadcast %265 : vector<1x4xf32> to vector<7x4xf32>
    %267 = arith.select %264, %266, %257 : vector<7x4xi1>, vector<7x4xf32>
    %268 = vector.extract_strided_slice %246 {offsets = [4, 0], sizes = [1, 4], strides = [1, 1]} : vector<14x4xf32> to vector<1x4xf32>
    %269 = vector.extract_strided_slice %246 {offsets = [5, 0], sizes = [1, 4], strides = [1, 1]} : vector<14x4xf32> to vector<1x4xf32>
    %270 = arith.maximumf %268, %269 : vector<1x4xf32>
    %c2_i32_56 = arith.constant 2 : i32
    %271 = vector.broadcast %c2_i32_56 : i32 to vector<7x1xi32>
    %272 = arith.cmpi eq, %89, %271 : vector<7x1xi32>
    %273 = vector.shape_cast %272 : vector<7x1xi1> to vector<7x1xi1>
    %274 = vector.broadcast %273 : vector<7x1xi1> to vector<7x4xi1>
    %275 = vector.shape_cast %270 : vector<1x4xf32> to vector<1x4xf32>
    %276 = vector.broadcast %275 : vector<1x4xf32> to vector<7x4xf32>
    %277 = arith.select %274, %276, %267 : vector<7x4xi1>, vector<7x4xf32>
    %278 = vector.extract_strided_slice %246 {offsets = [6, 0], sizes = [1, 4], strides = [1, 1]} : vector<14x4xf32> to vector<1x4xf32>
    %279 = vector.extract_strided_slice %246 {offsets = [7, 0], sizes = [1, 4], strides = [1, 1]} : vector<14x4xf32> to vector<1x4xf32>
    %280 = arith.maximumf %278, %279 : vector<1x4xf32>
    %c3_i32_57 = arith.constant 3 : i32
    %281 = vector.broadcast %c3_i32_57 : i32 to vector<7x1xi32>
    %282 = arith.cmpi eq, %89, %281 : vector<7x1xi32>
    %283 = vector.shape_cast %282 : vector<7x1xi1> to vector<7x1xi1>
    %284 = vector.broadcast %283 : vector<7x1xi1> to vector<7x4xi1>
    %285 = vector.shape_cast %280 : vector<1x4xf32> to vector<1x4xf32>
    %286 = vector.broadcast %285 : vector<1x4xf32> to vector<7x4xf32>
    %287 = arith.select %284, %286, %277 : vector<7x4xi1>, vector<7x4xf32>
    %288 = vector.extract_strided_slice %246 {offsets = [8, 0], sizes = [1, 4], strides = [1, 1]} : vector<14x4xf32> to vector<1x4xf32>
    %289 = vector.extract_strided_slice %246 {offsets = [9, 0], sizes = [1, 4], strides = [1, 1]} : vector<14x4xf32> to vector<1x4xf32>
    %290 = arith.maximumf %288, %289 : vector<1x4xf32>
    %c4_i32_58 = arith.constant 4 : i32
    %291 = vector.broadcast %c4_i32_58 : i32 to vector<7x1xi32>
    %292 = arith.cmpi eq, %89, %291 : vector<7x1xi32>
    %293 = vector.shape_cast %292 : vector<7x1xi1> to vector<7x1xi1>
    %294 = vector.broadcast %293 : vector<7x1xi1> to vector<7x4xi1>
    %295 = vector.shape_cast %290 : vector<1x4xf32> to vector<1x4xf32>
    %296 = vector.broadcast %295 : vector<1x4xf32> to vector<7x4xf32>
    %297 = arith.select %294, %296, %287 : vector<7x4xi1>, vector<7x4xf32>
    %298 = vector.extract_strided_slice %246 {offsets = [10, 0], sizes = [1, 4], strides = [1, 1]} : vector<14x4xf32> to vector<1x4xf32>
    %299 = vector.extract_strided_slice %246 {offsets = [11, 0], sizes = [1, 4], strides = [1, 1]} : vector<14x4xf32> to vector<1x4xf32>
    %300 = arith.maximumf %298, %299 : vector<1x4xf32>
    %c5_i32_59 = arith.constant 5 : i32
    %301 = vector.broadcast %c5_i32_59 : i32 to vector<7x1xi32>
    %302 = arith.cmpi eq, %89, %301 : vector<7x1xi32>
    %303 = vector.shape_cast %302 : vector<7x1xi1> to vector<7x1xi1>
    %304 = vector.broadcast %303 : vector<7x1xi1> to vector<7x4xi1>
    %305 = vector.shape_cast %300 : vector<1x4xf32> to vector<1x4xf32>
    %306 = vector.broadcast %305 : vector<1x4xf32> to vector<7x4xf32>
    %307 = arith.select %304, %306, %297 : vector<7x4xi1>, vector<7x4xf32>
    %308 = vector.extract_strided_slice %246 {offsets = [12, 0], sizes = [1, 4], strides = [1, 1]} : vector<14x4xf32> to vector<1x4xf32>
    %309 = vector.extract_strided_slice %246 {offsets = [13, 0], sizes = [1, 4], strides = [1, 1]} : vector<14x4xf32> to vector<1x4xf32>
    %310 = arith.maximumf %308, %309 : vector<1x4xf32>
    %c6_i32_60 = arith.constant 6 : i32
    %311 = vector.broadcast %c6_i32_60 : i32 to vector<7x1xi32>
    %312 = arith.cmpi eq, %89, %311 : vector<7x1xi32>
    %313 = vector.shape_cast %312 : vector<7x1xi1> to vector<7x1xi1>
    %314 = vector.broadcast %313 : vector<7x1xi1> to vector<7x4xi1>
    %315 = vector.shape_cast %310 : vector<1x4xf32> to vector<1x4xf32>
    %316 = vector.broadcast %315 : vector<1x4xf32> to vector<7x4xf32>
    %317 = arith.select %314, %316, %307 : vector<7x4xi1>, vector<7x4xf32>
    %318 = vector.extract_strided_slice %88 {offsets = [6, 0, 0], sizes = [1, 14, 4], strides = [1, 1, 1]} : vector<14x14x4xf32> to vector<1x14x4xf32>
    %319 = vector.shape_cast %318 : vector<1x14x4xf32> to vector<14x4xf32>
    %320 = vector.extract_strided_slice %88 {offsets = [7, 0, 0], sizes = [1, 14, 4], strides = [1, 1, 1]} : vector<14x14x4xf32> to vector<1x14x4xf32>
    %321 = vector.shape_cast %320 : vector<1x14x4xf32> to vector<14x4xf32>
    %322 = arith.maximumf %319, %321 : vector<14x4xf32>
    %cst_61 = arith.constant 0.000000e+00 : f32
    %323 = vector.broadcast %cst_61 : f32 to vector<7x4xf32>
    %324 = vector.extract_strided_slice %322 {offsets = [0, 0], sizes = [1, 4], strides = [1, 1]} : vector<14x4xf32> to vector<1x4xf32>
    %325 = vector.extract_strided_slice %322 {offsets = [1, 0], sizes = [1, 4], strides = [1, 1]} : vector<14x4xf32> to vector<1x4xf32>
    %326 = arith.maximumf %324, %325 : vector<1x4xf32>
    %c0_i32_62 = arith.constant 0 : i32
    %327 = vector.broadcast %c0_i32_62 : i32 to vector<7x1xi32>
    %328 = arith.cmpi eq, %89, %327 : vector<7x1xi32>
    %329 = vector.shape_cast %328 : vector<7x1xi1> to vector<7x1xi1>
    %330 = vector.broadcast %329 : vector<7x1xi1> to vector<7x4xi1>
    %331 = vector.shape_cast %326 : vector<1x4xf32> to vector<1x4xf32>
    %332 = vector.broadcast %331 : vector<1x4xf32> to vector<7x4xf32>
    %333 = arith.select %330, %332, %323 : vector<7x4xi1>, vector<7x4xf32>
    %334 = vector.extract_strided_slice %322 {offsets = [2, 0], sizes = [1, 4], strides = [1, 1]} : vector<14x4xf32> to vector<1x4xf32>
    %335 = vector.extract_strided_slice %322 {offsets = [3, 0], sizes = [1, 4], strides = [1, 1]} : vector<14x4xf32> to vector<1x4xf32>
    %336 = arith.maximumf %334, %335 : vector<1x4xf32>
    %c1_i32_63 = arith.constant 1 : i32
    %337 = vector.broadcast %c1_i32_63 : i32 to vector<7x1xi32>
    %338 = arith.cmpi eq, %89, %337 : vector<7x1xi32>
    %339 = vector.shape_cast %338 : vector<7x1xi1> to vector<7x1xi1>
    %340 = vector.broadcast %339 : vector<7x1xi1> to vector<7x4xi1>
    %341 = vector.shape_cast %336 : vector<1x4xf32> to vector<1x4xf32>
    %342 = vector.broadcast %341 : vector<1x4xf32> to vector<7x4xf32>
    %343 = arith.select %340, %342, %333 : vector<7x4xi1>, vector<7x4xf32>
    %344 = vector.extract_strided_slice %322 {offsets = [4, 0], sizes = [1, 4], strides = [1, 1]} : vector<14x4xf32> to vector<1x4xf32>
    %345 = vector.extract_strided_slice %322 {offsets = [5, 0], sizes = [1, 4], strides = [1, 1]} : vector<14x4xf32> to vector<1x4xf32>
    %346 = arith.maximumf %344, %345 : vector<1x4xf32>
    %c2_i32_64 = arith.constant 2 : i32
    %347 = vector.broadcast %c2_i32_64 : i32 to vector<7x1xi32>
    %348 = arith.cmpi eq, %89, %347 : vector<7x1xi32>
    %349 = vector.shape_cast %348 : vector<7x1xi1> to vector<7x1xi1>
    %350 = vector.broadcast %349 : vector<7x1xi1> to vector<7x4xi1>
    %351 = vector.shape_cast %346 : vector<1x4xf32> to vector<1x4xf32>
    %352 = vector.broadcast %351 : vector<1x4xf32> to vector<7x4xf32>
    %353 = arith.select %350, %352, %343 : vector<7x4xi1>, vector<7x4xf32>
    %354 = vector.extract_strided_slice %322 {offsets = [6, 0], sizes = [1, 4], strides = [1, 1]} : vector<14x4xf32> to vector<1x4xf32>
    %355 = vector.extract_strided_slice %322 {offsets = [7, 0], sizes = [1, 4], strides = [1, 1]} : vector<14x4xf32> to vector<1x4xf32>
    %356 = arith.maximumf %354, %355 : vector<1x4xf32>
    %c3_i32_65 = arith.constant 3 : i32
    %357 = vector.broadcast %c3_i32_65 : i32 to vector<7x1xi32>
    %358 = arith.cmpi eq, %89, %357 : vector<7x1xi32>
    %359 = vector.shape_cast %358 : vector<7x1xi1> to vector<7x1xi1>
    %360 = vector.broadcast %359 : vector<7x1xi1> to vector<7x4xi1>
    %361 = vector.shape_cast %356 : vector<1x4xf32> to vector<1x4xf32>
    %362 = vector.broadcast %361 : vector<1x4xf32> to vector<7x4xf32>
    %363 = arith.select %360, %362, %353 : vector<7x4xi1>, vector<7x4xf32>
    %364 = vector.extract_strided_slice %322 {offsets = [8, 0], sizes = [1, 4], strides = [1, 1]} : vector<14x4xf32> to vector<1x4xf32>
    %365 = vector.extract_strided_slice %322 {offsets = [9, 0], sizes = [1, 4], strides = [1, 1]} : vector<14x4xf32> to vector<1x4xf32>
    %366 = arith.maximumf %364, %365 : vector<1x4xf32>
    %c4_i32_66 = arith.constant 4 : i32
    %367 = vector.broadcast %c4_i32_66 : i32 to vector<7x1xi32>
    %368 = arith.cmpi eq, %89, %367 : vector<7x1xi32>
    %369 = vector.shape_cast %368 : vector<7x1xi1> to vector<7x1xi1>
    %370 = vector.broadcast %369 : vector<7x1xi1> to vector<7x4xi1>
    %371 = vector.shape_cast %366 : vector<1x4xf32> to vector<1x4xf32>
    %372 = vector.broadcast %371 : vector<1x4xf32> to vector<7x4xf32>
    %373 = arith.select %370, %372, %363 : vector<7x4xi1>, vector<7x4xf32>
    %374 = vector.extract_strided_slice %322 {offsets = [10, 0], sizes = [1, 4], strides = [1, 1]} : vector<14x4xf32> to vector<1x4xf32>
    %375 = vector.extract_strided_slice %322 {offsets = [11, 0], sizes = [1, 4], strides = [1, 1]} : vector<14x4xf32> to vector<1x4xf32>
    %376 = arith.maximumf %374, %375 : vector<1x4xf32>
    %c5_i32_67 = arith.constant 5 : i32
    %377 = vector.broadcast %c5_i32_67 : i32 to vector<7x1xi32>
    %378 = arith.cmpi eq, %89, %377 : vector<7x1xi32>
    %379 = vector.shape_cast %378 : vector<7x1xi1> to vector<7x1xi1>
    %380 = vector.broadcast %379 : vector<7x1xi1> to vector<7x4xi1>
    %381 = vector.shape_cast %376 : vector<1x4xf32> to vector<1x4xf32>
    %382 = vector.broadcast %381 : vector<1x4xf32> to vector<7x4xf32>
    %383 = arith.select %380, %382, %373 : vector<7x4xi1>, vector<7x4xf32>
    %384 = vector.extract_strided_slice %322 {offsets = [12, 0], sizes = [1, 4], strides = [1, 1]} : vector<14x4xf32> to vector<1x4xf32>
    %385 = vector.extract_strided_slice %322 {offsets = [13, 0], sizes = [1, 4], strides = [1, 1]} : vector<14x4xf32> to vector<1x4xf32>
    %386 = arith.maximumf %384, %385 : vector<1x4xf32>
    %c6_i32_68 = arith.constant 6 : i32
    %387 = vector.broadcast %c6_i32_68 : i32 to vector<7x1xi32>
    %388 = arith.cmpi eq, %89, %387 : vector<7x1xi32>
    %389 = vector.shape_cast %388 : vector<7x1xi1> to vector<7x1xi1>
    %390 = vector.broadcast %389 : vector<7x1xi1> to vector<7x4xi1>
    %391 = vector.shape_cast %386 : vector<1x4xf32> to vector<1x4xf32>
    %392 = vector.broadcast %391 : vector<1x4xf32> to vector<7x4xf32>
    %393 = arith.select %390, %392, %383 : vector<7x4xi1>, vector<7x4xf32>
    %394 = vector.extract_strided_slice %88 {offsets = [8, 0, 0], sizes = [1, 14, 4], strides = [1, 1, 1]} : vector<14x14x4xf32> to vector<1x14x4xf32>
    %395 = vector.shape_cast %394 : vector<1x14x4xf32> to vector<14x4xf32>
    %396 = vector.extract_strided_slice %88 {offsets = [9, 0, 0], sizes = [1, 14, 4], strides = [1, 1, 1]} : vector<14x14x4xf32> to vector<1x14x4xf32>
    %397 = vector.shape_cast %396 : vector<1x14x4xf32> to vector<14x4xf32>
    %398 = arith.maximumf %395, %397 : vector<14x4xf32>
    %cst_69 = arith.constant 0.000000e+00 : f32
    %399 = vector.broadcast %cst_69 : f32 to vector<7x4xf32>
    %400 = vector.extract_strided_slice %398 {offsets = [0, 0], sizes = [1, 4], strides = [1, 1]} : vector<14x4xf32> to vector<1x4xf32>
    %401 = vector.extract_strided_slice %398 {offsets = [1, 0], sizes = [1, 4], strides = [1, 1]} : vector<14x4xf32> to vector<1x4xf32>
    %402 = arith.maximumf %400, %401 : vector<1x4xf32>
    %c0_i32_70 = arith.constant 0 : i32
    %403 = vector.broadcast %c0_i32_70 : i32 to vector<7x1xi32>
    %404 = arith.cmpi eq, %89, %403 : vector<7x1xi32>
    %405 = vector.shape_cast %404 : vector<7x1xi1> to vector<7x1xi1>
    %406 = vector.broadcast %405 : vector<7x1xi1> to vector<7x4xi1>
    %407 = vector.shape_cast %402 : vector<1x4xf32> to vector<1x4xf32>
    %408 = vector.broadcast %407 : vector<1x4xf32> to vector<7x4xf32>
    %409 = arith.select %406, %408, %399 : vector<7x4xi1>, vector<7x4xf32>
    %410 = vector.extract_strided_slice %398 {offsets = [2, 0], sizes = [1, 4], strides = [1, 1]} : vector<14x4xf32> to vector<1x4xf32>
    %411 = vector.extract_strided_slice %398 {offsets = [3, 0], sizes = [1, 4], strides = [1, 1]} : vector<14x4xf32> to vector<1x4xf32>
    %412 = arith.maximumf %410, %411 : vector<1x4xf32>
    %c1_i32_71 = arith.constant 1 : i32
    %413 = vector.broadcast %c1_i32_71 : i32 to vector<7x1xi32>
    %414 = arith.cmpi eq, %89, %413 : vector<7x1xi32>
    %415 = vector.shape_cast %414 : vector<7x1xi1> to vector<7x1xi1>
    %416 = vector.broadcast %415 : vector<7x1xi1> to vector<7x4xi1>
    %417 = vector.shape_cast %412 : vector<1x4xf32> to vector<1x4xf32>
    %418 = vector.broadcast %417 : vector<1x4xf32> to vector<7x4xf32>
    %419 = arith.select %416, %418, %409 : vector<7x4xi1>, vector<7x4xf32>
    %420 = vector.extract_strided_slice %398 {offsets = [4, 0], sizes = [1, 4], strides = [1, 1]} : vector<14x4xf32> to vector<1x4xf32>
    %421 = vector.extract_strided_slice %398 {offsets = [5, 0], sizes = [1, 4], strides = [1, 1]} : vector<14x4xf32> to vector<1x4xf32>
    %422 = arith.maximumf %420, %421 : vector<1x4xf32>
    %c2_i32_72 = arith.constant 2 : i32
    %423 = vector.broadcast %c2_i32_72 : i32 to vector<7x1xi32>
    %424 = arith.cmpi eq, %89, %423 : vector<7x1xi32>
    %425 = vector.shape_cast %424 : vector<7x1xi1> to vector<7x1xi1>
    %426 = vector.broadcast %425 : vector<7x1xi1> to vector<7x4xi1>
    %427 = vector.shape_cast %422 : vector<1x4xf32> to vector<1x4xf32>
    %428 = vector.broadcast %427 : vector<1x4xf32> to vector<7x4xf32>
    %429 = arith.select %426, %428, %419 : vector<7x4xi1>, vector<7x4xf32>
    %430 = vector.extract_strided_slice %398 {offsets = [6, 0], sizes = [1, 4], strides = [1, 1]} : vector<14x4xf32> to vector<1x4xf32>
    %431 = vector.extract_strided_slice %398 {offsets = [7, 0], sizes = [1, 4], strides = [1, 1]} : vector<14x4xf32> to vector<1x4xf32>
    %432 = arith.maximumf %430, %431 : vector<1x4xf32>
    %c3_i32_73 = arith.constant 3 : i32
    %433 = vector.broadcast %c3_i32_73 : i32 to vector<7x1xi32>
    %434 = arith.cmpi eq, %89, %433 : vector<7x1xi32>
    %435 = vector.shape_cast %434 : vector<7x1xi1> to vector<7x1xi1>
    %436 = vector.broadcast %435 : vector<7x1xi1> to vector<7x4xi1>
    %437 = vector.shape_cast %432 : vector<1x4xf32> to vector<1x4xf32>
    %438 = vector.broadcast %437 : vector<1x4xf32> to vector<7x4xf32>
    %439 = arith.select %436, %438, %429 : vector<7x4xi1>, vector<7x4xf32>
    %440 = vector.extract_strided_slice %398 {offsets = [8, 0], sizes = [1, 4], strides = [1, 1]} : vector<14x4xf32> to vector<1x4xf32>
    %441 = vector.extract_strided_slice %398 {offsets = [9, 0], sizes = [1, 4], strides = [1, 1]} : vector<14x4xf32> to vector<1x4xf32>
    %442 = arith.maximumf %440, %441 : vector<1x4xf32>
    %c4_i32_74 = arith.constant 4 : i32
    %443 = vector.broadcast %c4_i32_74 : i32 to vector<7x1xi32>
    %444 = arith.cmpi eq, %89, %443 : vector<7x1xi32>
    %445 = vector.shape_cast %444 : vector<7x1xi1> to vector<7x1xi1>
    %446 = vector.broadcast %445 : vector<7x1xi1> to vector<7x4xi1>
    %447 = vector.shape_cast %442 : vector<1x4xf32> to vector<1x4xf32>
    %448 = vector.broadcast %447 : vector<1x4xf32> to vector<7x4xf32>
    %449 = arith.select %446, %448, %439 : vector<7x4xi1>, vector<7x4xf32>
    %450 = vector.extract_strided_slice %398 {offsets = [10, 0], sizes = [1, 4], strides = [1, 1]} : vector<14x4xf32> to vector<1x4xf32>
    %451 = vector.extract_strided_slice %398 {offsets = [11, 0], sizes = [1, 4], strides = [1, 1]} : vector<14x4xf32> to vector<1x4xf32>
    %452 = arith.maximumf %450, %451 : vector<1x4xf32>
    %c5_i32_75 = arith.constant 5 : i32
    %453 = vector.broadcast %c5_i32_75 : i32 to vector<7x1xi32>
    %454 = arith.cmpi eq, %89, %453 : vector<7x1xi32>
    %455 = vector.shape_cast %454 : vector<7x1xi1> to vector<7x1xi1>
    %456 = vector.broadcast %455 : vector<7x1xi1> to vector<7x4xi1>
    %457 = vector.shape_cast %452 : vector<1x4xf32> to vector<1x4xf32>
    %458 = vector.broadcast %457 : vector<1x4xf32> to vector<7x4xf32>
    %459 = arith.select %456, %458, %449 : vector<7x4xi1>, vector<7x4xf32>
    %460 = vector.extract_strided_slice %398 {offsets = [12, 0], sizes = [1, 4], strides = [1, 1]} : vector<14x4xf32> to vector<1x4xf32>
    %461 = vector.extract_strided_slice %398 {offsets = [13, 0], sizes = [1, 4], strides = [1, 1]} : vector<14x4xf32> to vector<1x4xf32>
    %462 = arith.maximumf %460, %461 : vector<1x4xf32>
    %c6_i32_76 = arith.constant 6 : i32
    %463 = vector.broadcast %c6_i32_76 : i32 to vector<7x1xi32>
    %464 = arith.cmpi eq, %89, %463 : vector<7x1xi32>
    %465 = vector.shape_cast %464 : vector<7x1xi1> to vector<7x1xi1>
    %466 = vector.broadcast %465 : vector<7x1xi1> to vector<7x4xi1>
    %467 = vector.shape_cast %462 : vector<1x4xf32> to vector<1x4xf32>
    %468 = vector.broadcast %467 : vector<1x4xf32> to vector<7x4xf32>
    %469 = arith.select %466, %468, %459 : vector<7x4xi1>, vector<7x4xf32>
    %470 = vector.extract_strided_slice %88 {offsets = [10, 0, 0], sizes = [1, 14, 4], strides = [1, 1, 1]} : vector<14x14x4xf32> to vector<1x14x4xf32>
    %471 = vector.shape_cast %470 : vector<1x14x4xf32> to vector<14x4xf32>
    %472 = vector.extract_strided_slice %88 {offsets = [11, 0, 0], sizes = [1, 14, 4], strides = [1, 1, 1]} : vector<14x14x4xf32> to vector<1x14x4xf32>
    %473 = vector.shape_cast %472 : vector<1x14x4xf32> to vector<14x4xf32>
    %474 = arith.maximumf %471, %473 : vector<14x4xf32>
    %cst_77 = arith.constant 0.000000e+00 : f32
    %475 = vector.broadcast %cst_77 : f32 to vector<7x4xf32>
    %476 = vector.extract_strided_slice %474 {offsets = [0, 0], sizes = [1, 4], strides = [1, 1]} : vector<14x4xf32> to vector<1x4xf32>
    %477 = vector.extract_strided_slice %474 {offsets = [1, 0], sizes = [1, 4], strides = [1, 1]} : vector<14x4xf32> to vector<1x4xf32>
    %478 = arith.maximumf %476, %477 : vector<1x4xf32>
    %c0_i32_78 = arith.constant 0 : i32
    %479 = vector.broadcast %c0_i32_78 : i32 to vector<7x1xi32>
    %480 = arith.cmpi eq, %89, %479 : vector<7x1xi32>
    %481 = vector.shape_cast %480 : vector<7x1xi1> to vector<7x1xi1>
    %482 = vector.broadcast %481 : vector<7x1xi1> to vector<7x4xi1>
    %483 = vector.shape_cast %478 : vector<1x4xf32> to vector<1x4xf32>
    %484 = vector.broadcast %483 : vector<1x4xf32> to vector<7x4xf32>
    %485 = arith.select %482, %484, %475 : vector<7x4xi1>, vector<7x4xf32>
    %486 = vector.extract_strided_slice %474 {offsets = [2, 0], sizes = [1, 4], strides = [1, 1]} : vector<14x4xf32> to vector<1x4xf32>
    %487 = vector.extract_strided_slice %474 {offsets = [3, 0], sizes = [1, 4], strides = [1, 1]} : vector<14x4xf32> to vector<1x4xf32>
    %488 = arith.maximumf %486, %487 : vector<1x4xf32>
    %c1_i32_79 = arith.constant 1 : i32
    %489 = vector.broadcast %c1_i32_79 : i32 to vector<7x1xi32>
    %490 = arith.cmpi eq, %89, %489 : vector<7x1xi32>
    %491 = vector.shape_cast %490 : vector<7x1xi1> to vector<7x1xi1>
    %492 = vector.broadcast %491 : vector<7x1xi1> to vector<7x4xi1>
    %493 = vector.shape_cast %488 : vector<1x4xf32> to vector<1x4xf32>
    %494 = vector.broadcast %493 : vector<1x4xf32> to vector<7x4xf32>
    %495 = arith.select %492, %494, %485 : vector<7x4xi1>, vector<7x4xf32>
    %496 = vector.extract_strided_slice %474 {offsets = [4, 0], sizes = [1, 4], strides = [1, 1]} : vector<14x4xf32> to vector<1x4xf32>
    %497 = vector.extract_strided_slice %474 {offsets = [5, 0], sizes = [1, 4], strides = [1, 1]} : vector<14x4xf32> to vector<1x4xf32>
    %498 = arith.maximumf %496, %497 : vector<1x4xf32>
    %c2_i32_80 = arith.constant 2 : i32
    %499 = vector.broadcast %c2_i32_80 : i32 to vector<7x1xi32>
    %500 = arith.cmpi eq, %89, %499 : vector<7x1xi32>
    %501 = vector.shape_cast %500 : vector<7x1xi1> to vector<7x1xi1>
    %502 = vector.broadcast %501 : vector<7x1xi1> to vector<7x4xi1>
    %503 = vector.shape_cast %498 : vector<1x4xf32> to vector<1x4xf32>
    %504 = vector.broadcast %503 : vector<1x4xf32> to vector<7x4xf32>
    %505 = arith.select %502, %504, %495 : vector<7x4xi1>, vector<7x4xf32>
    %506 = vector.extract_strided_slice %474 {offsets = [6, 0], sizes = [1, 4], strides = [1, 1]} : vector<14x4xf32> to vector<1x4xf32>
    %507 = vector.extract_strided_slice %474 {offsets = [7, 0], sizes = [1, 4], strides = [1, 1]} : vector<14x4xf32> to vector<1x4xf32>
    %508 = arith.maximumf %506, %507 : vector<1x4xf32>
    %c3_i32_81 = arith.constant 3 : i32
    %509 = vector.broadcast %c3_i32_81 : i32 to vector<7x1xi32>
    %510 = arith.cmpi eq, %89, %509 : vector<7x1xi32>
    %511 = vector.shape_cast %510 : vector<7x1xi1> to vector<7x1xi1>
    %512 = vector.broadcast %511 : vector<7x1xi1> to vector<7x4xi1>
    %513 = vector.shape_cast %508 : vector<1x4xf32> to vector<1x4xf32>
    %514 = vector.broadcast %513 : vector<1x4xf32> to vector<7x4xf32>
    %515 = arith.select %512, %514, %505 : vector<7x4xi1>, vector<7x4xf32>
    %516 = vector.extract_strided_slice %474 {offsets = [8, 0], sizes = [1, 4], strides = [1, 1]} : vector<14x4xf32> to vector<1x4xf32>
    %517 = vector.extract_strided_slice %474 {offsets = [9, 0], sizes = [1, 4], strides = [1, 1]} : vector<14x4xf32> to vector<1x4xf32>
    %518 = arith.maximumf %516, %517 : vector<1x4xf32>
    %c4_i32_82 = arith.constant 4 : i32
    %519 = vector.broadcast %c4_i32_82 : i32 to vector<7x1xi32>
    %520 = arith.cmpi eq, %89, %519 : vector<7x1xi32>
    %521 = vector.shape_cast %520 : vector<7x1xi1> to vector<7x1xi1>
    %522 = vector.broadcast %521 : vector<7x1xi1> to vector<7x4xi1>
    %523 = vector.shape_cast %518 : vector<1x4xf32> to vector<1x4xf32>
    %524 = vector.broadcast %523 : vector<1x4xf32> to vector<7x4xf32>
    %525 = arith.select %522, %524, %515 : vector<7x4xi1>, vector<7x4xf32>
    %526 = vector.extract_strided_slice %474 {offsets = [10, 0], sizes = [1, 4], strides = [1, 1]} : vector<14x4xf32> to vector<1x4xf32>
    %527 = vector.extract_strided_slice %474 {offsets = [11, 0], sizes = [1, 4], strides = [1, 1]} : vector<14x4xf32> to vector<1x4xf32>
    %528 = arith.maximumf %526, %527 : vector<1x4xf32>
    %c5_i32_83 = arith.constant 5 : i32
    %529 = vector.broadcast %c5_i32_83 : i32 to vector<7x1xi32>
    %530 = arith.cmpi eq, %89, %529 : vector<7x1xi32>
    %531 = vector.shape_cast %530 : vector<7x1xi1> to vector<7x1xi1>
    %532 = vector.broadcast %531 : vector<7x1xi1> to vector<7x4xi1>
    %533 = vector.shape_cast %528 : vector<1x4xf32> to vector<1x4xf32>
    %534 = vector.broadcast %533 : vector<1x4xf32> to vector<7x4xf32>
    %535 = arith.select %532, %534, %525 : vector<7x4xi1>, vector<7x4xf32>
    %536 = vector.extract_strided_slice %474 {offsets = [12, 0], sizes = [1, 4], strides = [1, 1]} : vector<14x4xf32> to vector<1x4xf32>
    %537 = vector.extract_strided_slice %474 {offsets = [13, 0], sizes = [1, 4], strides = [1, 1]} : vector<14x4xf32> to vector<1x4xf32>
    %538 = arith.maximumf %536, %537 : vector<1x4xf32>
    %c6_i32_84 = arith.constant 6 : i32
    %539 = vector.broadcast %c6_i32_84 : i32 to vector<7x1xi32>
    %540 = arith.cmpi eq, %89, %539 : vector<7x1xi32>
    %541 = vector.shape_cast %540 : vector<7x1xi1> to vector<7x1xi1>
    %542 = vector.broadcast %541 : vector<7x1xi1> to vector<7x4xi1>
    %543 = vector.shape_cast %538 : vector<1x4xf32> to vector<1x4xf32>
    %544 = vector.broadcast %543 : vector<1x4xf32> to vector<7x4xf32>
    %545 = arith.select %542, %544, %535 : vector<7x4xi1>, vector<7x4xf32>
    %546 = vector.extract_strided_slice %88 {offsets = [12, 0, 0], sizes = [1, 14, 4], strides = [1, 1, 1]} : vector<14x14x4xf32> to vector<1x14x4xf32>
    %547 = vector.shape_cast %546 : vector<1x14x4xf32> to vector<14x4xf32>
    %548 = vector.extract_strided_slice %88 {offsets = [13, 0, 0], sizes = [1, 14, 4], strides = [1, 1, 1]} : vector<14x14x4xf32> to vector<1x14x4xf32>
    %549 = vector.shape_cast %548 : vector<1x14x4xf32> to vector<14x4xf32>
    %550 = arith.maximumf %547, %549 : vector<14x4xf32>
    %cst_85 = arith.constant 0.000000e+00 : f32
    %551 = vector.broadcast %cst_85 : f32 to vector<7x4xf32>
    %552 = vector.extract_strided_slice %550 {offsets = [0, 0], sizes = [1, 4], strides = [1, 1]} : vector<14x4xf32> to vector<1x4xf32>
    %553 = vector.extract_strided_slice %550 {offsets = [1, 0], sizes = [1, 4], strides = [1, 1]} : vector<14x4xf32> to vector<1x4xf32>
    %554 = arith.maximumf %552, %553 : vector<1x4xf32>
    %c0_i32_86 = arith.constant 0 : i32
    %555 = vector.broadcast %c0_i32_86 : i32 to vector<7x1xi32>
    %556 = arith.cmpi eq, %89, %555 : vector<7x1xi32>
    %557 = vector.shape_cast %556 : vector<7x1xi1> to vector<7x1xi1>
    %558 = vector.broadcast %557 : vector<7x1xi1> to vector<7x4xi1>
    %559 = vector.shape_cast %554 : vector<1x4xf32> to vector<1x4xf32>
    %560 = vector.broadcast %559 : vector<1x4xf32> to vector<7x4xf32>
    %561 = arith.select %558, %560, %551 : vector<7x4xi1>, vector<7x4xf32>
    %562 = vector.extract_strided_slice %550 {offsets = [2, 0], sizes = [1, 4], strides = [1, 1]} : vector<14x4xf32> to vector<1x4xf32>
    %563 = vector.extract_strided_slice %550 {offsets = [3, 0], sizes = [1, 4], strides = [1, 1]} : vector<14x4xf32> to vector<1x4xf32>
    %564 = arith.maximumf %562, %563 : vector<1x4xf32>
    %c1_i32_87 = arith.constant 1 : i32
    %565 = vector.broadcast %c1_i32_87 : i32 to vector<7x1xi32>
    %566 = arith.cmpi eq, %89, %565 : vector<7x1xi32>
    %567 = vector.shape_cast %566 : vector<7x1xi1> to vector<7x1xi1>
    %568 = vector.broadcast %567 : vector<7x1xi1> to vector<7x4xi1>
    %569 = vector.shape_cast %564 : vector<1x4xf32> to vector<1x4xf32>
    %570 = vector.broadcast %569 : vector<1x4xf32> to vector<7x4xf32>
    %571 = arith.select %568, %570, %561 : vector<7x4xi1>, vector<7x4xf32>
    %572 = vector.extract_strided_slice %550 {offsets = [4, 0], sizes = [1, 4], strides = [1, 1]} : vector<14x4xf32> to vector<1x4xf32>
    %573 = vector.extract_strided_slice %550 {offsets = [5, 0], sizes = [1, 4], strides = [1, 1]} : vector<14x4xf32> to vector<1x4xf32>
    %574 = arith.maximumf %572, %573 : vector<1x4xf32>
    %c2_i32_88 = arith.constant 2 : i32
    %575 = vector.broadcast %c2_i32_88 : i32 to vector<7x1xi32>
    %576 = arith.cmpi eq, %89, %575 : vector<7x1xi32>
    %577 = vector.shape_cast %576 : vector<7x1xi1> to vector<7x1xi1>
    %578 = vector.broadcast %577 : vector<7x1xi1> to vector<7x4xi1>
    %579 = vector.shape_cast %574 : vector<1x4xf32> to vector<1x4xf32>
    %580 = vector.broadcast %579 : vector<1x4xf32> to vector<7x4xf32>
    %581 = arith.select %578, %580, %571 : vector<7x4xi1>, vector<7x4xf32>
    %582 = vector.extract_strided_slice %550 {offsets = [6, 0], sizes = [1, 4], strides = [1, 1]} : vector<14x4xf32> to vector<1x4xf32>
    %583 = vector.extract_strided_slice %550 {offsets = [7, 0], sizes = [1, 4], strides = [1, 1]} : vector<14x4xf32> to vector<1x4xf32>
    %584 = arith.maximumf %582, %583 : vector<1x4xf32>
    %c3_i32_89 = arith.constant 3 : i32
    %585 = vector.broadcast %c3_i32_89 : i32 to vector<7x1xi32>
    %586 = arith.cmpi eq, %89, %585 : vector<7x1xi32>
    %587 = vector.shape_cast %586 : vector<7x1xi1> to vector<7x1xi1>
    %588 = vector.broadcast %587 : vector<7x1xi1> to vector<7x4xi1>
    %589 = vector.shape_cast %584 : vector<1x4xf32> to vector<1x4xf32>
    %590 = vector.broadcast %589 : vector<1x4xf32> to vector<7x4xf32>
    %591 = arith.select %588, %590, %581 : vector<7x4xi1>, vector<7x4xf32>
    %592 = vector.extract_strided_slice %550 {offsets = [8, 0], sizes = [1, 4], strides = [1, 1]} : vector<14x4xf32> to vector<1x4xf32>
    %593 = vector.extract_strided_slice %550 {offsets = [9, 0], sizes = [1, 4], strides = [1, 1]} : vector<14x4xf32> to vector<1x4xf32>
    %594 = arith.maximumf %592, %593 : vector<1x4xf32>
    %c4_i32_90 = arith.constant 4 : i32
    %595 = vector.broadcast %c4_i32_90 : i32 to vector<7x1xi32>
    %596 = arith.cmpi eq, %89, %595 : vector<7x1xi32>
    %597 = vector.shape_cast %596 : vector<7x1xi1> to vector<7x1xi1>
    %598 = vector.broadcast %597 : vector<7x1xi1> to vector<7x4xi1>
    %599 = vector.shape_cast %594 : vector<1x4xf32> to vector<1x4xf32>
    %600 = vector.broadcast %599 : vector<1x4xf32> to vector<7x4xf32>
    %601 = arith.select %598, %600, %591 : vector<7x4xi1>, vector<7x4xf32>
    %602 = vector.extract_strided_slice %550 {offsets = [10, 0], sizes = [1, 4], strides = [1, 1]} : vector<14x4xf32> to vector<1x4xf32>
    %603 = vector.extract_strided_slice %550 {offsets = [11, 0], sizes = [1, 4], strides = [1, 1]} : vector<14x4xf32> to vector<1x4xf32>
    %604 = arith.maximumf %602, %603 : vector<1x4xf32>
    %c5_i32_91 = arith.constant 5 : i32
    %605 = vector.broadcast %c5_i32_91 : i32 to vector<7x1xi32>
    %606 = arith.cmpi eq, %89, %605 : vector<7x1xi32>
    %607 = vector.shape_cast %606 : vector<7x1xi1> to vector<7x1xi1>
    %608 = vector.broadcast %607 : vector<7x1xi1> to vector<7x4xi1>
    %609 = vector.shape_cast %604 : vector<1x4xf32> to vector<1x4xf32>
    %610 = vector.broadcast %609 : vector<1x4xf32> to vector<7x4xf32>
    %611 = arith.select %608, %610, %601 : vector<7x4xi1>, vector<7x4xf32>
    %612 = vector.extract_strided_slice %550 {offsets = [12, 0], sizes = [1, 4], strides = [1, 1]} : vector<14x4xf32> to vector<1x4xf32>
    %613 = vector.extract_strided_slice %550 {offsets = [13, 0], sizes = [1, 4], strides = [1, 1]} : vector<14x4xf32> to vector<1x4xf32>
    %614 = arith.maximumf %612, %613 : vector<1x4xf32>
    %c6_i32_92 = arith.constant 6 : i32
    %615 = vector.broadcast %c6_i32_92 : i32 to vector<7x1xi32>
    %616 = arith.cmpi eq, %89, %615 : vector<7x1xi32>
    %617 = vector.shape_cast %616 : vector<7x1xi1> to vector<7x1xi1>
    %618 = vector.broadcast %617 : vector<7x1xi1> to vector<7x4xi1>
    %619 = vector.shape_cast %614 : vector<1x4xf32> to vector<1x4xf32>
    %620 = vector.broadcast %619 : vector<1x4xf32> to vector<7x4xf32>
    %621 = arith.select %618, %620, %611 : vector<7x4xi1>, vector<7x4xf32>
    %c0_93 = arith.constant 0 : index
    %c0_94 = arith.constant 0 : index
    %c0_95 = arith.constant 0 : index
    %c0_96 = arith.constant 0 : index
    %622 = vector.load %arg4[%c0_93, %c0_94, %c0_95, %c0_96] : memref<3x3x4x8xf32, #tpu.memory_space<vmem>>, vector<1x1x4x8xf32>
    %623 = vector.shape_cast %622 : vector<1x1x4x8xf32> to vector<4x8xf32>
    %c0_97 = arith.constant 0 : index
    %c1_98 = arith.constant 1 : index
    %c0_99 = arith.constant 0 : index
    %c0_100 = arith.constant 0 : index
    %624 = vector.load %arg4[%c0_97, %c1_98, %c0_99, %c0_100] : memref<3x3x4x8xf32, #tpu.memory_space<vmem>>, vector<1x1x4x8xf32>
    %625 = vector.shape_cast %624 : vector<1x1x4x8xf32> to vector<4x8xf32>
    %c0_101 = arith.constant 0 : index
    %c2_102 = arith.constant 2 : index
    %c0_103 = arith.constant 0 : index
    %c0_104 = arith.constant 0 : index
    %626 = vector.load %arg4[%c0_101, %c2_102, %c0_103, %c0_104] : memref<3x3x4x8xf32, #tpu.memory_space<vmem>>, vector<1x1x4x8xf32>
    %627 = vector.shape_cast %626 : vector<1x1x4x8xf32> to vector<4x8xf32>
    %c1_105 = arith.constant 1 : index
    %c0_106 = arith.constant 0 : index
    %c0_107 = arith.constant 0 : index
    %c0_108 = arith.constant 0 : index
    %628 = vector.load %arg4[%c1_105, %c0_106, %c0_107, %c0_108] : memref<3x3x4x8xf32, #tpu.memory_space<vmem>>, vector<1x1x4x8xf32>
    %629 = vector.shape_cast %628 : vector<1x1x4x8xf32> to vector<4x8xf32>
    %c1_109 = arith.constant 1 : index
    %c1_110 = arith.constant 1 : index
    %c0_111 = arith.constant 0 : index
    %c0_112 = arith.constant 0 : index
    %630 = vector.load %arg4[%c1_109, %c1_110, %c0_111, %c0_112] : memref<3x3x4x8xf32, #tpu.memory_space<vmem>>, vector<1x1x4x8xf32>
    %631 = vector.shape_cast %630 : vector<1x1x4x8xf32> to vector<4x8xf32>
    %c1_113 = arith.constant 1 : index
    %c2_114 = arith.constant 2 : index
    %c0_115 = arith.constant 0 : index
    %c0_116 = arith.constant 0 : index
    %632 = vector.load %arg4[%c1_113, %c2_114, %c0_115, %c0_116] : memref<3x3x4x8xf32, #tpu.memory_space<vmem>>, vector<1x1x4x8xf32>
    %633 = vector.shape_cast %632 : vector<1x1x4x8xf32> to vector<4x8xf32>
    %c2_117 = arith.constant 2 : index
    %c0_118 = arith.constant 0 : index
    %c0_119 = arith.constant 0 : index
    %c0_120 = arith.constant 0 : index
    %634 = vector.load %arg4[%c2_117, %c0_118, %c0_119, %c0_120] : memref<3x3x4x8xf32, #tpu.memory_space<vmem>>, vector<1x1x4x8xf32>
    %635 = vector.shape_cast %634 : vector<1x1x4x8xf32> to vector<4x8xf32>
    %c2_121 = arith.constant 2 : index
    %c1_122 = arith.constant 1 : index
    %c0_123 = arith.constant 0 : index
    %c0_124 = arith.constant 0 : index
    %636 = vector.load %arg4[%c2_121, %c1_122, %c0_123, %c0_124] : memref<3x3x4x8xf32, #tpu.memory_space<vmem>>, vector<1x1x4x8xf32>
    %637 = vector.shape_cast %636 : vector<1x1x4x8xf32> to vector<4x8xf32>
    %c2_125 = arith.constant 2 : index
    %c2_126 = arith.constant 2 : index
    %c0_127 = arith.constant 0 : index
    %c0_128 = arith.constant 0 : index
    %638 = vector.load %arg4[%c2_125, %c2_126, %c0_127, %c0_128] : memref<3x3x4x8xf32, #tpu.memory_space<vmem>>, vector<1x1x4x8xf32>
    %639 = vector.shape_cast %638 : vector<1x1x4x8xf32> to vector<4x8xf32>
    %c0_129 = arith.constant 0 : index
    %c0_130 = arith.constant 0 : index
    %640 = vector.load %arg5[%c0_129, %c0_130] : memref<3x8xf32, #tpu.memory_space<vmem>>, vector<1x8xf32>
    %c1_131 = arith.constant 1 : index
    %c0_132 = arith.constant 0 : index
    %641 = vector.load %arg5[%c1_131, %c0_132] : memref<3x8xf32, #tpu.memory_space<vmem>>, vector<1x8xf32>
    %c2_133 = arith.constant 2 : index
    %c0_134 = arith.constant 0 : index
    %642 = vector.load %arg5[%c2_133, %c0_134] : memref<3x8xf32, #tpu.memory_space<vmem>>, vector<1x8xf32>
    %cst_135 = arith.constant 0.000000e+00 : f32
    %643 = vector.broadcast %cst_135 : f32 to vector<5x8xf32>
    %644 = vector.extract_strided_slice %165 {offsets = [0, 0], sizes = [5, 4], strides = [1, 1]} : vector<7x4xf32> to vector<5x4xf32>
    %cst_136 = arith.constant dense<0.000000e+00> : vector<5x8xf32>
    %645 = tpu.matmul %644, %623, %cst_136 {dimension_numbers = #tpu.dot_dimension_numbers<[1], [0], [0], [1], [0, 0, 1, 1], [], []>} : vector<5x4xf32>, vector<4x8xf32>, vector<5x8xf32> -> vector<5x8xf32>
    %646 = arith.addf %643, %645 : vector<5x8xf32>
    %647 = vector.extract_strided_slice %165 {offsets = [1, 0], sizes = [5, 4], strides = [1, 1]} : vector<7x4xf32> to vector<5x4xf32>
    %cst_137 = arith.constant dense<0.000000e+00> : vector<5x8xf32>
    %648 = tpu.matmul %647, %625, %cst_137 {dimension_numbers = #tpu.dot_dimension_numbers<[1], [0], [0], [1], [0, 0, 1, 1], [], []>} : vector<5x4xf32>, vector<4x8xf32>, vector<5x8xf32> -> vector<5x8xf32>
    %649 = arith.addf %646, %648 : vector<5x8xf32>
    %650 = vector.extract_strided_slice %165 {offsets = [2, 0], sizes = [5, 4], strides = [1, 1]} : vector<7x4xf32> to vector<5x4xf32>
    %cst_138 = arith.constant dense<0.000000e+00> : vector<5x8xf32>
    %651 = tpu.matmul %650, %627, %cst_138 {dimension_numbers = #tpu.dot_dimension_numbers<[1], [0], [0], [1], [0, 0, 1, 1], [], []>} : vector<5x4xf32>, vector<4x8xf32>, vector<5x8xf32> -> vector<5x8xf32>
    %652 = arith.addf %649, %651 : vector<5x8xf32>
    %653 = vector.extract_strided_slice %241 {offsets = [0, 0], sizes = [5, 4], strides = [1, 1]} : vector<7x4xf32> to vector<5x4xf32>
    %cst_139 = arith.constant dense<0.000000e+00> : vector<5x8xf32>
    %654 = tpu.matmul %653, %629, %cst_139 {dimension_numbers = #tpu.dot_dimension_numbers<[1], [0], [0], [1], [0, 0, 1, 1], [], []>} : vector<5x4xf32>, vector<4x8xf32>, vector<5x8xf32> -> vector<5x8xf32>
    %655 = arith.addf %652, %654 : vector<5x8xf32>
    %656 = vector.extract_strided_slice %241 {offsets = [1, 0], sizes = [5, 4], strides = [1, 1]} : vector<7x4xf32> to vector<5x4xf32>
    %cst_140 = arith.constant dense<0.000000e+00> : vector<5x8xf32>
    %657 = tpu.matmul %656, %631, %cst_140 {dimension_numbers = #tpu.dot_dimension_numbers<[1], [0], [0], [1], [0, 0, 1, 1], [], []>} : vector<5x4xf32>, vector<4x8xf32>, vector<5x8xf32> -> vector<5x8xf32>
    %658 = arith.addf %655, %657 : vector<5x8xf32>
    %659 = vector.extract_strided_slice %241 {offsets = [2, 0], sizes = [5, 4], strides = [1, 1]} : vector<7x4xf32> to vector<5x4xf32>
    %cst_141 = arith.constant dense<0.000000e+00> : vector<5x8xf32>
    %660 = tpu.matmul %659, %633, %cst_141 {dimension_numbers = #tpu.dot_dimension_numbers<[1], [0], [0], [1], [0, 0, 1, 1], [], []>} : vector<5x4xf32>, vector<4x8xf32>, vector<5x8xf32> -> vector<5x8xf32>
    %661 = arith.addf %658, %660 : vector<5x8xf32>
    %662 = vector.extract_strided_slice %317 {offsets = [0, 0], sizes = [5, 4], strides = [1, 1]} : vector<7x4xf32> to vector<5x4xf32>
    %cst_142 = arith.constant dense<0.000000e+00> : vector<5x8xf32>
    %663 = tpu.matmul %662, %635, %cst_142 {dimension_numbers = #tpu.dot_dimension_numbers<[1], [0], [0], [1], [0, 0, 1, 1], [], []>} : vector<5x4xf32>, vector<4x8xf32>, vector<5x8xf32> -> vector<5x8xf32>
    %664 = arith.addf %661, %663 : vector<5x8xf32>
    %665 = vector.extract_strided_slice %317 {offsets = [1, 0], sizes = [5, 4], strides = [1, 1]} : vector<7x4xf32> to vector<5x4xf32>
    %cst_143 = arith.constant dense<0.000000e+00> : vector<5x8xf32>
    %666 = tpu.matmul %665, %637, %cst_143 {dimension_numbers = #tpu.dot_dimension_numbers<[1], [0], [0], [1], [0, 0, 1, 1], [], []>} : vector<5x4xf32>, vector<4x8xf32>, vector<5x8xf32> -> vector<5x8xf32>
    %667 = arith.addf %664, %666 : vector<5x8xf32>
    %668 = vector.extract_strided_slice %317 {offsets = [2, 0], sizes = [5, 4], strides = [1, 1]} : vector<7x4xf32> to vector<5x4xf32>
    %cst_144 = arith.constant dense<0.000000e+00> : vector<5x8xf32>
    %669 = tpu.matmul %668, %639, %cst_144 {dimension_numbers = #tpu.dot_dimension_numbers<[1], [0], [0], [1], [0, 0, 1, 1], [], []>} : vector<5x4xf32>, vector<4x8xf32>, vector<5x8xf32> -> vector<5x8xf32>
    %670 = arith.addf %667, %669 : vector<5x8xf32>
    %671 = vector.broadcast %640 : vector<1x8xf32> to vector<5x8xf32>
    %672 = arith.addf %670, %671 : vector<5x8xf32>
    %cst_145 = arith.constant 0.000000e+00 : f32
    %673 = vector.broadcast %cst_145 : f32 to vector<5x8xf32>
    %674 = arith.maximumf %672, %673 : vector<5x8xf32>
    %675 = vector.broadcast %641 : vector<1x8xf32> to vector<5x8xf32>
    %676 = arith.mulf %674, %675 : vector<5x8xf32>
    %677 = vector.broadcast %642 : vector<1x8xf32> to vector<5x8xf32>
    %678 = arith.addf %676, %677 : vector<5x8xf32>
    %cst_146 = arith.constant 0.000000e+00 : f32
    %679 = vector.broadcast %cst_146 : f32 to vector<5x8xf32>
    %680 = vector.extract_strided_slice %241 {offsets = [0, 0], sizes = [5, 4], strides = [1, 1]} : vector<7x4xf32> to vector<5x4xf32>
    %cst_147 = arith.constant dense<0.000000e+00> : vector<5x8xf32>
    %681 = tpu.matmul %680, %623, %cst_147 {dimension_numbers = #tpu.dot_dimension_numbers<[1], [0], [0], [1], [0, 0, 1, 1], [], []>} : vector<5x4xf32>, vector<4x8xf32>, vector<5x8xf32> -> vector<5x8xf32>
    %682 = arith.addf %679, %681 : vector<5x8xf32>
    %683 = vector.extract_strided_slice %241 {offsets = [1, 0], sizes = [5, 4], strides = [1, 1]} : vector<7x4xf32> to vector<5x4xf32>
    %cst_148 = arith.constant dense<0.000000e+00> : vector<5x8xf32>
    %684 = tpu.matmul %683, %625, %cst_148 {dimension_numbers = #tpu.dot_dimension_numbers<[1], [0], [0], [1], [0, 0, 1, 1], [], []>} : vector<5x4xf32>, vector<4x8xf32>, vector<5x8xf32> -> vector<5x8xf32>
    %685 = arith.addf %682, %684 : vector<5x8xf32>
    %686 = vector.extract_strided_slice %241 {offsets = [2, 0], sizes = [5, 4], strides = [1, 1]} : vector<7x4xf32> to vector<5x4xf32>
    %cst_149 = arith.constant dense<0.000000e+00> : vector<5x8xf32>
    %687 = tpu.matmul %686, %627, %cst_149 {dimension_numbers = #tpu.dot_dimension_numbers<[1], [0], [0], [1], [0, 0, 1, 1], [], []>} : vector<5x4xf32>, vector<4x8xf32>, vector<5x8xf32> -> vector<5x8xf32>
    %688 = arith.addf %685, %687 : vector<5x8xf32>
    %689 = vector.extract_strided_slice %317 {offsets = [0, 0], sizes = [5, 4], strides = [1, 1]} : vector<7x4xf32> to vector<5x4xf32>
    %cst_150 = arith.constant dense<0.000000e+00> : vector<5x8xf32>
    %690 = tpu.matmul %689, %629, %cst_150 {dimension_numbers = #tpu.dot_dimension_numbers<[1], [0], [0], [1], [0, 0, 1, 1], [], []>} : vector<5x4xf32>, vector<4x8xf32>, vector<5x8xf32> -> vector<5x8xf32>
    %691 = arith.addf %688, %690 : vector<5x8xf32>
    %692 = vector.extract_strided_slice %317 {offsets = [1, 0], sizes = [5, 4], strides = [1, 1]} : vector<7x4xf32> to vector<5x4xf32>
    %cst_151 = arith.constant dense<0.000000e+00> : vector<5x8xf32>
    %693 = tpu.matmul %692, %631, %cst_151 {dimension_numbers = #tpu.dot_dimension_numbers<[1], [0], [0], [1], [0, 0, 1, 1], [], []>} : vector<5x4xf32>, vector<4x8xf32>, vector<5x8xf32> -> vector<5x8xf32>
    %694 = arith.addf %691, %693 : vector<5x8xf32>
    %695 = vector.extract_strided_slice %317 {offsets = [2, 0], sizes = [5, 4], strides = [1, 1]} : vector<7x4xf32> to vector<5x4xf32>
    %cst_152 = arith.constant dense<0.000000e+00> : vector<5x8xf32>
    %696 = tpu.matmul %695, %633, %cst_152 {dimension_numbers = #tpu.dot_dimension_numbers<[1], [0], [0], [1], [0, 0, 1, 1], [], []>} : vector<5x4xf32>, vector<4x8xf32>, vector<5x8xf32> -> vector<5x8xf32>
    %697 = arith.addf %694, %696 : vector<5x8xf32>
    %698 = vector.extract_strided_slice %393 {offsets = [0, 0], sizes = [5, 4], strides = [1, 1]} : vector<7x4xf32> to vector<5x4xf32>
    %cst_153 = arith.constant dense<0.000000e+00> : vector<5x8xf32>
    %699 = tpu.matmul %698, %635, %cst_153 {dimension_numbers = #tpu.dot_dimension_numbers<[1], [0], [0], [1], [0, 0, 1, 1], [], []>} : vector<5x4xf32>, vector<4x8xf32>, vector<5x8xf32> -> vector<5x8xf32>
    %700 = arith.addf %697, %699 : vector<5x8xf32>
    %701 = vector.extract_strided_slice %393 {offsets = [1, 0], sizes = [5, 4], strides = [1, 1]} : vector<7x4xf32> to vector<5x4xf32>
    %cst_154 = arith.constant dense<0.000000e+00> : vector<5x8xf32>
    %702 = tpu.matmul %701, %637, %cst_154 {dimension_numbers = #tpu.dot_dimension_numbers<[1], [0], [0], [1], [0, 0, 1, 1], [], []>} : vector<5x4xf32>, vector<4x8xf32>, vector<5x8xf32> -> vector<5x8xf32>
    %703 = arith.addf %700, %702 : vector<5x8xf32>
    %704 = vector.extract_strided_slice %393 {offsets = [2, 0], sizes = [5, 4], strides = [1, 1]} : vector<7x4xf32> to vector<5x4xf32>
    %cst_155 = arith.constant dense<0.000000e+00> : vector<5x8xf32>
    %705 = tpu.matmul %704, %639, %cst_155 {dimension_numbers = #tpu.dot_dimension_numbers<[1], [0], [0], [1], [0, 0, 1, 1], [], []>} : vector<5x4xf32>, vector<4x8xf32>, vector<5x8xf32> -> vector<5x8xf32>
    %706 = arith.addf %703, %705 : vector<5x8xf32>
    %707 = vector.broadcast %640 : vector<1x8xf32> to vector<5x8xf32>
    %708 = arith.addf %706, %707 : vector<5x8xf32>
    %cst_156 = arith.constant 0.000000e+00 : f32
    %709 = vector.broadcast %cst_156 : f32 to vector<5x8xf32>
    %710 = arith.maximumf %708, %709 : vector<5x8xf32>
    %711 = vector.broadcast %641 : vector<1x8xf32> to vector<5x8xf32>
    %712 = arith.mulf %710, %711 : vector<5x8xf32>
    %713 = vector.broadcast %642 : vector<1x8xf32> to vector<5x8xf32>
    %714 = arith.addf %712, %713 : vector<5x8xf32>
    %cst_157 = arith.constant 0.000000e+00 : f32
    %715 = vector.broadcast %cst_157 : f32 to vector<5x8xf32>
    %716 = vector.extract_strided_slice %317 {offsets = [0, 0], sizes = [5, 4], strides = [1, 1]} : vector<7x4xf32> to vector<5x4xf32>
    %cst_158 = arith.constant dense<0.000000e+00> : vector<5x8xf32>
    %717 = tpu.matmul %716, %623, %cst_158 {dimension_numbers = #tpu.dot_dimension_numbers<[1], [0], [0], [1], [0, 0, 1, 1], [], []>} : vector<5x4xf32>, vector<4x8xf32>, vector<5x8xf32> -> vector<5x8xf32>
    %718 = arith.addf %715, %717 : vector<5x8xf32>
    %719 = vector.extract_strided_slice %317 {offsets = [1, 0], sizes = [5, 4], strides = [1, 1]} : vector<7x4xf32> to vector<5x4xf32>
    %cst_159 = arith.constant dense<0.000000e+00> : vector<5x8xf32>
    %720 = tpu.matmul %719, %625, %cst_159 {dimension_numbers = #tpu.dot_dimension_numbers<[1], [0], [0], [1], [0, 0, 1, 1], [], []>} : vector<5x4xf32>, vector<4x8xf32>, vector<5x8xf32> -> vector<5x8xf32>
    %721 = arith.addf %718, %720 : vector<5x8xf32>
    %722 = vector.extract_strided_slice %317 {offsets = [2, 0], sizes = [5, 4], strides = [1, 1]} : vector<7x4xf32> to vector<5x4xf32>
    %cst_160 = arith.constant dense<0.000000e+00> : vector<5x8xf32>
    %723 = tpu.matmul %722, %627, %cst_160 {dimension_numbers = #tpu.dot_dimension_numbers<[1], [0], [0], [1], [0, 0, 1, 1], [], []>} : vector<5x4xf32>, vector<4x8xf32>, vector<5x8xf32> -> vector<5x8xf32>
    %724 = arith.addf %721, %723 : vector<5x8xf32>
    %725 = vector.extract_strided_slice %393 {offsets = [0, 0], sizes = [5, 4], strides = [1, 1]} : vector<7x4xf32> to vector<5x4xf32>
    %cst_161 = arith.constant dense<0.000000e+00> : vector<5x8xf32>
    %726 = tpu.matmul %725, %629, %cst_161 {dimension_numbers = #tpu.dot_dimension_numbers<[1], [0], [0], [1], [0, 0, 1, 1], [], []>} : vector<5x4xf32>, vector<4x8xf32>, vector<5x8xf32> -> vector<5x8xf32>
    %727 = arith.addf %724, %726 : vector<5x8xf32>
    %728 = vector.extract_strided_slice %393 {offsets = [1, 0], sizes = [5, 4], strides = [1, 1]} : vector<7x4xf32> to vector<5x4xf32>
    %cst_162 = arith.constant dense<0.000000e+00> : vector<5x8xf32>
    %729 = tpu.matmul %728, %631, %cst_162 {dimension_numbers = #tpu.dot_dimension_numbers<[1], [0], [0], [1], [0, 0, 1, 1], [], []>} : vector<5x4xf32>, vector<4x8xf32>, vector<5x8xf32> -> vector<5x8xf32>
    %730 = arith.addf %727, %729 : vector<5x8xf32>
    %731 = vector.extract_strided_slice %393 {offsets = [2, 0], sizes = [5, 4], strides = [1, 1]} : vector<7x4xf32> to vector<5x4xf32>
    %cst_163 = arith.constant dense<0.000000e+00> : vector<5x8xf32>
    %732 = tpu.matmul %731, %633, %cst_163 {dimension_numbers = #tpu.dot_dimension_numbers<[1], [0], [0], [1], [0, 0, 1, 1], [], []>} : vector<5x4xf32>, vector<4x8xf32>, vector<5x8xf32> -> vector<5x8xf32>
    %733 = arith.addf %730, %732 : vector<5x8xf32>
    %734 = vector.extract_strided_slice %469 {offsets = [0, 0], sizes = [5, 4], strides = [1, 1]} : vector<7x4xf32> to vector<5x4xf32>
    %cst_164 = arith.constant dense<0.000000e+00> : vector<5x8xf32>
    %735 = tpu.matmul %734, %635, %cst_164 {dimension_numbers = #tpu.dot_dimension_numbers<[1], [0], [0], [1], [0, 0, 1, 1], [], []>} : vector<5x4xf32>, vector<4x8xf32>, vector<5x8xf32> -> vector<5x8xf32>
    %736 = arith.addf %733, %735 : vector<5x8xf32>
    %737 = vector.extract_strided_slice %469 {offsets = [1, 0], sizes = [5, 4], strides = [1, 1]} : vector<7x4xf32> to vector<5x4xf32>
    %cst_165 = arith.constant dense<0.000000e+00> : vector<5x8xf32>
    %738 = tpu.matmul %737, %637, %cst_165 {dimension_numbers = #tpu.dot_dimension_numbers<[1], [0], [0], [1], [0, 0, 1, 1], [], []>} : vector<5x4xf32>, vector<4x8xf32>, vector<5x8xf32> -> vector<5x8xf32>
    %739 = arith.addf %736, %738 : vector<5x8xf32>
    %740 = vector.extract_strided_slice %469 {offsets = [2, 0], sizes = [5, 4], strides = [1, 1]} : vector<7x4xf32> to vector<5x4xf32>
    %cst_166 = arith.constant dense<0.000000e+00> : vector<5x8xf32>
    %741 = tpu.matmul %740, %639, %cst_166 {dimension_numbers = #tpu.dot_dimension_numbers<[1], [0], [0], [1], [0, 0, 1, 1], [], []>} : vector<5x4xf32>, vector<4x8xf32>, vector<5x8xf32> -> vector<5x8xf32>
    %742 = arith.addf %739, %741 : vector<5x8xf32>
    %743 = vector.broadcast %640 : vector<1x8xf32> to vector<5x8xf32>
    %744 = arith.addf %742, %743 : vector<5x8xf32>
    %cst_167 = arith.constant 0.000000e+00 : f32
    %745 = vector.broadcast %cst_167 : f32 to vector<5x8xf32>
    %746 = arith.maximumf %744, %745 : vector<5x8xf32>
    %747 = vector.broadcast %641 : vector<1x8xf32> to vector<5x8xf32>
    %748 = arith.mulf %746, %747 : vector<5x8xf32>
    %749 = vector.broadcast %642 : vector<1x8xf32> to vector<5x8xf32>
    %750 = arith.addf %748, %749 : vector<5x8xf32>
    %cst_168 = arith.constant 0.000000e+00 : f32
    %751 = vector.broadcast %cst_168 : f32 to vector<5x8xf32>
    %752 = vector.extract_strided_slice %393 {offsets = [0, 0], sizes = [5, 4], strides = [1, 1]} : vector<7x4xf32> to vector<5x4xf32>
    %cst_169 = arith.constant dense<0.000000e+00> : vector<5x8xf32>
    %753 = tpu.matmul %752, %623, %cst_169 {dimension_numbers = #tpu.dot_dimension_numbers<[1], [0], [0], [1], [0, 0, 1, 1], [], []>} : vector<5x4xf32>, vector<4x8xf32>, vector<5x8xf32> -> vector<5x8xf32>
    %754 = arith.addf %751, %753 : vector<5x8xf32>
    %755 = vector.extract_strided_slice %393 {offsets = [1, 0], sizes = [5, 4], strides = [1, 1]} : vector<7x4xf32> to vector<5x4xf32>
    %cst_170 = arith.constant dense<0.000000e+00> : vector<5x8xf32>
    %756 = tpu.matmul %755, %625, %cst_170 {dimension_numbers = #tpu.dot_dimension_numbers<[1], [0], [0], [1], [0, 0, 1, 1], [], []>} : vector<5x4xf32>, vector<4x8xf32>, vector<5x8xf32> -> vector<5x8xf32>
    %757 = arith.addf %754, %756 : vector<5x8xf32>
    %758 = vector.extract_strided_slice %393 {offsets = [2, 0], sizes = [5, 4], strides = [1, 1]} : vector<7x4xf32> to vector<5x4xf32>
    %cst_171 = arith.constant dense<0.000000e+00> : vector<5x8xf32>
    %759 = tpu.matmul %758, %627, %cst_171 {dimension_numbers = #tpu.dot_dimension_numbers<[1], [0], [0], [1], [0, 0, 1, 1], [], []>} : vector<5x4xf32>, vector<4x8xf32>, vector<5x8xf32> -> vector<5x8xf32>
    %760 = arith.addf %757, %759 : vector<5x8xf32>
    %761 = vector.extract_strided_slice %469 {offsets = [0, 0], sizes = [5, 4], strides = [1, 1]} : vector<7x4xf32> to vector<5x4xf32>
    %cst_172 = arith.constant dense<0.000000e+00> : vector<5x8xf32>
    %762 = tpu.matmul %761, %629, %cst_172 {dimension_numbers = #tpu.dot_dimension_numbers<[1], [0], [0], [1], [0, 0, 1, 1], [], []>} : vector<5x4xf32>, vector<4x8xf32>, vector<5x8xf32> -> vector<5x8xf32>
    %763 = arith.addf %760, %762 : vector<5x8xf32>
    %764 = vector.extract_strided_slice %469 {offsets = [1, 0], sizes = [5, 4], strides = [1, 1]} : vector<7x4xf32> to vector<5x4xf32>
    %cst_173 = arith.constant dense<0.000000e+00> : vector<5x8xf32>
    %765 = tpu.matmul %764, %631, %cst_173 {dimension_numbers = #tpu.dot_dimension_numbers<[1], [0], [0], [1], [0, 0, 1, 1], [], []>} : vector<5x4xf32>, vector<4x8xf32>, vector<5x8xf32> -> vector<5x8xf32>
    %766 = arith.addf %763, %765 : vector<5x8xf32>
    %767 = vector.extract_strided_slice %469 {offsets = [2, 0], sizes = [5, 4], strides = [1, 1]} : vector<7x4xf32> to vector<5x4xf32>
    %cst_174 = arith.constant dense<0.000000e+00> : vector<5x8xf32>
    %768 = tpu.matmul %767, %633, %cst_174 {dimension_numbers = #tpu.dot_dimension_numbers<[1], [0], [0], [1], [0, 0, 1, 1], [], []>} : vector<5x4xf32>, vector<4x8xf32>, vector<5x8xf32> -> vector<5x8xf32>
    %769 = arith.addf %766, %768 : vector<5x8xf32>
    %770 = vector.extract_strided_slice %545 {offsets = [0, 0], sizes = [5, 4], strides = [1, 1]} : vector<7x4xf32> to vector<5x4xf32>
    %cst_175 = arith.constant dense<0.000000e+00> : vector<5x8xf32>
    %771 = tpu.matmul %770, %635, %cst_175 {dimension_numbers = #tpu.dot_dimension_numbers<[1], [0], [0], [1], [0, 0, 1, 1], [], []>} : vector<5x4xf32>, vector<4x8xf32>, vector<5x8xf32> -> vector<5x8xf32>
    %772 = arith.addf %769, %771 : vector<5x8xf32>
    %773 = vector.extract_strided_slice %545 {offsets = [1, 0], sizes = [5, 4], strides = [1, 1]} : vector<7x4xf32> to vector<5x4xf32>
    %cst_176 = arith.constant dense<0.000000e+00> : vector<5x8xf32>
    %774 = tpu.matmul %773, %637, %cst_176 {dimension_numbers = #tpu.dot_dimension_numbers<[1], [0], [0], [1], [0, 0, 1, 1], [], []>} : vector<5x4xf32>, vector<4x8xf32>, vector<5x8xf32> -> vector<5x8xf32>
    %775 = arith.addf %772, %774 : vector<5x8xf32>
    %776 = vector.extract_strided_slice %545 {offsets = [2, 0], sizes = [5, 4], strides = [1, 1]} : vector<7x4xf32> to vector<5x4xf32>
    %cst_177 = arith.constant dense<0.000000e+00> : vector<5x8xf32>
    %777 = tpu.matmul %776, %639, %cst_177 {dimension_numbers = #tpu.dot_dimension_numbers<[1], [0], [0], [1], [0, 0, 1, 1], [], []>} : vector<5x4xf32>, vector<4x8xf32>, vector<5x8xf32> -> vector<5x8xf32>
    %778 = arith.addf %775, %777 : vector<5x8xf32>
    %779 = vector.broadcast %640 : vector<1x8xf32> to vector<5x8xf32>
    %780 = arith.addf %778, %779 : vector<5x8xf32>
    %cst_178 = arith.constant 0.000000e+00 : f32
    %781 = vector.broadcast %cst_178 : f32 to vector<5x8xf32>
    %782 = arith.maximumf %780, %781 : vector<5x8xf32>
    %783 = vector.broadcast %641 : vector<1x8xf32> to vector<5x8xf32>
    %784 = arith.mulf %782, %783 : vector<5x8xf32>
    %785 = vector.broadcast %642 : vector<1x8xf32> to vector<5x8xf32>
    %786 = arith.addf %784, %785 : vector<5x8xf32>
    %cst_179 = arith.constant 0.000000e+00 : f32
    %787 = vector.broadcast %cst_179 : f32 to vector<5x8xf32>
    %788 = vector.extract_strided_slice %469 {offsets = [0, 0], sizes = [5, 4], strides = [1, 1]} : vector<7x4xf32> to vector<5x4xf32>
    %cst_180 = arith.constant dense<0.000000e+00> : vector<5x8xf32>
    %789 = tpu.matmul %788, %623, %cst_180 {dimension_numbers = #tpu.dot_dimension_numbers<[1], [0], [0], [1], [0, 0, 1, 1], [], []>} : vector<5x4xf32>, vector<4x8xf32>, vector<5x8xf32> -> vector<5x8xf32>
    %790 = arith.addf %787, %789 : vector<5x8xf32>
    %791 = vector.extract_strided_slice %469 {offsets = [1, 0], sizes = [5, 4], strides = [1, 1]} : vector<7x4xf32> to vector<5x4xf32>
    %cst_181 = arith.constant dense<0.000000e+00> : vector<5x8xf32>
    %792 = tpu.matmul %791, %625, %cst_181 {dimension_numbers = #tpu.dot_dimension_numbers<[1], [0], [0], [1], [0, 0, 1, 1], [], []>} : vector<5x4xf32>, vector<4x8xf32>, vector<5x8xf32> -> vector<5x8xf32>
    %793 = arith.addf %790, %792 : vector<5x8xf32>
    %794 = vector.extract_strided_slice %469 {offsets = [2, 0], sizes = [5, 4], strides = [1, 1]} : vector<7x4xf32> to vector<5x4xf32>
    %cst_182 = arith.constant dense<0.000000e+00> : vector<5x8xf32>
    %795 = tpu.matmul %794, %627, %cst_182 {dimension_numbers = #tpu.dot_dimension_numbers<[1], [0], [0], [1], [0, 0, 1, 1], [], []>} : vector<5x4xf32>, vector<4x8xf32>, vector<5x8xf32> -> vector<5x8xf32>
    %796 = arith.addf %793, %795 : vector<5x8xf32>
    %797 = vector.extract_strided_slice %545 {offsets = [0, 0], sizes = [5, 4], strides = [1, 1]} : vector<7x4xf32> to vector<5x4xf32>
    %cst_183 = arith.constant dense<0.000000e+00> : vector<5x8xf32>
    %798 = tpu.matmul %797, %629, %cst_183 {dimension_numbers = #tpu.dot_dimension_numbers<[1], [0], [0], [1], [0, 0, 1, 1], [], []>} : vector<5x4xf32>, vector<4x8xf32>, vector<5x8xf32> -> vector<5x8xf32>
    %799 = arith.addf %796, %798 : vector<5x8xf32>
    %800 = vector.extract_strided_slice %545 {offsets = [1, 0], sizes = [5, 4], strides = [1, 1]} : vector<7x4xf32> to vector<5x4xf32>
    %cst_184 = arith.constant dense<0.000000e+00> : vector<5x8xf32>
    %801 = tpu.matmul %800, %631, %cst_184 {dimension_numbers = #tpu.dot_dimension_numbers<[1], [0], [0], [1], [0, 0, 1, 1], [], []>} : vector<5x4xf32>, vector<4x8xf32>, vector<5x8xf32> -> vector<5x8xf32>
    %802 = arith.addf %799, %801 : vector<5x8xf32>
    %803 = vector.extract_strided_slice %545 {offsets = [2, 0], sizes = [5, 4], strides = [1, 1]} : vector<7x4xf32> to vector<5x4xf32>
    %cst_185 = arith.constant dense<0.000000e+00> : vector<5x8xf32>
    %804 = tpu.matmul %803, %633, %cst_185 {dimension_numbers = #tpu.dot_dimension_numbers<[1], [0], [0], [1], [0, 0, 1, 1], [], []>} : vector<5x4xf32>, vector<4x8xf32>, vector<5x8xf32> -> vector<5x8xf32>
    %805 = arith.addf %802, %804 : vector<5x8xf32>
    %806 = vector.extract_strided_slice %621 {offsets = [0, 0], sizes = [5, 4], strides = [1, 1]} : vector<7x4xf32> to vector<5x4xf32>
    %cst_186 = arith.constant dense<0.000000e+00> : vector<5x8xf32>
    %807 = tpu.matmul %806, %635, %cst_186 {dimension_numbers = #tpu.dot_dimension_numbers<[1], [0], [0], [1], [0, 0, 1, 1], [], []>} : vector<5x4xf32>, vector<4x8xf32>, vector<5x8xf32> -> vector<5x8xf32>
    %808 = arith.addf %805, %807 : vector<5x8xf32>
    %809 = vector.extract_strided_slice %621 {offsets = [1, 0], sizes = [5, 4], strides = [1, 1]} : vector<7x4xf32> to vector<5x4xf32>
    %cst_187 = arith.constant dense<0.000000e+00> : vector<5x8xf32>
    %810 = tpu.matmul %809, %637, %cst_187 {dimension_numbers = #tpu.dot_dimension_numbers<[1], [0], [0], [1], [0, 0, 1, 1], [], []>} : vector<5x4xf32>, vector<4x8xf32>, vector<5x8xf32> -> vector<5x8xf32>
    %811 = arith.addf %808, %810 : vector<5x8xf32>
    %812 = vector.extract_strided_slice %621 {offsets = [2, 0], sizes = [5, 4], strides = [1, 1]} : vector<7x4xf32> to vector<5x4xf32>
    %cst_188 = arith.constant dense<0.000000e+00> : vector<5x8xf32>
    %813 = tpu.matmul %812, %639, %cst_188 {dimension_numbers = #tpu.dot_dimension_numbers<[1], [0], [0], [1], [0, 0, 1, 1], [], []>} : vector<5x4xf32>, vector<4x8xf32>, vector<5x8xf32> -> vector<5x8xf32>
    %814 = arith.addf %811, %813 : vector<5x8xf32>
    %815 = vector.broadcast %640 : vector<1x8xf32> to vector<5x8xf32>
    %816 = arith.addf %814, %815 : vector<5x8xf32>
    %cst_189 = arith.constant 0.000000e+00 : f32
    %817 = vector.broadcast %cst_189 : f32 to vector<5x8xf32>
    %818 = arith.maximumf %816, %817 : vector<5x8xf32>
    %819 = vector.broadcast %641 : vector<1x8xf32> to vector<5x8xf32>
    %820 = arith.mulf %818, %819 : vector<5x8xf32>
    %821 = vector.broadcast %642 : vector<1x8xf32> to vector<5x8xf32>
    %822 = arith.addf %820, %821 : vector<5x8xf32>
    %c0_190 = arith.constant 0 : index
    %c0_191 = arith.constant 0 : index
    %823 = vector.load %arg7[%c0_190, %c0_191] : memref<1x32xf32, #tpu.memory_space<vmem>>, vector<1x32xf32>
    %824 = vector.extract_strided_slice %678 {offsets = [0, 0], sizes = [1, 8], strides = [1, 1]} : vector<5x8xf32> to vector<1x8xf32>
    %c0_192 = arith.constant 0 : index
    %c0_193 = arith.constant 0 : index
    %c0_194 = arith.constant 0 : index
    %c0_195 = arith.constant 0 : index
    %825 = vector.load %arg6[%c0_192, %c0_193, %c0_194, %c0_195] : memref<5x5x8x32xf32, #tpu.memory_space<vmem>>, vector<1x1x8x32xf32>
    %826 = vector.shape_cast %825 : vector<1x1x8x32xf32> to vector<8x32xf32>
    %cst_196 = arith.constant dense<0.000000e+00> : vector<1x32xf32>
    %827 = tpu.matmul %824, %826, %cst_196 {dimension_numbers = #tpu.dot_dimension_numbers<[1], [0], [0], [1], [0, 0, 1, 1], [], []>} : vector<1x8xf32>, vector<8x32xf32>, vector<1x32xf32> -> vector<1x32xf32>
    %828 = arith.addf %823, %827 : vector<1x32xf32>
    %829 = vector.extract_strided_slice %678 {offsets = [1, 0], sizes = [1, 8], strides = [1, 1]} : vector<5x8xf32> to vector<1x8xf32>
    %c0_197 = arith.constant 0 : index
    %c1_198 = arith.constant 1 : index
    %c0_199 = arith.constant 0 : index
    %c0_200 = arith.constant 0 : index
    %830 = vector.load %arg6[%c0_197, %c1_198, %c0_199, %c0_200] : memref<5x5x8x32xf32, #tpu.memory_space<vmem>>, vector<1x1x8x32xf32>
    %831 = vector.shape_cast %830 : vector<1x1x8x32xf32> to vector<8x32xf32>
    %cst_201 = arith.constant dense<0.000000e+00> : vector<1x32xf32>
    %832 = tpu.matmul %829, %831, %cst_201 {dimension_numbers = #tpu.dot_dimension_numbers<[1], [0], [0], [1], [0, 0, 1, 1], [], []>} : vector<1x8xf32>, vector<8x32xf32>, vector<1x32xf32> -> vector<1x32xf32>
    %833 = arith.addf %828, %832 : vector<1x32xf32>
    %834 = vector.extract_strided_slice %678 {offsets = [2, 0], sizes = [1, 8], strides = [1, 1]} : vector<5x8xf32> to vector<1x8xf32>
    %c0_202 = arith.constant 0 : index
    %c2_203 = arith.constant 2 : index
    %c0_204 = arith.constant 0 : index
    %c0_205 = arith.constant 0 : index
    %835 = vector.load %arg6[%c0_202, %c2_203, %c0_204, %c0_205] : memref<5x5x8x32xf32, #tpu.memory_space<vmem>>, vector<1x1x8x32xf32>
    %836 = vector.shape_cast %835 : vector<1x1x8x32xf32> to vector<8x32xf32>
    %cst_206 = arith.constant dense<0.000000e+00> : vector<1x32xf32>
    %837 = tpu.matmul %834, %836, %cst_206 {dimension_numbers = #tpu.dot_dimension_numbers<[1], [0], [0], [1], [0, 0, 1, 1], [], []>} : vector<1x8xf32>, vector<8x32xf32>, vector<1x32xf32> -> vector<1x32xf32>
    %838 = arith.addf %833, %837 : vector<1x32xf32>
    %839 = vector.extract_strided_slice %678 {offsets = [3, 0], sizes = [1, 8], strides = [1, 1]} : vector<5x8xf32> to vector<1x8xf32>
    %c0_207 = arith.constant 0 : index
    %c3 = arith.constant 3 : index
    %c0_208 = arith.constant 0 : index
    %c0_209 = arith.constant 0 : index
    %840 = vector.load %arg6[%c0_207, %c3, %c0_208, %c0_209] : memref<5x5x8x32xf32, #tpu.memory_space<vmem>>, vector<1x1x8x32xf32>
    %841 = vector.shape_cast %840 : vector<1x1x8x32xf32> to vector<8x32xf32>
    %cst_210 = arith.constant dense<0.000000e+00> : vector<1x32xf32>
    %842 = tpu.matmul %839, %841, %cst_210 {dimension_numbers = #tpu.dot_dimension_numbers<[1], [0], [0], [1], [0, 0, 1, 1], [], []>} : vector<1x8xf32>, vector<8x32xf32>, vector<1x32xf32> -> vector<1x32xf32>
    %843 = arith.addf %838, %842 : vector<1x32xf32>
    %844 = vector.extract_strided_slice %678 {offsets = [4, 0], sizes = [1, 8], strides = [1, 1]} : vector<5x8xf32> to vector<1x8xf32>
    %c0_211 = arith.constant 0 : index
    %c4 = arith.constant 4 : index
    %c0_212 = arith.constant 0 : index
    %c0_213 = arith.constant 0 : index
    %845 = vector.load %arg6[%c0_211, %c4, %c0_212, %c0_213] : memref<5x5x8x32xf32, #tpu.memory_space<vmem>>, vector<1x1x8x32xf32>
    %846 = vector.shape_cast %845 : vector<1x1x8x32xf32> to vector<8x32xf32>
    %cst_214 = arith.constant dense<0.000000e+00> : vector<1x32xf32>
    %847 = tpu.matmul %844, %846, %cst_214 {dimension_numbers = #tpu.dot_dimension_numbers<[1], [0], [0], [1], [0, 0, 1, 1], [], []>} : vector<1x8xf32>, vector<8x32xf32>, vector<1x32xf32> -> vector<1x32xf32>
    %848 = arith.addf %843, %847 : vector<1x32xf32>
    %849 = vector.extract_strided_slice %714 {offsets = [0, 0], sizes = [1, 8], strides = [1, 1]} : vector<5x8xf32> to vector<1x8xf32>
    %c1_215 = arith.constant 1 : index
    %c0_216 = arith.constant 0 : index
    %c0_217 = arith.constant 0 : index
    %c0_218 = arith.constant 0 : index
    %850 = vector.load %arg6[%c1_215, %c0_216, %c0_217, %c0_218] : memref<5x5x8x32xf32, #tpu.memory_space<vmem>>, vector<1x1x8x32xf32>
    %851 = vector.shape_cast %850 : vector<1x1x8x32xf32> to vector<8x32xf32>
    %cst_219 = arith.constant dense<0.000000e+00> : vector<1x32xf32>
    %852 = tpu.matmul %849, %851, %cst_219 {dimension_numbers = #tpu.dot_dimension_numbers<[1], [0], [0], [1], [0, 0, 1, 1], [], []>} : vector<1x8xf32>, vector<8x32xf32>, vector<1x32xf32> -> vector<1x32xf32>
    %853 = arith.addf %848, %852 : vector<1x32xf32>
    %854 = vector.extract_strided_slice %714 {offsets = [1, 0], sizes = [1, 8], strides = [1, 1]} : vector<5x8xf32> to vector<1x8xf32>
    %c1_220 = arith.constant 1 : index
    %c1_221 = arith.constant 1 : index
    %c0_222 = arith.constant 0 : index
    %c0_223 = arith.constant 0 : index
    %855 = vector.load %arg6[%c1_220, %c1_221, %c0_222, %c0_223] : memref<5x5x8x32xf32, #tpu.memory_space<vmem>>, vector<1x1x8x32xf32>
    %856 = vector.shape_cast %855 : vector<1x1x8x32xf32> to vector<8x32xf32>
    %cst_224 = arith.constant dense<0.000000e+00> : vector<1x32xf32>
    %857 = tpu.matmul %854, %856, %cst_224 {dimension_numbers = #tpu.dot_dimension_numbers<[1], [0], [0], [1], [0, 0, 1, 1], [], []>} : vector<1x8xf32>, vector<8x32xf32>, vector<1x32xf32> -> vector<1x32xf32>
    %858 = arith.addf %853, %857 : vector<1x32xf32>
    %859 = vector.extract_strided_slice %714 {offsets = [2, 0], sizes = [1, 8], strides = [1, 1]} : vector<5x8xf32> to vector<1x8xf32>
    %c1_225 = arith.constant 1 : index
    %c2_226 = arith.constant 2 : index
    %c0_227 = arith.constant 0 : index
    %c0_228 = arith.constant 0 : index
    %860 = vector.load %arg6[%c1_225, %c2_226, %c0_227, %c0_228] : memref<5x5x8x32xf32, #tpu.memory_space<vmem>>, vector<1x1x8x32xf32>
    %861 = vector.shape_cast %860 : vector<1x1x8x32xf32> to vector<8x32xf32>
    %cst_229 = arith.constant dense<0.000000e+00> : vector<1x32xf32>
    %862 = tpu.matmul %859, %861, %cst_229 {dimension_numbers = #tpu.dot_dimension_numbers<[1], [0], [0], [1], [0, 0, 1, 1], [], []>} : vector<1x8xf32>, vector<8x32xf32>, vector<1x32xf32> -> vector<1x32xf32>
    %863 = arith.addf %858, %862 : vector<1x32xf32>
    %864 = vector.extract_strided_slice %714 {offsets = [3, 0], sizes = [1, 8], strides = [1, 1]} : vector<5x8xf32> to vector<1x8xf32>
    %c1_230 = arith.constant 1 : index
    %c3_231 = arith.constant 3 : index
    %c0_232 = arith.constant 0 : index
    %c0_233 = arith.constant 0 : index
    %865 = vector.load %arg6[%c1_230, %c3_231, %c0_232, %c0_233] : memref<5x5x8x32xf32, #tpu.memory_space<vmem>>, vector<1x1x8x32xf32>
    %866 = vector.shape_cast %865 : vector<1x1x8x32xf32> to vector<8x32xf32>
    %cst_234 = arith.constant dense<0.000000e+00> : vector<1x32xf32>
    %867 = tpu.matmul %864, %866, %cst_234 {dimension_numbers = #tpu.dot_dimension_numbers<[1], [0], [0], [1], [0, 0, 1, 1], [], []>} : vector<1x8xf32>, vector<8x32xf32>, vector<1x32xf32> -> vector<1x32xf32>
    %868 = arith.addf %863, %867 : vector<1x32xf32>
    %869 = vector.extract_strided_slice %714 {offsets = [4, 0], sizes = [1, 8], strides = [1, 1]} : vector<5x8xf32> to vector<1x8xf32>
    %c1_235 = arith.constant 1 : index
    %c4_236 = arith.constant 4 : index
    %c0_237 = arith.constant 0 : index
    %c0_238 = arith.constant 0 : index
    %870 = vector.load %arg6[%c1_235, %c4_236, %c0_237, %c0_238] : memref<5x5x8x32xf32, #tpu.memory_space<vmem>>, vector<1x1x8x32xf32>
    %871 = vector.shape_cast %870 : vector<1x1x8x32xf32> to vector<8x32xf32>
    %cst_239 = arith.constant dense<0.000000e+00> : vector<1x32xf32>
    %872 = tpu.matmul %869, %871, %cst_239 {dimension_numbers = #tpu.dot_dimension_numbers<[1], [0], [0], [1], [0, 0, 1, 1], [], []>} : vector<1x8xf32>, vector<8x32xf32>, vector<1x32xf32> -> vector<1x32xf32>
    %873 = arith.addf %868, %872 : vector<1x32xf32>
    %874 = vector.extract_strided_slice %750 {offsets = [0, 0], sizes = [1, 8], strides = [1, 1]} : vector<5x8xf32> to vector<1x8xf32>
    %c2_240 = arith.constant 2 : index
    %c0_241 = arith.constant 0 : index
    %c0_242 = arith.constant 0 : index
    %c0_243 = arith.constant 0 : index
    %875 = vector.load %arg6[%c2_240, %c0_241, %c0_242, %c0_243] : memref<5x5x8x32xf32, #tpu.memory_space<vmem>>, vector<1x1x8x32xf32>
    %876 = vector.shape_cast %875 : vector<1x1x8x32xf32> to vector<8x32xf32>
    %cst_244 = arith.constant dense<0.000000e+00> : vector<1x32xf32>
    %877 = tpu.matmul %874, %876, %cst_244 {dimension_numbers = #tpu.dot_dimension_numbers<[1], [0], [0], [1], [0, 0, 1, 1], [], []>} : vector<1x8xf32>, vector<8x32xf32>, vector<1x32xf32> -> vector<1x32xf32>
    %878 = arith.addf %873, %877 : vector<1x32xf32>
    %879 = vector.extract_strided_slice %750 {offsets = [1, 0], sizes = [1, 8], strides = [1, 1]} : vector<5x8xf32> to vector<1x8xf32>
    %c2_245 = arith.constant 2 : index
    %c1_246 = arith.constant 1 : index
    %c0_247 = arith.constant 0 : index
    %c0_248 = arith.constant 0 : index
    %880 = vector.load %arg6[%c2_245, %c1_246, %c0_247, %c0_248] : memref<5x5x8x32xf32, #tpu.memory_space<vmem>>, vector<1x1x8x32xf32>
    %881 = vector.shape_cast %880 : vector<1x1x8x32xf32> to vector<8x32xf32>
    %cst_249 = arith.constant dense<0.000000e+00> : vector<1x32xf32>
    %882 = tpu.matmul %879, %881, %cst_249 {dimension_numbers = #tpu.dot_dimension_numbers<[1], [0], [0], [1], [0, 0, 1, 1], [], []>} : vector<1x8xf32>, vector<8x32xf32>, vector<1x32xf32> -> vector<1x32xf32>
    %883 = arith.addf %878, %882 : vector<1x32xf32>
    %884 = vector.extract_strided_slice %750 {offsets = [2, 0], sizes = [1, 8], strides = [1, 1]} : vector<5x8xf32> to vector<1x8xf32>
    %c2_250 = arith.constant 2 : index
    %c2_251 = arith.constant 2 : index
    %c0_252 = arith.constant 0 : index
    %c0_253 = arith.constant 0 : index
    %885 = vector.load %arg6[%c2_250, %c2_251, %c0_252, %c0_253] : memref<5x5x8x32xf32, #tpu.memory_space<vmem>>, vector<1x1x8x32xf32>
    %886 = vector.shape_cast %885 : vector<1x1x8x32xf32> to vector<8x32xf32>
    %cst_254 = arith.constant dense<0.000000e+00> : vector<1x32xf32>
    %887 = tpu.matmul %884, %886, %cst_254 {dimension_numbers = #tpu.dot_dimension_numbers<[1], [0], [0], [1], [0, 0, 1, 1], [], []>} : vector<1x8xf32>, vector<8x32xf32>, vector<1x32xf32> -> vector<1x32xf32>
    %888 = arith.addf %883, %887 : vector<1x32xf32>
    %889 = vector.extract_strided_slice %750 {offsets = [3, 0], sizes = [1, 8], strides = [1, 1]} : vector<5x8xf32> to vector<1x8xf32>
    %c2_255 = arith.constant 2 : index
    %c3_256 = arith.constant 3 : index
    %c0_257 = arith.constant 0 : index
    %c0_258 = arith.constant 0 : index
    %890 = vector.load %arg6[%c2_255, %c3_256, %c0_257, %c0_258] : memref<5x5x8x32xf32, #tpu.memory_space<vmem>>, vector<1x1x8x32xf32>
    %891 = vector.shape_cast %890 : vector<1x1x8x32xf32> to vector<8x32xf32>
    %cst_259 = arith.constant dense<0.000000e+00> : vector<1x32xf32>
    %892 = tpu.matmul %889, %891, %cst_259 {dimension_numbers = #tpu.dot_dimension_numbers<[1], [0], [0], [1], [0, 0, 1, 1], [], []>} : vector<1x8xf32>, vector<8x32xf32>, vector<1x32xf32> -> vector<1x32xf32>
    %893 = arith.addf %888, %892 : vector<1x32xf32>
    %894 = vector.extract_strided_slice %750 {offsets = [4, 0], sizes = [1, 8], strides = [1, 1]} : vector<5x8xf32> to vector<1x8xf32>
    %c2_260 = arith.constant 2 : index
    %c4_261 = arith.constant 4 : index
    %c0_262 = arith.constant 0 : index
    %c0_263 = arith.constant 0 : index
    %895 = vector.load %arg6[%c2_260, %c4_261, %c0_262, %c0_263] : memref<5x5x8x32xf32, #tpu.memory_space<vmem>>, vector<1x1x8x32xf32>
    %896 = vector.shape_cast %895 : vector<1x1x8x32xf32> to vector<8x32xf32>
    %cst_264 = arith.constant dense<0.000000e+00> : vector<1x32xf32>
    %897 = tpu.matmul %894, %896, %cst_264 {dimension_numbers = #tpu.dot_dimension_numbers<[1], [0], [0], [1], [0, 0, 1, 1], [], []>} : vector<1x8xf32>, vector<8x32xf32>, vector<1x32xf32> -> vector<1x32xf32>
    %898 = arith.addf %893, %897 : vector<1x32xf32>
    %899 = vector.extract_strided_slice %786 {offsets = [0, 0], sizes = [1, 8], strides = [1, 1]} : vector<5x8xf32> to vector<1x8xf32>
    %c3_265 = arith.constant 3 : index
    %c0_266 = arith.constant 0 : index
    %c0_267 = arith.constant 0 : index
    %c0_268 = arith.constant 0 : index
    %900 = vector.load %arg6[%c3_265, %c0_266, %c0_267, %c0_268] : memref<5x5x8x32xf32, #tpu.memory_space<vmem>>, vector<1x1x8x32xf32>
    %901 = vector.shape_cast %900 : vector<1x1x8x32xf32> to vector<8x32xf32>
    %cst_269 = arith.constant dense<0.000000e+00> : vector<1x32xf32>
    %902 = tpu.matmul %899, %901, %cst_269 {dimension_numbers = #tpu.dot_dimension_numbers<[1], [0], [0], [1], [0, 0, 1, 1], [], []>} : vector<1x8xf32>, vector<8x32xf32>, vector<1x32xf32> -> vector<1x32xf32>
    %903 = arith.addf %898, %902 : vector<1x32xf32>
    %904 = vector.extract_strided_slice %786 {offsets = [1, 0], sizes = [1, 8], strides = [1, 1]} : vector<5x8xf32> to vector<1x8xf32>
    %c3_270 = arith.constant 3 : index
    %c1_271 = arith.constant 1 : index
    %c0_272 = arith.constant 0 : index
    %c0_273 = arith.constant 0 : index
    %905 = vector.load %arg6[%c3_270, %c1_271, %c0_272, %c0_273] : memref<5x5x8x32xf32, #tpu.memory_space<vmem>>, vector<1x1x8x32xf32>
    %906 = vector.shape_cast %905 : vector<1x1x8x32xf32> to vector<8x32xf32>
    %cst_274 = arith.constant dense<0.000000e+00> : vector<1x32xf32>
    %907 = tpu.matmul %904, %906, %cst_274 {dimension_numbers = #tpu.dot_dimension_numbers<[1], [0], [0], [1], [0, 0, 1, 1], [], []>} : vector<1x8xf32>, vector<8x32xf32>, vector<1x32xf32> -> vector<1x32xf32>
    %908 = arith.addf %903, %907 : vector<1x32xf32>
    %909 = vector.extract_strided_slice %786 {offsets = [2, 0], sizes = [1, 8], strides = [1, 1]} : vector<5x8xf32> to vector<1x8xf32>
    %c3_275 = arith.constant 3 : index
    %c2_276 = arith.constant 2 : index
    %c0_277 = arith.constant 0 : index
    %c0_278 = arith.constant 0 : index
    %910 = vector.load %arg6[%c3_275, %c2_276, %c0_277, %c0_278] : memref<5x5x8x32xf32, #tpu.memory_space<vmem>>, vector<1x1x8x32xf32>
    %911 = vector.shape_cast %910 : vector<1x1x8x32xf32> to vector<8x32xf32>
    %cst_279 = arith.constant dense<0.000000e+00> : vector<1x32xf32>
    %912 = tpu.matmul %909, %911, %cst_279 {dimension_numbers = #tpu.dot_dimension_numbers<[1], [0], [0], [1], [0, 0, 1, 1], [], []>} : vector<1x8xf32>, vector<8x32xf32>, vector<1x32xf32> -> vector<1x32xf32>
    %913 = arith.addf %908, %912 : vector<1x32xf32>
    %914 = vector.extract_strided_slice %786 {offsets = [3, 0], sizes = [1, 8], strides = [1, 1]} : vector<5x8xf32> to vector<1x8xf32>
    %c3_280 = arith.constant 3 : index
    %c3_281 = arith.constant 3 : index
    %c0_282 = arith.constant 0 : index
    %c0_283 = arith.constant 0 : index
    %915 = vector.load %arg6[%c3_280, %c3_281, %c0_282, %c0_283] : memref<5x5x8x32xf32, #tpu.memory_space<vmem>>, vector<1x1x8x32xf32>
    %916 = vector.shape_cast %915 : vector<1x1x8x32xf32> to vector<8x32xf32>
    %cst_284 = arith.constant dense<0.000000e+00> : vector<1x32xf32>
    %917 = tpu.matmul %914, %916, %cst_284 {dimension_numbers = #tpu.dot_dimension_numbers<[1], [0], [0], [1], [0, 0, 1, 1], [], []>} : vector<1x8xf32>, vector<8x32xf32>, vector<1x32xf32> -> vector<1x32xf32>
    %918 = arith.addf %913, %917 : vector<1x32xf32>
    %919 = vector.extract_strided_slice %786 {offsets = [4, 0], sizes = [1, 8], strides = [1, 1]} : vector<5x8xf32> to vector<1x8xf32>
    %c3_285 = arith.constant 3 : index
    %c4_286 = arith.constant 4 : index
    %c0_287 = arith.constant 0 : index
    %c0_288 = arith.constant 0 : index
    %920 = vector.load %arg6[%c3_285, %c4_286, %c0_287, %c0_288] : memref<5x5x8x32xf32, #tpu.memory_space<vmem>>, vector<1x1x8x32xf32>
    %921 = vector.shape_cast %920 : vector<1x1x8x32xf32> to vector<8x32xf32>
    %cst_289 = arith.constant dense<0.000000e+00> : vector<1x32xf32>
    %922 = tpu.matmul %919, %921, %cst_289 {dimension_numbers = #tpu.dot_dimension_numbers<[1], [0], [0], [1], [0, 0, 1, 1], [], []>} : vector<1x8xf32>, vector<8x32xf32>, vector<1x32xf32> -> vector<1x32xf32>
    %923 = arith.addf %918, %922 : vector<1x32xf32>
    %924 = vector.extract_strided_slice %822 {offsets = [0, 0], sizes = [1, 8], strides = [1, 1]} : vector<5x8xf32> to vector<1x8xf32>
    %c4_290 = arith.constant 4 : index
    %c0_291 = arith.constant 0 : index
    %c0_292 = arith.constant 0 : index
    %c0_293 = arith.constant 0 : index
    %925 = vector.load %arg6[%c4_290, %c0_291, %c0_292, %c0_293] : memref<5x5x8x32xf32, #tpu.memory_space<vmem>>, vector<1x1x8x32xf32>
    %926 = vector.shape_cast %925 : vector<1x1x8x32xf32> to vector<8x32xf32>
    %cst_294 = arith.constant dense<0.000000e+00> : vector<1x32xf32>
    %927 = tpu.matmul %924, %926, %cst_294 {dimension_numbers = #tpu.dot_dimension_numbers<[1], [0], [0], [1], [0, 0, 1, 1], [], []>} : vector<1x8xf32>, vector<8x32xf32>, vector<1x32xf32> -> vector<1x32xf32>
    %928 = arith.addf %923, %927 : vector<1x32xf32>
    %929 = vector.extract_strided_slice %822 {offsets = [1, 0], sizes = [1, 8], strides = [1, 1]} : vector<5x8xf32> to vector<1x8xf32>
    %c4_295 = arith.constant 4 : index
    %c1_296 = arith.constant 1 : index
    %c0_297 = arith.constant 0 : index
    %c0_298 = arith.constant 0 : index
    %930 = vector.load %arg6[%c4_295, %c1_296, %c0_297, %c0_298] : memref<5x5x8x32xf32, #tpu.memory_space<vmem>>, vector<1x1x8x32xf32>
    %931 = vector.shape_cast %930 : vector<1x1x8x32xf32> to vector<8x32xf32>
    %cst_299 = arith.constant dense<0.000000e+00> : vector<1x32xf32>
    %932 = tpu.matmul %929, %931, %cst_299 {dimension_numbers = #tpu.dot_dimension_numbers<[1], [0], [0], [1], [0, 0, 1, 1], [], []>} : vector<1x8xf32>, vector<8x32xf32>, vector<1x32xf32> -> vector<1x32xf32>
    %933 = arith.addf %928, %932 : vector<1x32xf32>
    %934 = vector.extract_strided_slice %822 {offsets = [2, 0], sizes = [1, 8], strides = [1, 1]} : vector<5x8xf32> to vector<1x8xf32>
    %c4_300 = arith.constant 4 : index
    %c2_301 = arith.constant 2 : index
    %c0_302 = arith.constant 0 : index
    %c0_303 = arith.constant 0 : index
    %935 = vector.load %arg6[%c4_300, %c2_301, %c0_302, %c0_303] : memref<5x5x8x32xf32, #tpu.memory_space<vmem>>, vector<1x1x8x32xf32>
    %936 = vector.shape_cast %935 : vector<1x1x8x32xf32> to vector<8x32xf32>
    %cst_304 = arith.constant dense<0.000000e+00> : vector<1x32xf32>
    %937 = tpu.matmul %934, %936, %cst_304 {dimension_numbers = #tpu.dot_dimension_numbers<[1], [0], [0], [1], [0, 0, 1, 1], [], []>} : vector<1x8xf32>, vector<8x32xf32>, vector<1x32xf32> -> vector<1x32xf32>
    %938 = arith.addf %933, %937 : vector<1x32xf32>
    %939 = vector.extract_strided_slice %822 {offsets = [3, 0], sizes = [1, 8], strides = [1, 1]} : vector<5x8xf32> to vector<1x8xf32>
    %c4_305 = arith.constant 4 : index
    %c3_306 = arith.constant 3 : index
    %c0_307 = arith.constant 0 : index
    %c0_308 = arith.constant 0 : index
    %940 = vector.load %arg6[%c4_305, %c3_306, %c0_307, %c0_308] : memref<5x5x8x32xf32, #tpu.memory_space<vmem>>, vector<1x1x8x32xf32>
    %941 = vector.shape_cast %940 : vector<1x1x8x32xf32> to vector<8x32xf32>
    %cst_309 = arith.constant dense<0.000000e+00> : vector<1x32xf32>
    %942 = tpu.matmul %939, %941, %cst_309 {dimension_numbers = #tpu.dot_dimension_numbers<[1], [0], [0], [1], [0, 0, 1, 1], [], []>} : vector<1x8xf32>, vector<8x32xf32>, vector<1x32xf32> -> vector<1x32xf32>
    %943 = arith.addf %938, %942 : vector<1x32xf32>
    %944 = vector.extract_strided_slice %822 {offsets = [4, 0], sizes = [1, 8], strides = [1, 1]} : vector<5x8xf32> to vector<1x8xf32>
    %c4_310 = arith.constant 4 : index
    %c4_311 = arith.constant 4 : index
    %c0_312 = arith.constant 0 : index
    %c0_313 = arith.constant 0 : index
    %945 = vector.load %arg6[%c4_310, %c4_311, %c0_312, %c0_313] : memref<5x5x8x32xf32, #tpu.memory_space<vmem>>, vector<1x1x8x32xf32>
    %946 = vector.shape_cast %945 : vector<1x1x8x32xf32> to vector<8x32xf32>
    %cst_314 = arith.constant dense<0.000000e+00> : vector<1x32xf32>
    %947 = tpu.matmul %944, %946, %cst_314 {dimension_numbers = #tpu.dot_dimension_numbers<[1], [0], [0], [1], [0, 0, 1, 1], [], []>} : vector<1x8xf32>, vector<8x32xf32>, vector<1x32xf32> -> vector<1x32xf32>
    %948 = arith.addf %943, %947 : vector<1x32xf32>
    %cst_315 = arith.constant 0.000000e+00 : f32
    %949 = vector.broadcast %cst_315 : f32 to vector<1x32xf32>
    %950 = arith.maximumf %948, %949 : vector<1x32xf32>
    %c0_316 = arith.constant 0 : index
    %c0_317 = arith.constant 0 : index
    %951 = vector.load %arg8[%c0_316, %c0_317] : memref<32x2xf32, #tpu.memory_space<vmem>>, vector<32x2xf32>
    %cst_318 = arith.constant dense<0.000000e+00> : vector<1x2xf32>
    %952 = tpu.matmul %950, %951, %cst_318 {dimension_numbers = #tpu.dot_dimension_numbers<[1], [0], [0], [1], [0, 0, 1, 1], [], []>} : vector<1x32xf32>, vector<32x2xf32>, vector<1x2xf32> -> vector<1x2xf32>
    %c0_319 = arith.constant 0 : index
    %c0_320 = arith.constant 0 : index
    %953 = vector.load %arg9[%c0_319, %c0_320] : memref<1x2xf32, #tpu.memory_space<vmem>>, vector<1x2xf32>
    %954 = arith.addf %952, %953 : vector<1x2xf32>
    %cst_321 = arith.constant dense<0xFF800000> : vector<1xf32>
    %955 = vector.multi_reduction <maximumf>, %954, %cst_321 [1] : vector<1x2xf32> to vector<1xf32>
    %956 = vector.shape_cast %955 : vector<1xf32> to vector<1x1xf32>
    %957 = vector.broadcast %956 : vector<1x1xf32> to vector<1x2xf32>
    %958 = arith.subf %954, %957 : vector<1x2xf32>
    %959 = math.exp %958 : vector<1x2xf32>
    %cst_322 = arith.constant dense<0.000000e+00> : vector<1xf32>
    %960 = vector.multi_reduction <add>, %959, %cst_322 [1] : vector<1x2xf32> to vector<1xf32>
    %961 = vector.shape_cast %960 : vector<1xf32> to vector<1x1xf32>
    %962 = math.log %961 : vector<1x1xf32>
    %963 = vector.broadcast %962 : vector<1x1xf32> to vector<1x2xf32>
    %964 = arith.subf %958, %963 : vector<1x2xf32>
    %c0_323 = arith.constant 0 : index
    %c0_324 = arith.constant 0 : index
    %c0_325 = arith.constant 0 : index
    %965 = vector.load %arg10[%c0_323, %c0_324, %c0_325] : memref<1x1x2xf32, #tpu.memory_space<vmem>>, vector<1x1x2xf32>
    %966 = vector.shape_cast %965 : vector<1x1x2xf32> to vector<1x2xf32>
    %967 = vector.shape_cast %964 : vector<1x2xf32> to vector<1x1x2xf32>
    tpu.vector_store %arg10[%c0_323, %c0_324, %c0_325], %967 {strides = array<i32>} : memref<1x1x2xf32, #tpu.memory_space<vmem>>, vector<1x1x2xf32>,
    return
  }
  func.func @transform_0(%arg0: i32) -> (i32, i32, i32, i32) {
    %c0_i32 = arith.constant 0 : i32
    %c0_i32_0 = arith.constant 0 : i32
    %c0_i32_1 = arith.constant 0 : i32
    %c0_i32_2 = arith.constant 0 : i32
    return %arg0, %c0_i32, %c0_i32_0, %c0_i32_1 : i32, i32, i32, i32
  }
  func.func @transform_1(%arg0: i32) -> (i32, i32, i32, i32) {
    %c0_i32 = arith.constant 0 : i32
    %c0_i32_0 = arith.constant 0 : i32
    %c0_i32_1 = arith.constant 0 : i32
    %c0_i32_2 = arith.constant 0 : i32
    %c0_i32_3 = arith.constant 0 : i32
    return %c0_i32, %c0_i32_0, %c0_i32_1, %c0_i32_2 : i32, i32, i32, i32
  }
  func.func @transform_2(%arg0: i32) -> (i32, i32) {
    %c0_i32 = arith.constant 0 : i32
    %c0_i32_0 = arith.constant 0 : i32
    %c0_i32_1 = arith.constant 0 : i32
    return %c0_i32, %c0_i32_0 : i32, i32
  }
  func.func @transform_3(%arg0: i32) -> (i32, i32, i32, i32) {
    %c0_i32 = arith.constant 0 : i32
    %c0_i32_0 = arith.constant 0 : i32
    %c0_i32_1 = arith.constant 0 : i32
    %c0_i32_2 = arith.constant 0 : i32
    %c0_i32_3 = arith.constant 0 : i32
    return %c0_i32, %c0_i32_0, %c0_i32_1, %c0_i32_2 : i32, i32, i32, i32
  }
  func.func @transform_4(%arg0: i32) -> (i32, i32) {
    %c0_i32 = arith.constant 0 : i32
    %c0_i32_0 = arith.constant 0 : i32
    %c0_i32_1 = arith.constant 0 : i32
    return %c0_i32, %c0_i32_0 : i32, i32
  }
  func.func @transform_5(%arg0: i32) -> (i32, i32, i32, i32) {
    %c0_i32 = arith.constant 0 : i32
    %c0_i32_0 = arith.constant 0 : i32
    %c0_i32_1 = arith.constant 0 : i32
    %c0_i32_2 = arith.constant 0 : i32
    %c0_i32_3 = arith.constant 0 : i32
    return %c0_i32, %c0_i32_0, %c0_i32_1, %c0_i32_2 : i32, i32, i32, i32
  }
  func.func @transform_6(%arg0: i32) -> (i32, i32) {
    %c0_i32 = arith.constant 0 : i32
    %c0_i32_0 = arith.constant 0 : i32
    %c0_i32_1 = arith.constant 0 : i32
    return %c0_i32, %c0_i32_0 : i32, i32
  }
  func.func @transform_7(%arg0: i32) -> (i32, i32) {
    %c0_i32 = arith.constant 0 : i32
    %c0_i32_0 = arith.constant 0 : i32
    %c0_i32_1 = arith.constant 0 : i32
    return %c0_i32, %c0_i32_0 : i32, i32
  }
  func.func @transform_8(%arg0: i32) -> (i32, i32) {
    %c0_i32 = arith.constant 0 : i32
    %c0_i32_0 = arith.constant 0 : i32
    %c0_i32_1 = arith.constant 0 : i32
    return %c0_i32, %c0_i32_0 : i32, i32
  }
  func.func @transform_9(%arg0: i32) -> (i32, i32, i32) {
    %c0_i32 = arith.constant 0 : i32
    %c0_i32_0 = arith.constant 0 : i32
    %c0_i32_1 = arith.constant 0 : i32
    return %arg0, %c0_i32, %c0_i32_0 : i32, i32, i32
  }
}

</mosaic_0001>

<bundles_post_ra>
// kernel: forward.1
= control target key start
LH: loop header
LB: loop body
LE: loop exit
PB: predicated region body
PF: predicated region fallthrough
CT: control target
= control target key end

     0   :  { %14 = vsyncpa [#allocation3], 0  ;;  %s10353_s0 = inlined_call_operand.vmem [shape: f32[2,16,16,1], index: 0, kind: input, shape index: {}]   ;;  %s10354_s1 = inlined_call_operand.vmem [shape: f32[3,3,1,4], index: 1, kind: input, shape index: {}]   ;;  %s10355_s2 = inlined_call_operand.vmem [shape: f32[3,4], index: 2, kind: input, shape index: {}]   ;;  %s10356_s3 = inlined_call_operand.vmem [shape: f32[3,3,4,8], index: 3, kind: input, shape index: {}]   ;;  %s10357_s4 = inlined_call_operand.vmem [shape: f32[3,8], index: 4, kind: input, shape index: {}]   ;;  %s10358_s5 = inlined_call_operand.vmem [shape: f32[5,5,8,32], index: 5, kind: input, shape index: {}]   ;;  %s10359_s6 = inlined_call_operand.vmem [shape: f32[1,32], index: 6, kind: input, shape index: {}]   ;;  %s10360_s7 = inlined_call_operand.vmem [shape: f32[32,2], index: 7, kind: input, shape index: {}]   ;;  %s10361_s8 = inlined_call_operand.vmem [shape: f32[1,2], index: 8, kind: input, shape index: {}]   ;;  %s10362_s9 = inlined_call_operand.hbm [shape: f32[2,1,2], index: 9, kind: output, shape index: {}]  }
   0x1   :  { %16 = vsyncpa [#allocation3 + $0x1], 0  ;;  %s8467_s30 = smov 0   ;;  %s8469_s10 = smov 0  }
   0x2   :  { %s8471_s11 = smov 0   ;;  %s8473_s12 = smov 0  }
   0x3 LB: > { %s8488_s13 = sadd.s32 4294967295, %s8410_s12   ;;  %s7544_s14 = sadd.s32 4294967294, %s8410_s12   ;;  %s8410_s12 = sphi %s8473_s12, %s10446_s12   ;;  %s8406_s11 = sphi %s8471_s11, %s10445_s11   ;;  %s8402_s10 = sphi %s8469_s10, %s10444_s10   ;;  %s8398_s30 = sphi %s8467_s30, %s10443_s30  }
   0x4   : > { %s8492_s15 = sadd.s32 1, %s8410_s12   ;;  %s223_s16 = sadd.s32 1, %s8406_s11 }
   0x5   : > { %s220_s17 = ssub.s32 %s8410_s12, %s8492_s15  ;;  %p233_p0 = scmp.ne.s32.totalorder %s8406_s11, %s8402_s10 }
   0x6   : > { %p221_p1 = scmp.eq.s32.totalorder %s220_s17, 0  ;;  %p234_p2 = scmp.eq.s32.totalorder %s8488_s13, 1 }
   0x7   : > { %p239_p3 = scmp.ne.s32.totalorder %s8402_s10, %s8398_s30  ;;  %p240_p4 = scmp.eq.s32.totalorder %s7544_s14, 1 }
   0x8   : > { %s8503_s18 = scalar_select %p221_p1, %s8406_s11, %s223_s16  }
   0x9   : > { %p8505_p5 = por %p234_p2, %p233_p0  ;;  %p8509_p6 = por %p240_p4, %p239_p3 }
   0xa   : > { %p7547_p7 = scmp.ge.s32.totalorder %s8410_s12, 1  ;;  %p290_p8 = scmp.lt.s32.totalorder %s8410_s12, 3 }
   0xc   : > { %p291_p9 = pnand %p7547_p7, %p290_p8 }
   0xe   : > { %294 = sbr.rel (%p291_p9) target bundleno = 1573 (0x625), region = 56 }
  0x15   : > { %p325_p10 = scmp.lt.s32.totalorder %s8488_s13, 1  ;;  %v8412_v0 = vmov 0   ;;  %v8557_v35 = vld [vmem:[%s10354_s1 + $0x1] ss:$0 sm:$0xff]  ;;  %v8562_v36 = vld [vmem:[%s10354_s1] ss:$0 sm:$0xff] }
  0x16   : > { %8330 = vset.pattern.permute.xlu1 %v8412_v0  ;;  %8329 = vset.pattern.permute.xlu0 %v8412_v0  ;;  %v8567_v37 = vld [vmem:[%s10354_s1 + $0x2] ss:$0 sm:$0xff]  ;;  %v8573_v41 = vld [vmem:[%s10354_s1 + $0x3] ss:$0 sm:$0xff]  ;;  %vm629_vm0 = vcmask 1046528   ;;  %vm792_vm1 = vcmask 1045504  }
  0x17   : > { %s326_s21 = scalar_select %p325_p10, %s8488_s13, 1  ;;  %v8581_v45 = vld [vmem:[%s10354_s1 + $0x4] ss:$0 sm:$0xff]  ;;  %v8597_v62 = vld [vmem:[%s10354_s1 + $0x5] ss:$0 sm:$0xff]  ;;  %vm2177_vm2 = vcmask 1043456  }
  0x18   : > { %vm8414_vm3 = vmmov 0   ;;  %vm2174_vm7 = vcmask 31744   ;;  %vm5483_vm12 = vcmask 64512   ;;  %vm7388_vm13 = vcmask 261120   ;;  %s323_s14 = sand.u32 1, %s8402_s10   ;;  %s7721_s16 = sshll.u32 %s8488_s13, 4 }
  0x19   : > { %s7724_s22 = sshll.u32 %s326_s21, 8  ;;  %vm7462_vm14 = vcmask 8192   ;;  %s324_s17 = scalar_lea.vmem [#allocation2], %s323_s14 }
  0x1a   : > { %s8520_s25 = scalar_lea.vmem %s10353_s0, %s7724_s22  ;;  %s7489_s21 = sshll.u32 %s324_s17, 4  ;;  %s10312_s21 = int_to_ptr.vmem [resolvable:$true] %s7489_s21 }
  0x1b   : > { %v332_v1 = vld [vmem:[%s8520_s25 + $0x10] sm:$0xff]  ;;  %v330_v2 = vld [vmem:[%s8520_s25] sm:$0xff]  ;;  %v333_v3 = vld [vmem:[%s8520_s25 + $0x18] sm:$0xff]  ;;  %s10310_s24 = scalar_lea.hbm %s10362_s9, %s7721_s16  ;;  %s8348_s26 = scalar_lea.vmem %s10312_s21, 16 }
  0x1c   : > { %375 = vperm.xlu1 %8330, %v332_v1   ;;  %365 = vperm.xlu0 %8329, %v330_v2   ;;  %v331_v4 = vld [vmem:[%s8520_s25 + $0x8] sm:$0xff]  ;;  %v334_v6 = vld [vmem:[%s8520_s25 + $0x20] sm:$0xff]  ;;  %v337_v7 = vld [vmem:[%s8520_s25 + $0x38] sm:$0xff]  ;;  %p8349_p11 = scmp.ne.s32.totalorder %s10312_s21, %s8348_s26  ;;  %s8416_s13 = smov [#allocation2]  }
  0x1d   : > { %v335_v5 = vld [vmem:[%s8520_s25 + $0x28] sm:$0xff]  ;;  %v336_v8 = vld [vmem:[%s8520_s25 + $0x30] sm:$0xff]  ;;  %v338_v10 = vld [vmem:[%s8520_s25 + $0x40] sm:$0xff]  ;;  %s8352_s27 = sshll.u32 %s8416_s13, 4  ;;  %s8353_s27 = int_to_ptr.vmem [resolvable:$false] %s8352_s27 }
  0x1e   : > { %v339_v9 = vld [vmem:[%s8520_s25 + $0x48] sm:$0xff]  ;;  %v341_v11 = vld [vmem:[%s8520_s25 + $0x58] sm:$0xff]  ;;  %v340_v12 = vld [vmem:[%s8520_s25 + $0x50] sm:$0xff]  ;;  %p8350_p12 = pnand %p8349_p11, %p8505_p5  ;;  %s8354_s28 = scalar_lea.vmem %s8353_s27, 32 }
  0x1f   : > { %v343_v13 = vld [vmem:[%s8520_s25 + $0x68] sm:$0xff]  ;;  %v342_v14 = vld [vmem:[%s8520_s25 + $0x60] sm:$0xff]  ;;  %v345_v15 = vld [vmem:[%s8520_s25 + $0x78] sm:$0xff]  ;;  %p8355_p0 = scmp.lt.s32.totalorder %s10312_s21, %s8353_s27  ;;  %p8356_p1 = scmp.lt.s32.totalorder %s8354_s28, %s8348_s26 }
  0x20   : > { %380 = vperm.xlu1 %8330, %v333_v3   ;;  %370 = vperm.xlu0 %8329, %v331_v4   ;;  %v344_v16 = vld [vmem:[%s8520_s25 + $0x70] sm:$0xff]  ;;  %v347_v17 = vld [vmem:[%s8520_s25 + $0x88] sm:$0xff]  ;;  %v346_v18 = vld [vmem:[%s8520_s25 + $0x80] sm:$0xff]  ;;  %p8351_p13 = pneg %p8350_p12 }
  0x21   : > { %v349_v19 = vld [vmem:[%s8520_s25 + $0x98] sm:$0xff]  ;;  %v348_v20 = vld [vmem:[%s8520_s25 + $0x90] sm:$0xff]  ;;  %v351_v21 = vld [vmem:[%s8520_s25 + $0xa8] sm:$0xff]  ;;  %p8357_p2 = por %p8356_p1, %p8355_p0 }
  0x22   : > { %v350_v22 = vld [vmem:[%s8520_s25 + $0xa0] sm:$0xff]  ;;  %v353_v23 = vld [vmem:[%s8520_s25 + $0xb8] sm:$0xff]  ;;  %v352_v24 = vld [vmem:[%s8520_s25 + $0xb0] sm:$0xff] }
  0x23   : > { %v355_v25 = vld [vmem:[%s8520_s25 + $0xc8] sm:$0xff]  ;;  %v354_v26 = vld [vmem:[%s8520_s25 + $0xc0] sm:$0xff]  ;;  %v357_v27 = vld [vmem:[%s8520_s25 + $0xd8] sm:$0xff]  ;;  %p8358_p3 = pnand %p8357_p2, %p8351_p13 }
  0x24   : > { %390 = vperm.xlu1 %8330, %v335_v5   ;;  %385 = vperm.xlu0 %8329, %v334_v6   ;;  %v356_v28 = vld [vmem:[%s8520_s25 + $0xd0] sm:$0xff]  ;;  %v359_v29 = vld [vmem:[%s8520_s25 + $0xe8] sm:$0xff]  ;;  %v358_v30 = vld [vmem:[%s8520_s25 + $0xe0] sm:$0xff] }
  0x25   : > { %v361_v31 = vld [vmem:[%s8520_s25 + $0xf8] sm:$0xff]  ;;  %v360_v32 = vld [vmem:[%s8520_s25 + $0xf0] sm:$0xff]  ;;  %s7477_s25 = scalar_lea.sflag [#allocation3], %s323_s14 }
  0x28   : > { %400 = vperm.xlu1 %8330, %v337_v7   ;;  %395 = vperm.xlu0 %8329, %v336_v8  }
  0x2c   : > { %410 = vperm.xlu1 %8330, %v339_v9   ;;  %405 = vperm.xlu0 %8329, %v338_v10  }
  0x30   : > { %420 = vperm.xlu1 %8330, %v341_v11   ;;  %415 = vperm.xlu0 %8329, %v340_v12  }
  0x34   : > { %430 = vperm.xlu1 %8330, %v343_v13   ;;  %425 = vperm.xlu0 %8329, %v342_v14  }
  0x38   : > { %440 = vperm.xlu1 %8330, %v345_v15   ;;  %435 = vperm.xlu0 %8329, %v344_v16  }
  0x3c   : > { %450 = vperm.xlu1 %8330, %v347_v17   ;;  %445 = vperm.xlu0 %8329, %v346_v18  }
  0x40   : > { %460 = vperm.xlu1 %8330, %v349_v19   ;;  %455 = vperm.xlu0 %8329, %v348_v20  }
  0x44   : > { %470 = vperm.xlu1 %8330, %v351_v21   ;;  %465 = vperm.xlu0 %8329, %v350_v22  }
  0x48   : > { %480 = vperm.xlu1 %8330, %v353_v23   ;;  %475 = vperm.xlu0 %8329, %v352_v24  }
  0x4c   : > { %490 = vperm.xlu1 %8330, %v355_v25   ;;  %485 = vperm.xlu0 %8329, %v354_v26   ;;  %v8610_v25 = vld [vmem:[%s10354_s1 + $0x6] ss:$0 sm:$0xff] }
  0x50   : > { %500 = vperm.xlu1 %8330, %v357_v27   ;;  %495 = vperm.xlu0 %8329, %v356_v28  }
  0x54   : > { %900 = vperm.xlu1 %8330, %v359_v29   ;;  %895 = vperm.xlu0 %8329, %v358_v30  }
  0x58   : > { %1298 = vperm.xlu1 %8330, %v361_v31   ;;  %1293 = vperm.xlu0 %8329, %v360_v32   ;;  %v8620_v31 = vld [vmem:[%s10354_s1 + $0x7] ss:$0 sm:$0xff] }
  0x9b   : > { %v376_v33 = vpop.permute.xlu1 %375  ;;  %v366_v34 = vpop.permute.xlu0 %365 }
  0x9c   : > { %v573_v38 = vmul.f32 %v8557_v35, %v366_v34  ;;  %v511_v43 = vmul.f32 %v8562_v36, %v376_v33  ;;  %v575_v44 = vmul.f32 %v8557_v35, %v376_v33  ;;  %v736_v46 = vmul.f32 %v8567_v37, %v366_v34 }
  0x9d   : > { %v738_v50 = vmul.f32 %v8567_v37, %v376_v33  ;;  %v909_v51 = vmul.f32 %v8573_v41, %v376_v33  ;;  %v973_v59 = vmul.f32 %v8581_v45, %v376_v33  ;;  %v509_v60 = vmul.f32 %v8562_v36, %v366_v34 }
  0x9e   : > { %v630_v52 = vrot.slane %v573_v38, 1  ;;  %v633_v58 = vrot.slane %v575_v44, 1  ;;  %v793_v63 = vrot.slane %v736_v46, 2  ;;  %v1135_v13 = vmul.f32 %v8597_v62, %v376_v33  ;;  %v8631_v44 = vld [vmem:[%s10354_s1 + $0x8] ss:$0 sm:$0xff] }
  0x9f   : > { %v381_v39 = vpop.permute.xlu1 %380  ;;  %v371_v40 = vpop.permute.xlu0 %370  ;;  %v1029_v12 = vrot.slane %v973_v59, 1  ;;  %v796_v16 = vrot.slane %v738_v50, 2 }
  0xa0   : > { %v576_v42 = vmul.f32 %v8557_v35, %v381_v39  ;;  %v574_v48 = vmul.f32 %v8557_v35, %v371_v40  ;;  %v737_v49 = vmul.f32 %v8567_v37, %v371_v40  ;;  %v974_v53 = vmul.f32 %v8581_v45, %v381_v39 }
  0xa1   : > { %v512_v54 = vmul.f32 %v8562_v36, %v381_v39  ;;  %v739_v55 = vmul.f32 %v8567_v37, %v381_v39  ;;  %v510_v56 = vmul.f32 %v8562_v36, %v371_v40  ;;  %v1136_v4 = vmul.f32 %v8597_v62, %v381_v39 }
  0xa2   : > { %v634_v47 = vrot.slane %v576_v42, 1  ;;  %v631_v57 = vrot.slane %v574_v48, 1  ;;  %v794_v61 = vrot.slane %v737_v49, 2  ;;  %v910_v5 = vmul.f32 %v8573_v41, %v381_v39 }
  0xa3   : > { %v391_v3 = vpop.permute.xlu1 %390  ;;  %v1030_v6 = vrot.slane %v974_v53, 1  ;;  %v797_v9 = vrot.slane %v739_v55, 2  ;;  %v1192_v20 = vrot.slane %v1136_v4, 2  ;;  %v386_v23 = vpop.permute.xlu0 %385  ;;  %v1191_v29 = vrot.slane %v1135_v13, 2 }
  0xa4   : > { %v703_v0 = vadd.f32 %v634_v47, %v512_v54  ;;  %v632_v1 = vsel %vm629_vm0, %v630_v52, %v631_v57  ;;  %v701_v2 = vadd.f32 %v631_v57, %v510_v56  ;;  %v635_v8 = vsel %vm629_vm0, %v633_v58, %v634_v47 }
  0xa5   : > { %v700_v7 = vadd.f32 %v632_v1, %v509_v60  ;;  %v795_v10 = vsel %vm792_vm1, %v793_v63, %v794_v61  ;;  %v578_v15 = vmul.f32 %v8557_v35, %v391_v3  ;;  %v702_v19 = vadd.f32 %v635_v8, %v511_v43 }
  0xa6   : > { %v864_v11 = vadd.f32 %v794_v61, %v701_v2  ;;  %v866_v17 = vadd.f32 %v797_v9, %v703_v0  ;;  %v1031_v21 = vsel %vm629_vm0, %v1029_v12, %v1030_v6  ;;  %v8613_v26 = vmul.f32 %v8567_v37, %v391_v3 }
  0xa7   : > { %v863_v14 = vadd.f32 %v795_v10, %v700_v7  ;;  %v912_v27 = vmul.f32 %v8573_v41, %v391_v3  ;;  %v976_v28 = vmul.f32 %v8581_v45, %v391_v3  ;;  %v637_v32 = vrot.slane %v578_v15, 1  ;;  %v401_v1 = vpop.permute.xlu1 %400 }
  0xa8   : > { %v938_v18 = vadd.f32 %v910_v5, %v864_v11  ;;  %v8623_v33 = vmul.f32 %v8597_v62, %v391_v3  ;;  %v798_v34 = vsel %vm792_vm1, %v796_v16, %v797_v9  ;;  %v577_v40 = vmul.f32 %v8557_v35, %v386_v23 }
  0xa9   : > { %v937_v22 = vadd.f32 %v909_v51, %v863_v14  ;;  %v940_v39 = vadd.f32 %v912_v27, %v866_v17  ;;  %v865_v42 = vadd.f32 %v798_v34, %v702_v19  ;;  %v1193_v43 = vsel %vm792_vm1, %v1191_v29, %v1192_v20  ;;  %v396_v27 = vpop.permute.xlu0 %395 }
  0xaa   : > { %v1100_v24 = vadd.f32 %v1030_v6, %v938_v18  ;;  %v514_v46 = vmul.f32 %v8562_v36, %v391_v3  ;;  %v1308_v47 = vmul.f32 %v8610_v25, %v391_v3  ;;  %v800_v48 = vrot.slane %v8613_v26, 2 }
  0xab   : > { %v1099_v30 = vadd.f32 %v1031_v21, %v937_v22  ;;  %v1033_v49 = vrot.slane %v976_v28, 1  ;;  %v1372_v50 = vmul.f32 %v8620_v31, %v391_v3  ;;  %v975_v51 = vmul.f32 %v8581_v45, %v386_v23 }
  0xac   : > { %v1262_v38 = vadd.f32 %v1192_v20, %v1100_v24  ;;  %v705_v53 = vadd.f32 %v637_v32, %v514_v46  ;;  %v1195_v54 = vrot.slane %v8623_v33, 2  ;;  %v1371_v55 = vmul.f32 %v8620_v31, %v386_v23 }
  0xad   : > { %v1261_v52 = vadd.f32 %v1193_v43, %v1099_v30  ;;  %v1102_v56 = vadd.f32 %v1033_v49, %v940_v39  ;;  %v1534_v58 = vmul.f32 %v8631_v44, %v391_v3  ;;  %v636_v59 = vrot.slane %v577_v40, 1 }
  0xae   : > { %v1336_v57 = vadd.f32 %v1308_v47, %v1262_v38  ;;  %v911_v60 = vmul.f32 %v8573_v41, %v386_v23  ;;  %v1137_v61 = vmul.f32 %v8597_v62, %v386_v23  ;;  %v1307_v63 = vmul.f32 %v8610_v25, %v386_v23 }
  0xaf   : > { %v1533_v0 = vmul.f32 %v8631_v44, %v386_v23  ;;  %v1428_v2 = vrot.slane %v1372_v50, 1  ;;  %v513_v4 = vmul.f32 %v8562_v36, %v386_v23  ;;  %v1032_v5 = vrot.slane %v975_v51, 1 }
  0xb0   : > { %v1427_v6 = vrot.slane %v1371_v55, 1  ;;  %v868_v7 = vadd.f32 %v800_v48, %v705_v53  ;;  %v740_v8 = vmul.f32 %v8567_v37, %v386_v23  ;;  %v939_v9 = vadd.f32 %v911_v60, %v865_v42 }
  0xb1   : > { %v1335_v3 = vadd.f32 %v1307_v63, %v1261_v52  ;;  %v1264_v10 = vadd.f32 %v1195_v54, %v1102_v56  ;;  %v1498_v11 = vadd.f32 %v1428_v2, %v1336_v57  ;;  %v638_v12 = vsel %vm629_vm0, %v636_v59, %v637_v32  ;;  %v8672_v57 = vld [vmem:[%s10355_s2] ss:$0 sm:$0xff] }
  0xb2   : > { %v580_v13 = vmul.f32 %v8557_v35, %v401_v1  ;;  %v1590_v14 = vrot.slane %v1534_v58, 2  ;;  %v1194_v15 = vrot.slane %v1137_v61, 2  ;;  %v1589_v16 = vrot.slane %v1533_v0, 2 }
  0xb3   : > { %v8650_v17 = vmul.f32 %v8567_v37, %v401_v1  ;;  %v1034_v18 = vsel %vm629_vm0, %v1032_v5, %v1033_v49  ;;  %v1429_v19 = vsel %vm629_vm0, %v1427_v6, %v1428_v2  ;;  %v914_v20 = vmul.f32 %v8573_v41, %v401_v1 }
  0xb4   : > { %v978_v21 = vmul.f32 %v8581_v45, %v401_v1  ;;  %v704_v22 = vadd.f32 %v638_v12, %v513_v4  ;;  %v799_v23 = vrot.slane %v740_v8, 2  ;;  %v1101_v24 = vadd.f32 %v1034_v18, %v939_v9 }
  0xb5   : > { %v1497_v26 = vadd.f32 %v1429_v19, %v1335_v3  ;;  %v8656_v28 = vadd.f32 %v1590_v14, %v1498_v11  ;;  %v516_v29 = vmul.f32 %v8562_v36, %v401_v1  ;;  %v640_v30 = vrot.slane %v580_v13, 1 }
  0xb6   : > { %v942_v32 = vadd.f32 %v914_v20, %v868_v7  ;;  %v1591_v33 = vsel %vm792_vm1, %v1589_v16, %v1590_v14  ;;  %v803_v34 = vrot.slane %v8650_v17, 2  ;;  %v1140_v38 = vmul.f32 %v8597_v62, %v401_v1 }
  0xb7   : > { %v1374_v39 = vmul.f32 %v8620_v31, %v401_v1  ;;  %v1036_v40 = vrot.slane %v978_v21, 1  ;;  %v1310_v42 = vmul.f32 %v8610_v25, %v401_v1  ;;  %v1196_v43 = vsel %vm792_vm1, %v1194_v15, %v1195_v54 }
  0xb8   : > { %v579_v46 = vmul.f32 %v8557_v35, %v396_v27  ;;  %v1659_v47 = vadd.f32 %v1591_v33, %v1497_v26  ;;  %v801_v49 = vsel %vm792_vm1, %v799_v23, %v800_v48  ;;  %v1263_v50 = vadd.f32 %v1196_v43, %v1101_v24  ;;  %v411_v48 = vpop.permute.xlu1 %410 }
  0xb9   : > { %v977_v51 = vmul.f32 %v8581_v45, %v396_v27  ;;  %v707_v52 = vadd.f32 %v640_v30, %v516_v29  ;;  %v1104_v53 = vadd.f32 %v1036_v40, %v942_v32  ;;  %v867_v55 = vadd.f32 %v801_v49, %v704_v22 }
  0xba   : > { %v1373_v56 = vmul.f32 %v8620_v31, %v396_v27  ;;  %v1338_v58 = vadd.f32 %v1310_v42, %v1264_v10  ;;  %v1431_v54 = vrot.slane %v1374_v39, 1  ;;  %v1536_v59 = vmul.f32 %v8631_v44, %v401_v1  ;;  %v406_v39 = vpop.permute.xlu0 %405 }
  0xbb   : > { %v1309_v60 = vmul.f32 %v8610_v25, %v396_v27  ;;  %v639_v61 = vrot.slane %v579_v46, 1  ;;  %v913_v63 = vmul.f32 %v8573_v41, %v396_v27  ;;  %v1535_v2 = vmul.f32 %v8631_v44, %v396_v27 }
  0xbc   : > { %v1430_v0 = vrot.slane %v1373_v56, 1  ;;  %v1198_v4 = vrot.slane %v1140_v38, 2  ;;  %v1035_v5 = vrot.slane %v977_v51, 1  ;;  %v1139_v6 = vmul.f32 %v8597_v62, %v396_v27 }
  0xbd   : > { %v1337_v7 = vadd.f32 %v1309_v60, %v1263_v50  ;;  %v8680_v8 = vadd.f32 %v8672_v57, %v1659_v47  ;;  %v742_v9 = vmul.f32 %v8567_v37, %v396_v27  ;;  %v941_v1 = vadd.f32 %v913_v63, %v867_v55 }
  0xbe   : > { %v582_v3 = vmul.f32 %v8557_v35, %v411_v48  ;;  %v870_v10 = vadd.f32 %v803_v34, %v707_v52  ;;  %v1266_v11 = vadd.f32 %v1198_v4, %v1104_v53  ;;  %v1500_v12 = vadd.f32 %v1431_v54, %v1338_v58 }
  0xbf   : > { %v1593_v13 = vrot.slane %v1536_v59, 2  ;;  %v641_v14 = vsel %vm629_vm0, %v639_v61, %v640_v30  ;;  %v1432_v15 = vsel %vm629_vm0, %v1430_v0, %v1431_v54  ;;  %v1592_v16 = vrot.slane %v1535_v2, 2  ;;  %v421_v2 = vpop.permute.xlu1 %420 }
  0xc0   : > { %v8689_v18 = vmul.f32 %v8567_v37, %v411_v48  ;;  %v515_v19 = vmul.f32 %v8562_v36, %v396_v27  ;;  %v1037_v20 = vsel %vm629_vm0, %v1035_v5, %v1036_v40  ;;  %v1197_v21 = vrot.slane %v1139_v6, 2 }
  0xc1   : > { %v1499_v22 = vadd.f32 %v1432_v15, %v1337_v7  ;;  %v802_v24 = vrot.slane %v742_v9, 2  ;;  %v1103_v26 = vadd.f32 %v1037_v20, %v941_v1  ;;  %v643_v29 = vrot.slane %v582_v3, 1 }
  0xc2   : > { %v8694_v32 = vadd.f32 %v1593_v13, %v1500_v12  ;;  %v706_v30 = vadd.f32 %v641_v14, %v515_v19  ;;  %v518_v33 = vmul.f32 %v8562_v36, %v411_v48  ;;  %v916_v38 = vmul.f32 %v8573_v41, %v411_v48 }
  0xc3   : > { %v1594_v42 = vsel %vm792_vm1, %v1592_v16, %v1593_v13  ;;  %v806_v27 = vrot.slane %v8689_v18, 2  ;;  %v980_v40 = vmul.f32 %v8581_v45, %v411_v48  ;;  %v1376_v43 = vmul.f32 %v8620_v31, %v411_v48  ;;  %v431_v18 = vpop.permute.xlu1 %430 }
  0xc4   : > { %v1661_v46 = vadd.f32 %v1594_v42, %v1499_v22  ;;  %v1142_v47 = vmul.f32 %v8597_v62, %v411_v48  ;;  %v1312_v49 = vmul.f32 %v8610_v25, %v411_v48  ;;  %v1199_v50 = vsel %vm792_vm1, %v1197_v21, %v1198_v4 }
  0xc5   : > { %v709_v51 = vadd.f32 %v643_v29, %v518_v33  ;;  %v804_v52 = vsel %vm792_vm1, %v802_v24, %v803_v34  ;;  %v1265_v53 = vadd.f32 %v1199_v50, %v1103_v26  ;;  %v581_v55 = vmul.f32 %v8557_v35, %v406_v39 }
  0xc6   : > { %v944_v56 = vadd.f32 %v916_v38, %v870_v10  ;;  %v869_v58 = vadd.f32 %v804_v52, %v706_v30  ;;  %v979_v54 = vmul.f32 %v8581_v45, %v406_v39  ;;  %v1375_v59 = vmul.f32 %v8620_v31, %v406_v39 }
  0xc7   : > { %v1039_v60 = vrot.slane %v980_v40, 1  ;;  %v1434_v61 = vrot.slane %v1376_v43, 1  ;;  %v8712_v63 = vmul.f32 %v8631_v44, %v411_v48  ;;  %v1311_v0 = vmul.f32 %v8610_v25, %v406_v39 }
  0xc8   : > { %v642_v17 = vrot.slane %v581_v55, 1  ;;  %v915_v34 = vmul.f32 %v8573_v41, %v406_v39  ;;  %v1433_v4 = vrot.slane %v1375_v59, 1  ;;  %v1537_v5 = vmul.f32 %v8631_v44, %v406_v39 }
  0xc9   : > { %v1201_v6 = vrot.slane %v1142_v47, 2  ;;  %v1038_v7 = vrot.slane %v979_v54, 1  ;;  %v1141_v9 = vmul.f32 %v8597_v62, %v406_v39  ;;  %v1339_v1 = vadd.f32 %v1311_v0, %v1265_v53 }
  0xca   : > { %v8719_v3 = vadd.f32 %v8672_v57, %v1661_v46  ;;  %v744_v48 = vmul.f32 %v8567_v37, %v406_v39  ;;  %v943_v10 = vadd.f32 %v915_v34, %v869_v58  ;;  %v584_v12 = vmul.f32 %v8557_v35, %v421_v2 }
  0xcb   : > { %v872_v13 = vadd.f32 %v806_v27, %v709_v51  ;;  %v1106_v14 = vadd.f32 %v1039_v60, %v944_v56  ;;  %v1340_v15 = vadd.f32 %v1312_v49, %v1266_v11  ;;  %v10366_v16 = vrot.slane %v8712_v63, 2  ;;  %v416_v49 = vpop.permute.xlu0 %415 }
  0xcc   : > { %v644_v19 = vsel %vm629_vm0, %v642_v17, %v643_v29  ;;  %v1435_v20 = vsel %vm629_vm0, %v1433_v4, %v1434_v61  ;;  %v1595_v21 = vrot.slane %v1537_v5, 2  ;;  %v8729_v22 = vmul.f32 %v8567_v37, %v421_v2 }
  0xcd   : > { %v517_v24 = vmul.f32 %v8562_v36, %v406_v39  ;;  %v1040_v26 = vsel %vm629_vm0, %v1038_v7, %v1039_v60  ;;  %v1200_v30 = vrot.slane %v1141_v9, 2  ;;  %v1501_v33 = vadd.f32 %v1435_v20, %v1339_v1 }
  0xce   : > { %v805_v42 = vrot.slane %v744_v48, 2  ;;  %v1105_v11 = vadd.f32 %v1040_v26, %v943_v10  ;;  %v646_v40 = vrot.slane %v584_v12, 1  ;;  %v1268_v43 = vadd.f32 %v1201_v6, %v1106_v14 }
  0xcf   : > { %v8734_v46 = vadd.f32 %v1434_v61, %v1340_v15  ;;  %v708_v29 = vadd.f32 %v644_v19, %v517_v24  ;;  %v520_v47 = vmul.f32 %v8562_v36, %v421_v2  ;;  %v1597_v39 = vsel %vm792_vm1, %v1595_v21, %v10366_v16 }
  0xd0   : > { %v809_v50 = vrot.slane %v8729_v22, 2  ;;  %v918_v51 = vmul.f32 %v8573_v41, %v421_v2  ;;  %v1378_v52 = vmul.f32 %v8620_v31, %v421_v2  ;;  %v1663_v53 = vadd.f32 %v1597_v39, %v1501_v33 }
  0xd1   : > { %v982_v55 = vmul.f32 %v8581_v45, %v421_v2  ;;  %v1144_v56 = vmul.f32 %v8597_v62, %v421_v2  ;;  %v1202_v58 = vsel %vm792_vm1, %v1200_v30, %v1201_v6  ;;  %v711_v54 = vadd.f32 %v646_v40, %v520_v47 }
  0xd2   : > { %v807_v59 = vsel %vm792_vm1, %v805_v42, %v806_v27  ;;  %v1267_v60 = vadd.f32 %v1202_v58, %v1105_v11  ;;  %v583_v61 = vmul.f32 %v8557_v35, %v416_v49  ;;  %v1314_v0 = vmul.f32 %v8610_v25, %v421_v2 }
  0xd3   : > { %v871_v17 = vadd.f32 %v807_v59, %v708_v29  ;;  %v981_v34 = vmul.f32 %v8581_v45, %v416_v49  ;;  %v1377_v4 = vmul.f32 %v8620_v31, %v416_v49  ;;  %v946_v5 = vadd.f32 %v918_v51, %v872_v13 }
  0xd4   : > { %v1437_v7 = vrot.slane %v1378_v52, 1  ;;  %v8754_v9 = vmul.f32 %v8631_v44, %v421_v2  ;;  %v1313_v6 = vmul.f32 %v8610_v25, %v416_v49  ;;  %v645_v1 = vrot.slane %v583_v61, 1 }
  0xd5   : > { %v917_v27 = vmul.f32 %v8573_v41, %v416_v49  ;;  %v1436_v48 = vrot.slane %v1377_v4, 1  ;;  %v1539_v10 = vmul.f32 %v8631_v44, %v416_v49  ;;  %v1042_v12 = vrot.slane %v982_v55, 1 }
  0xd6   : > { %v1041_v14 = vrot.slane %v981_v34, 1  ;;  %v1143_v15 = vmul.f32 %v8597_v62, %v416_v49  ;;  %v1341_v19 = vadd.f32 %v1313_v6, %v1267_v60  ;;  %v1204_v20 = vrot.slane %v1144_v56, 2 }
  0xd7   : > { %v1342_v13 = vadd.f32 %v1314_v0, %v1268_v43  ;;  %v945_v21 = vadd.f32 %v917_v27, %v871_v17  ;;  %v586_v2 = vmul.f32 %v8557_v35, %v431_v18  ;;  %v8762_v24 = vadd.f32 %v8672_v57, %v1663_v53  ;;  %v426_v0 = vpop.permute.xlu0 %425 }
  0xd8   : > { %v1108_v26 = vadd.f32 %v1042_v12, %v946_v5  ;;  %v10365_v30 = vrot.slane %v8754_v9, 2  ;;  %v746_v33 = vmul.f32 %v8567_v37, %v416_v49  ;;  %v647_v42 = vsel %vm629_vm0, %v645_v1, %v646_v40 }
  0xd9   : > { %v1438_v11 = vsel %vm629_vm0, %v1436_v48, %v1437_v7  ;;  %v1598_v29 = vrot.slane %v1539_v10, 2  ;;  %v8769_v47 = vmul.f32 %v8567_v37, %v431_v18  ;;  %v519_v43 = vmul.f32 %v8562_v36, %v416_v49 }
  0xda   : > { %v1043_v39 = vsel %vm629_vm0, %v1041_v14, %v1042_v12  ;;  %v1203_v51 = vrot.slane %v1143_v15, 2  ;;  %v1503_v52 = vadd.f32 %v1438_v11, %v1341_v19  ;;  %v874_v53 = vadd.f32 %v809_v50, %v711_v54 }
  0xdb   : > { %v8775_v55 = vadd.f32 %v1437_v7, %v1342_v13  ;;  %v1107_v56 = vadd.f32 %v1043_v39, %v945_v21  ;;  %v649_v58 = vrot.slane %v586_v2, 1  ;;  %v1270_v40 = vadd.f32 %v1204_v20, %v1108_v26  ;;  %v441_v13 = vpop.permute.xlu1 %440 }
  0xdc   : > { %v710_v59 = vadd.f32 %v647_v42, %v519_v43  ;;  %v808_v60 = vrot.slane %v746_v33, 2  ;;  %v522_v61 = vmul.f32 %v8562_v36, %v431_v18  ;;  %v1600_v49 = vsel %vm792_vm1, %v1598_v29, %v10365_v30 }
  0xdd   : > { %v812_v17 = vrot.slane %v8769_v47, 2  ;;  %v920_v34 = vmul.f32 %v8573_v41, %v431_v18  ;;  %v984_v54 = vmul.f32 %v8581_v45, %v431_v18  ;;  %v1665_v4 = vadd.f32 %v1600_v49, %v1503_v52 }
  0xde   : > { %v8785_v5 = vmul.f32 %v8597_v62, %v431_v18  ;;  %v1380_v7 = vmul.f32 %v8620_v31, %v431_v18  ;;  %v1205_v6 = vsel %vm792_vm1, %v1203_v51, %v1204_v20  ;;  %v713_v1 = vadd.f32 %v649_v58, %v522_v61 }
  0xdf   : > { %v1316_v27 = vmul.f32 %v8610_v25, %v431_v18  ;;  %v1269_v48 = vadd.f32 %v1205_v6, %v1107_v56  ;;  %v585_v10 = vmul.f32 %v8557_v35, %v426_v0  ;;  %v948_v12 = vadd.f32 %v920_v34, %v874_v53 }
  0xe0   : > { %v810_v14 = vsel %vm792_vm1, %v808_v60, %v809_v50  ;;  %v983_v15 = vmul.f32 %v8581_v45, %v426_v0  ;;  %v1379_v19 = vmul.f32 %v8620_v31, %v426_v0  ;;  %v8797_v21 = vmul.f32 %v8631_v44, %v431_v18 }
  0xe1   : > { %v873_v20 = vadd.f32 %v810_v14, %v710_v59  ;;  %v648_v2 = vrot.slane %v585_v10, 1  ;;  %v1315_v26 = vmul.f32 %v8610_v25, %v426_v0  ;;  %v1045_v33 = vrot.slane %v984_v54, 1 }
  0xe2   : > { %v1440_v42 = vrot.slane %v1380_v7, 1  ;;  %v1439_v11 = vrot.slane %v1379_v19, 1  ;;  %v1541_v29 = vmul.f32 %v8631_v44, %v426_v0  ;;  %v748_v22 = vmul.f32 %v8567_v37, %v426_v0  ;;  %v436_v19 = vpop.permute.xlu0 %435 }
  0xe3   : > { %v919_v50 = vmul.f32 %v8573_v41, %v426_v0  ;;  %v1343_v47 = vadd.f32 %v1315_v26, %v1269_v48  ;;  %v8804_v43 = vmul.f32 %v8557_v35, %v441_v13  ;;  %v1110_v39 = vadd.f32 %v1045_v33, %v948_v12 }
  0xe4   : > { %v1207_v18 = vrot.slane %v8785_v5, 2  ;;  %v1344_v51 = vadd.f32 %v1316_v27, %v1270_v40  ;;  %v1044_v52 = vrot.slane %v983_v15, 1  ;;  %v10364_v53 = vrot.slane %v8797_v21, 2 }
  0xe5   : > { %v650_v56 = vsel %vm629_vm0, %v648_v2, %v649_v58  ;;  %v947_v59 = vadd.f32 %v919_v50, %v873_v20  ;;  %v1145_v60 = vmul.f32 %v8597_v62, %v426_v0  ;;  %v521_v61 = vmul.f32 %v8562_v36, %v426_v0 }
  0xe6   : > { %v1441_v49 = vsel %vm629_vm0, %v1439_v11, %v1440_v42  ;;  %v1601_v34 = vrot.slane %v1541_v29, 2  ;;  %v8813_v54 = vmul.f32 %v8567_v37, %v441_v13  ;;  %v8816_v7 = vadd.f32 %v8672_v57, %v1665_v4 }
  0xe7   : > { %v811_v40 = vrot.slane %v748_v22, 2  ;;  %v1505_v5 = vadd.f32 %v1441_v49, %v1343_v47  ;;  %v652_v6 = vrot.slane %v8804_v43, 1  ;;  %v876_v27 = vadd.f32 %v812_v17, %v713_v1 }
  0xe8   : > { %v8819_v58 = vadd.f32 %v1440_v42, %v1344_v51  ;;  %v712_v48 = vadd.f32 %v650_v56, %v521_v61  ;;  %v1046_v10 = vsel %vm629_vm0, %v1044_v52, %v1045_v33  ;;  %v1272_v0 = vadd.f32 %v1207_v18, %v1110_v39 }
  0xe9   : > { %v1109_v12 = vadd.f32 %v1046_v10, %v947_v59  ;;  %v1206_v14 = vrot.slane %v1145_v60, 2  ;;  %v524_v15 = vmul.f32 %v8562_v36, %v441_v13  ;;  %v1603_v4 = vsel %vm792_vm1, %v1601_v34, %v10364_v53 }
  0xea   : > { %v815_v20 = vrot.slane %v8813_v54, 2  ;;  %v922_v2 = vmul.f32 %v8573_v41, %v441_v13  ;;  %v986_v1 = vmul.f32 %v8581_v45, %v441_v13  ;;  %v1667_v26 = vadd.f32 %v1603_v4, %v1505_v5  ;;  %v451_v4 = vpop.permute.xlu1 %450 }
  0xeb   : > { %v715_v42 = vadd.f32 %v652_v6, %v524_v15  ;;  %v1148_v33 = vmul.f32 %v8597_v62, %v441_v13  ;;  %v813_v11 = vsel %vm792_vm1, %v811_v40, %v812_v17  ;;  %v1318_v29 = vmul.f32 %v8610_v25, %v441_v13 }
  0xec   : > { %v1382_v22 = vmul.f32 %v8620_v31, %v441_v13  ;;  %v875_v50 = vadd.f32 %v813_v11, %v712_v48  ;;  %v587_v47 = vmul.f32 %v8557_v35, %v436_v19  ;;  %v950_v43 = vadd.f32 %v922_v2, %v876_v27 }
  0xed   : > { %v1208_v39 = vsel %vm792_vm1, %v1206_v14, %v1207_v18  ;;  %v985_v51 = vmul.f32 %v8581_v45, %v436_v19  ;;  %v1381_v52 = vmul.f32 %v8620_v31, %v436_v19  ;;  %v1048_v56 = vrot.slane %v986_v1, 1 }
  0xee   : > { %v8838_v59 = vmul.f32 %v8631_v44, %v441_v13  ;;  %v1271_v60 = vadd.f32 %v1208_v39, %v1109_v12  ;;  %v921_v17 = vmul.f32 %v8573_v41, %v436_v19  ;;  %v1210_v61 = vrot.slane %v1148_v33, 2 }
  0xef   : > { %v1346_v49 = vadd.f32 %v1318_v29, %v1272_v0  ;;  %v1047_v34 = vrot.slane %v985_v51, 1  ;;  %v1147_v40 = vmul.f32 %v8597_v62, %v436_v19  ;;  %v651_v5 = vrot.slane %v587_v47, 1 }
  0xf0   : > { %v949_v27 = vadd.f32 %v921_v17, %v875_v50  ;;  %v1317_v18 = vmul.f32 %v8610_v25, %v436_v19  ;;  %v1543_v48 = vmul.f32 %v8631_v44, %v436_v19  ;;  %v1112_v10 = vadd.f32 %v1048_v56, %v950_v43 }
  0xf1   : > { %v1443_v14 = vrot.slane %v1382_v22, 1  ;;  %v750_v15 = vmul.f32 %v8567_v37, %v436_v19  ;;  %v1442_v13 = vrot.slane %v1381_v52, 1  ;;  %v8846_v12 = vadd.f32 %v8672_v57, %v1667_v26 }
  0xf2   : > { %v878_v0 = vadd.f32 %v815_v20, %v715_v42  ;;  %v10363_v2 = vrot.slane %v8838_v59, 2  ;;  %v1345_v1 = vadd.f32 %v1317_v18, %v1271_v60  ;;  %v523_v11 = vmul.f32 %v8562_v36, %v436_v19 }
  0xf3   : > { %v8851_v33 = vadd.f32 %v1443_v14, %v1346_v49  ;;  %v1049_v29 = vsel %vm629_vm0, %v1047_v34, %v1048_v56  ;;  %v1209_v22 = vrot.slane %v1147_v40, 2  ;;  %v653_v50 = vsel %vm629_vm0, %v651_v5, %v652_v6  ;;  %v446_v5 = vpop.permute.xlu0 %445 }
  0xf4   : > { %v1111_v47 = vadd.f32 %v1049_v29, %v949_v27  ;;  %v1604_v43 = vrot.slane %v1543_v48, 2  ;;  %v590_v26 = vmul.f32 %v8557_v35, %v451_v4  ;;  %v1274_v39 = vadd.f32 %v1210_v61, %v1112_v10 }
  0xf5   : > { %v814_v51 = vrot.slane %v750_v15, 2  ;;  %v1444_v42 = vsel %vm629_vm0, %v1442_v13, %v1443_v14  ;;  %v8859_v52 = vmul.f32 %v8567_v37, %v451_v4  ;;  %v526_v17 = vmul.f32 %v8562_v36, %v451_v4 }
  0xf6   : > { %v1507_v60 = vadd.f32 %v1444_v42, %v1345_v1  ;;  %v924_v19 = vmul.f32 %v8573_v41, %v451_v4  ;;  %v988_v56 = vmul.f32 %v8581_v45, %v451_v4  ;;  %v714_v49 = vadd.f32 %v653_v50, %v523_v11 }
  0xf7   : > { %v1320_v6 = vmul.f32 %v8610_v25, %v451_v4  ;;  %v1384_v34 = vmul.f32 %v8620_v31, %v451_v4  ;;  %v1211_v40 = vsel %vm792_vm1, %v1209_v22, %v1210_v61  ;;  %v1606_v27 = vsel %vm792_vm1, %v1604_v43, %v10363_v2 }
  0xf8   : > { %v655_v18 = vrot.slane %v590_v26, 1  ;;  %v952_v48 = vadd.f32 %v924_v19, %v878_v0  ;;  %v1273_v10 = vadd.f32 %v1211_v40, %v1111_v47  ;;  %v818_v14 = vrot.slane %v8859_v52, 2 }
  0xf9   : > { %v1150_v15 = vmul.f32 %v8597_v62, %v451_v4  ;;  %v1348_v13 = vadd.f32 %v1320_v6, %v1274_v39  ;;  %v1546_v1 = vmul.f32 %v8631_v44, %v451_v4  ;;  %v1669_v11 = vadd.f32 %v1606_v27, %v1507_v60  ;;  %v461_v4 = vpop.permute.xlu1 %460 }
  0xfa   : > { %v1051_v29 = vrot.slane %v988_v56, 1  ;;  %v589_v50 = vmul.f32 %v8557_v35, %v446_v5  ;;  %v1319_v61 = vmul.f32 %v8610_v25, %v446_v5  ;;  %v1446_v22 = vrot.slane %v1384_v34, 1 }
  0xfb   : > { %v816_v43 = vsel %vm792_vm1, %v814_v51, %v815_v20  ;;  %v987_v0 = vmul.f32 %v8581_v45, %v446_v5  ;;  %v1383_v47 = vmul.f32 %v8620_v31, %v446_v5  ;;  %v717_v26 = vadd.f32 %v655_v18, %v526_v17 }
  0xfc   : > { %v1114_v42 = vadd.f32 %v1051_v29, %v952_v48  ;;  %v877_v39 = vadd.f32 %v816_v43, %v714_v49  ;;  %v1347_v19 = vadd.f32 %v1319_v61, %v1273_v10  ;;  %v1510_v60 = vadd.f32 %v1446_v22, %v1348_v13 }
  0xfd   : > { %v1608_v56 = vrot.slane %v1546_v1, 2  ;;  %v1445_v6 = vrot.slane %v1383_v47, 1  ;;  %v1545_v40 = vmul.f32 %v8631_v44, %v446_v5  ;;  %v1213_v27 = vrot.slane %v1150_v15, 2 }
  0xfe   : > { %v654_v34 = vrot.slane %v589_v50, 1  ;;  %v923_v54 = vmul.f32 %v8573_v41, %v446_v5  ;;  %v1149_v20 = vmul.f32 %v8597_v62, %v446_v5  ;;  %v1050_v51 = vrot.slane %v987_v0, 1 }
  0xff   : > { %v1447_v2 = vsel %vm629_vm0, %v1445_v6, %v1446_v22  ;;  %v1607_v53 = vrot.slane %v1545_v40, 2  ;;  %v8885_v17 = vmul.f32 %v8557_v35, %v461_v4  ;;  %v8888_v49 = vadd.f32 %v8672_v57, %v1669_v11 }
 0x100   : > { %v880_v48 = vadd.f32 %v818_v14, %v717_v26  ;;  %v951_v10 = vadd.f32 %v923_v54, %v877_v39  ;;  %v1509_v15 = vadd.f32 %v1447_v2, %v1347_v19  ;;  %v1276_v13 = vadd.f32 %v1213_v27, %v1114_v42 }
 0x101   : > { %10388 = vst [vmem:[#allocation5_spill] sm:$0xff] %v8888_v49  ;;  %v1672_v1 = vadd.f32 %v1608_v56, %v1510_v60  ;;  %v752_v50 = vmul.f32 %v8567_v37, %v446_v5  ;;  %v1609_v61 = vsel %vm792_vm1, %v1607_v53, %v1608_v56  ;;  %v1212_v43 = vrot.slane %v1149_v20, 2  ;;  %v456_v20 = vpop.permute.xlu0 %455 }
 0x102   : > { %v1671_v22 = vadd.f32 %v1609_v61, %v1509_v15  ;;  %v926_v0 = vmul.f32 %v8573_v41, %v461_v4  ;;  %v8896_v47 = vmul.f32 %v8581_v45, %v461_v4  ;;  %v656_v11 = vsel %vm629_vm0, %v654_v34, %v655_v18 }
 0x103   : > { %v1052_v6 = vsel %vm629_vm0, %v1050_v51, %v1051_v29  ;;  %v658_v26 = vrot.slane %v8885_v17, 1  ;;  %v8902_v2 = vmul.f32 %v8567_v37, %v461_v4  ;;  %v525_v42 = vmul.f32 %v8562_v36, %v446_v5 }
 0x104   : > { %v1113_v39 = vadd.f32 %v1052_v6, %v951_v10  ;;  %v954_v53 = vadd.f32 %v926_v0, %v880_v48  ;;  %v8906_v19 = vmul.f32 %v8597_v62, %v461_v4  ;;  %v817_v60 = vrot.slane %v752_v50, 2  ;;  %v471_v6 = vpop.permute.xlu1 %470 }
 0x105   : > { %v528_v56 = vmul.f32 %v8562_v36, %v461_v4  ;;  %v1322_v40 = vmul.f32 %v8610_v25, %v461_v4  ;;  %v1386_v18 = vmul.f32 %v8620_v31, %v461_v4  ;;  %v8912_v29 = vadd.f32 %v8672_v57, %v1672_v1 }
 0x106   : > { %v716_v34 = vadd.f32 %v656_v11, %v525_v42  ;;  %v1706_v54 = vadd.f32 %v8672_v57, %v1671_v22  ;;  %v1054_v5 = vrot.slane %v8896_v47, 1  ;;  %v821_v17 = vrot.slane %v8902_v2, 2 }
 0x107   : > { %10389 = vst [vmem:[#allocation6_spill] sm:$0xff] %v8912_v29  ;;  %v719_v51 = vadd.f32 %v658_v26, %v528_v56  ;;  %v1350_v48 = vadd.f32 %v1322_v40, %v1276_v13  ;;  %v1214_v10 = vsel %vm792_vm1, %v1212_v43, %v1213_v27  ;;  %v1216_v50 = vrot.slane %v8906_v19, 2 }
 0x108   : > { %v1116_v15 = vadd.f32 %v1054_v5, %v954_v53  ;;  %v1548_v61 = vmul.f32 %v8631_v44, %v461_v4  ;;  %v1275_v0 = vadd.f32 %v1214_v10, %v1113_v39  ;;  %v1449_v1 = vrot.slane %v1386_v18, 1 }
 0x109   : > { %v819_v22 = vsel %vm792_vm1, %v817_v60, %v818_v14  ;;  %v591_v47 = vmul.f32 %v8557_v35, %v456_v20  ;;  %v989_v11 = vmul.f32 %v8581_v45, %v456_v20  ;;  %v1734_v42 = vmax.f32 %v1706_v54, 0.0 }
 0x10a   : > { %v879_v13 = vadd.f32 %v819_v22, %v716_v34  ;;  %v1321_v27 = vmul.f32 %v8610_v25, %v456_v20  ;;  %v1385_v43 = vmul.f32 %v8620_v31, %v456_v20  ;;  %v1512_v53 = vadd.f32 %v1449_v1, %v1350_v48  ;;  %v8938_v48 = vld [vmem:[%s10355_s2 + $0x1] ss:$0 sm:$0xff] }
 0x10b   : > { %v754_v4 = vmul.f32 %v8567_v37, %v456_v20  ;;  %v925_v39 = vmul.f32 %v8573_v41, %v456_v20  ;;  %v1547_v52 = vmul.f32 %v8631_v44, %v456_v20  ;;  %v1151_v14 = vmul.f32 %v8597_v62, %v456_v20 }
 0x10c   : > { %v1349_v19 = vadd.f32 %v1321_v27, %v1275_v0  ;;  %v1448_v60 = vrot.slane %v1385_v43, 1  ;;  %v8932_v56 = vmul.f32 %v8557_v35, %v471_v6  ;;  %v1611_v18 = vrot.slane %v1548_v61, 2 }
 0x10d   : > { %v657_v34 = vrot.slane %v591_v47, 1  ;;  %v1053_v54 = vrot.slane %v989_v11, 1  ;;  %v882_v10 = vadd.f32 %v821_v17, %v719_v51  ;;  %v1278_v22 = vadd.f32 %v1216_v50, %v1116_v15 }
 0x10e   : > { %v527_v0 = vmul.f32 %v8562_v36, %v456_v20  ;;  %v953_v27 = vadd.f32 %v925_v39, %v879_v13  ;;  %v8944_v35 = vmul.f32 %v8938_v48, %v1734_v42  ;;  %v1674_v43 = vadd.f32 %v1611_v18, %v1512_v53 }
 0x10f   : > { %v1450_v61 = vsel %vm629_vm0, %v1448_v60, %v1449_v1  ;;  %v1610_v47 = vrot.slane %v1547_v52, 2  ;;  %v820_v11 = vrot.slane %v754_v4, 2  ;;  %v1215_v40 = vrot.slane %v1151_v14, 2  ;;  %v466_v4 = vpop.permute.xlu0 %465 }
 0x110   : > { %10390 = vst [vmem:[#allocation7_spill] sm:$0xff] %v8944_v35  ;;  %v1511_v30 = vadd.f32 %v1450_v61, %v1349_v19  ;;  %v661_v16 = vrot.slane %v8932_v56, 1  ;;  %v659_v38 = vsel %vm629_vm0, %v657_v34, %v658_v26  ;;  %v1055_v51 = vsel %vm629_vm0, %v1053_v54, %v1054_v5  ;;  %v8969_v34 = vld [vmem:[%s10354_s1 + $0x1] ss:$0 sm:$0xff] }
 0x111   : > { %v928_v15 = vmul.f32 %v8573_v41, %v471_v6  ;;  %v992_v20 = vmul.f32 %v8581_v45, %v471_v6  ;;  %v1115_v13 = vadd.f32 %v1055_v51, %v953_v27  ;;  %v530_v42 = vmul.f32 %v8562_v36, %v471_v6  ;;  %v481_v51 = vpop.permute.xlu1 %480 }
 0x112   : > { %v8954_v53 = vmul.f32 %v8567_v37, %v471_v6  ;;  %v8957_v1 = vmul.f32 %v8597_v62, %v471_v6  ;;  %v1612_v39 = vsel %vm792_vm1, %v1610_v47, %v1611_v18  ;;  %v1324_v26 = vmul.f32 %v8610_v25, %v471_v6 }
 0x113   : > { %v956_v52 = vadd.f32 %v928_v15, %v882_v10  ;;  %v1388_v5 = vmul.f32 %v8620_v31, %v471_v6  ;;  %v8963_v41 = vadd.f32 %v8672_v57, %v1674_v43  ;;  %v718_v14 = vadd.f32 %v659_v38, %v527_v0 }
 0x114   : > { %v1673_v19 = vadd.f32 %v1612_v39, %v1511_v30  ;;  %v721_v36 = vadd.f32 %v661_v16, %v530_v42  ;;  %v1057_v60 = vrot.slane %v992_v20, 1  ;;  %v1352_v37 = vadd.f32 %v1324_v26, %v1278_v22 }
 0x115   : > { %10391 = vst [vmem:[#allocation8_spill] sm:$0xff] %v8963_v41  ;;  %v1217_v56 = vsel %vm792_vm1, %v1215_v40, %v1216_v50  ;;  %v593_v18 = vmul.f32 %v8969_v34, %v466_v4  ;;  %v824_v54 = vrot.slane %v8954_v53, 2  ;;  %v1219_v10 = vrot.slane %v8957_v1, 2  ;;  %v9078_v53 = vld [vmem:[%s10354_s1 + $0x7] ss:$0 sm:$0xff] }
 0x116   : > { %v1277_v27 = vadd.f32 %v1217_v56, %v1115_v13  ;;  %v991_v38 = vmul.f32 %v8581_v45, %v466_v4  ;;  %v1118_v30 = vadd.f32 %v1057_v60, %v956_v52  ;;  %v1452_v0 = vrot.slane %v1388_v5, 1  ;;  %v8986_v45 = vld [vmem:[%s10354_s1 + $0x3] ss:$0 sm:$0xff] }
 0x117   : > { %v1550_v22 = vmul.f32 %v8631_v44, %v471_v6  ;;  %v822_v50 = vsel %vm792_vm1, %v820_v11, %v821_v17  ;;  %v1708_v40 = vadd.f32 %v8672_v57, %v1673_v19  ;;  %v884_v43 = vadd.f32 %v824_v54, %v721_v36  ;;  %v9000_v19 = vld [vmem:[%s10354_s1] ss:$0 sm:$0xff] }
 0x118   : > { %v881_v61 = vadd.f32 %v822_v50, %v718_v14  ;;  %v1323_v47 = vmul.f32 %v8610_v25, %v466_v4  ;;  %v1514_v15 = vadd.f32 %v1452_v0, %v1352_v37  ;;  %v660_v20 = vrot.slane %v593_v18, 1 }
 0x119   : > { %v927_v2 = vmul.f32 %v8986_v45, %v466_v4  ;;  %v1387_v17 = vmul.f32 %v8620_v31, %v466_v4  ;;  %v1056_v6 = vrot.slane %v991_v38, 1  ;;  %v1153_v11 = vmul.f32 %v8597_v62, %v466_v4 }
 0x11a   : > { %v1351_v13 = vadd.f32 %v1323_v47, %v1277_v27  ;;  %v1549_v42 = vmul.f32 %v8631_v44, %v466_v4  ;;  %v1280_v39 = vadd.f32 %v1219_v10, %v1118_v30  ;;  %v1614_v52 = vrot.slane %v1550_v22, 2  ;;  %v9007_v27 = vld [vmem:[%s10354_s1 + $0x2] ss:$0 sm:$0xff] }
 0x11b   : > { %v1451_v26 = vrot.slane %v1387_v17, 1  ;;  %v8995_v5 = vmul.f32 %v8969_v34, %v481_v51  ;;  %v1736_v14 = vmax.f32 %v1708_v40, 0.0  ;;  %v529_v36 = vmul.f32 %v9000_v19, %v466_v4 }
 0x11c   : > { %v955_v62 = vadd.f32 %v927_v2, %v881_v61  ;;  %v1613_v37 = vrot.slane %v1549_v42, 2  ;;  %v1676_v56 = vadd.f32 %v1614_v52, %v1514_v15  ;;  %v662_v18 = vsel %vm629_vm0, %v660_v20, %v661_v16 }
 0x11d   : > { %v756_v38 = vmul.f32 %v9007_v27, %v466_v4  ;;  %v1453_v30 = vsel %vm629_vm0, %v1451_v26, %v1452_v0  ;;  %v1058_v22 = vsel %vm629_vm0, %v1056_v6, %v1057_v60  ;;  %v1218_v50 = vrot.slane %v1153_v11, 2  ;;  %v9029_v6 = vld [vmem:[%s10354_s1 + $0x4] ss:$0 sm:$0xff] }
 0x11e   : > { %v1513_v40 = vadd.f32 %v1453_v30, %v1351_v13  ;;  %v532_v47 = vmul.f32 %v9000_v19, %v481_v51  ;;  %v1615_v61 = vsel %vm792_vm1, %v1613_v37, %v1614_v52  ;;  %v664_v15 = vrot.slane %v8995_v5, 1  ;;  %v9042_v52 = vld [vmem:[%s10354_s1 + $0x5] ss:$0 sm:$0xff] }
 0x11f   : > { %v1326_v16 = vmul.f32 %v8610_v25, %v481_v51  ;;  %v9017_v20 = vmul.f32 %v8620_v31, %v481_v51  ;;  %v1117_v2 = vadd.f32 %v1058_v22, %v955_v62  ;;  %v9020_v4 = vmul.f32 %v9007_v27, %v481_v51  ;;  %v476_v62 = vpop.permute.xlu0 %475 }
 0x120   : > { %v1675_v17 = vadd.f32 %v1615_v61, %v1513_v40  ;;  %v9023_v60 = vmul.f32 %v8631_v44, %v481_v51  ;;  %v930_v0 = vmul.f32 %v8986_v45, %v481_v51  ;;  %v9032_v25 = vmul.f32 %v9029_v6, %v481_v51 }
 0x121   : > { %v1354_v31 = vadd.f32 %v1326_v16, %v1280_v39  ;;  %v1455_v11 = vrot.slane %v9017_v20, 1  ;;  %v9037_v42 = vadd.f32 %v8672_v57, %v1676_v56  ;;  %v823_v44 = vrot.slane %v756_v38, 2 }
 0x122   : > { %v9045_v26 = vmul.f32 %v9042_v52, %v481_v51  ;;  %v720_v37 = vadd.f32 %v662_v18, %v529_v36  ;;  %v723_v39 = vadd.f32 %v664_v15, %v532_v47  ;;  %v958_v30 = vadd.f32 %v930_v0, %v884_v43 }
 0x123   : > { %v1516_v22 = vadd.f32 %v1455_v11, %v1354_v31  ;;  %v9050_v40 = vmul.f32 %v8938_v48, %v1736_v14  ;;  %v1710_v56 = vadd.f32 %v8672_v57, %v1675_v17  ;;  %v1617_v38 = vrot.slane %v9023_v60, 2  ;;  %v9081_v31 = vpop.permute.xlu1 %490 }
 0x124   : > { %v1220_v61 = vsel %vm792_vm1, %v1218_v50, %v1219_v10  ;;  %v10367_v51 = vrot.slane %v9020_v4, 2  ;;  %v1060_v36 = vrot.slane %v9032_v25, 1  ;;  %v595_v47 = vmul.f32 %v8969_v34, %v476_v62 }
 0x125   : > { %10392 = vst [vmem:[#allocation9_spill] sm:$0xff] %v9050_v40  ;;  %v1279_v18 = vadd.f32 %v1220_v61, %v1117_v2  ;;  %v1739_v43 = vmax.f32 %v9037_v42, 0.0  ;;  %v1222_v14 = vrot.slane %v9045_v26, 2  ;;  %v1678_v16 = vadd.f32 %v1617_v38, %v1516_v22  ;;  %v9070_v2 = vld [vmem:[%s10354_s1 + $0x6] ss:$0 sm:$0xff] }
 0x126   : > { %v825_v20 = vsel %vm792_vm1, %v823_v44, %v824_v54  ;;  %v886_v1 = vadd.f32 %v10367_v51, %v723_v39  ;;  %v1120_v10 = vadd.f32 %v1060_v36, %v958_v30  ;;  %v1325_v17 = vmul.f32 %v9070_v2, %v476_v62 }
 0x127   : > { %v883_v50 = vadd.f32 %v825_v20, %v720_v37  ;;  %v1738_v60 = vmax.f32 %v1710_v56, 0.0  ;;  %v531_v0 = vmul.f32 %v9000_v19, %v476_v62  ;;  %v993_v25 = vmul.f32 %v9029_v6, %v476_v62  ;;  %v9086_v37 = vld [vmem:[%s10354_s1 + $0x8] ss:$0 sm:$0xff] }
 0x128   : > { %v1389_v54 = vmul.f32 %v9078_v53, %v476_v62  ;;  %v663_v42 = vrot.slane %v595_v47, 1  ;;  %v1353_v44 = vadd.f32 %v1325_v17, %v1279_v18  ;;  %v1551_v39 = vmul.f32 %v9086_v37, %v476_v62 }
 0x129   : > { %v1713_v30 = vadd.f32 %v8672_v57, %v1678_v16  ;;  %v758_v22 = vmul.f32 %v9007_v27, %v476_v62  ;;  %v929_v56 = vmul.f32 %v8986_v45, %v476_v62  ;;  %v10368_v20 = vmov 0.0  }
 0x12a   : > { %v1454_v61 = vrot.slane %v1389_v54, 1  ;;  %7870 = vmatprep.subr.mxu0 %v10368_v20  ;;  %7985 = vmatprep.subr.mxu1 %v10368_v20  ;;  %v1155_v18 = vmul.f32 %v9042_v52, %v476_v62  ;;  %v1616_v47 = vrot.slane %v1551_v39, 2  ;;  %v932_v17 = vmul.f32 %v8986_v45, %v9081_v31 }
 0x12b   : > { %v9099_v13 = vmul.f32 %v9029_v6, %v9081_v31  ;;  %v1770_v16 = vmul.f32 %v8938_v48, %v1738_v60  ;;  %v1282_v54 = vadd.f32 %v1222_v14, %v1120_v10  ;;  %v1059_v23 = vrot.slane %v993_v25, 1 }
 0x12c   : > { %v1456_v51 = vsel %vm629_vm0, %v1454_v61, %v1455_v11  ;;  %v665_v62 = vsel %vm629_vm0, %v663_v42, %v664_v15  ;;  %v957_v39 = vadd.f32 %v929_v56, %v883_v50  ;;  %v960_v35 = vadd.f32 %v932_v17, %v886_v1 }
 0x12d   : > { %v1515_v20 = vadd.f32 %v1456_v51, %v1353_v44  ;;  %v1741_v40 = vmax.f32 %v1713_v30, 0.0  ;;  %v826_v41 = vrot.slane %v758_v22, 2  ;;  %v1618_v29 = vsel %vm792_vm1, %v1616_v47, %v1617_v38  ;;  %v486_v30 = vpop.permute.xlu0 %485 }
 0x12e   : > { %v9111_v60 = vmul.f32 %v8969_v34, %v9081_v31  ;;  %v1221_v49 = vrot.slane %v1155_v18, 2  ;;  %v10373_v25 = vrot.slane %v9099_v13, 1  ;;  %v9116_v5 = vmul.f32 %v9042_v52, %v9081_v31 }
 0x12f   : > { %v1677_v10 = vadd.f32 %v1618_v29, %v1515_v20  ;;  %v722_v15 = vadd.f32 %v665_v62, %v531_v0  ;;  %v1061_v11 = vsel %vm629_vm0, %v1059_v23, %v1060_v36  ;;  %v9121_v51 = vmul.f32 %v9078_v53, %v9081_v31  ;;  %v9133_v29 = vld [vmem:[%s10355_s2 + $0x2] ss:$0 sm:$0xff] }
 0x130   : > { %v9125_v38 = vmul.f32 %v9086_v37, %v9081_v31  ;;  %v9128_v1 = vmul.f32 %v8938_v48, %v1739_v43  ;;  %v1119_v50 = vadd.f32 %v1061_v11, %v957_v39  ;;  %v1122_v23 = vadd.f32 %v10373_v25, %v960_v35 }
 0x131   : > { %v1328_v36 = vmul.f32 %v9070_v2, %v9081_v31  ;;  %v9140_v0 = vadd.f32 %v9133_v29, %v1770_v16  ;;  %v9143_v42 = vmul.f32 %v8938_v48, %v1741_v40  ;;  %v9147_v43 = vmul.f32 %v9000_v19, %v9081_v31  ;;  %v9158_v40 = vld [vmem:[%s10356_s3 + $0x4] sm:$0xf] }
 0x132   : > { %10393 = vst [vmem:[#allocation10_spill] sm:$0xff] %v9125_v38  ;;  %10394 = vst [vmem:[#allocation11_spill] sm:$0xff] %v9128_v1  ;;  %v1712_v22 = vadd.f32 %v8672_v57, %v1677_v10  ;;  %v10372_v35 = vrot.slane %v9116_v5, 2  ;;  %v10396_v61 = vrot.slane %v9020_v4, 2  ;;  %v1458_v18 = vrot.slane %v9121_v51, 1  ;;  %7871 = vmatpush3.msk.msra.mxu0 %vm2177_vm2, %v9158_v40 }
 0x133   : > { %10395 = vst [vmem:[#allocation12_spill] sm:$0xff] %v9143_v42  ;;  %v1356_v56 = vadd.f32 %v1328_v36, %v1282_v54  ;;  %10397 = vst [vmem:[#allocation13_spill] sm:$0xff] %v9158_v40  ;;  %v1223_v57 = vsel %vm792_vm1, %v1221_v49, %v1222_v14  ;;  %v9175_v54 = vld [vmem:[%s10356_s3 + $0x14] sm:$0xf]  ;;  %v9178_v62 = vmul.f32 %v8969_v34, %v486_v30  ;;  %v9188_v49 = vld [vmem:[%s10355_s2] ss:$0 sm:$0xff] }
 0x134   : > { %v828_v20 = vsel %vm792_vm1, %v826_v41, %v10396_v61  ;;  %v9167_v16 = vadd.f32 %v10372_v35, %v1122_v23  ;;  %v1281_v4 = vadd.f32 %v1223_v57, %v1119_v50  ;;  %v9170_v41 = vmul.f32 %v9000_v19, %v486_v30  ;;  %10398 = vst [vmem:[#allocation14_spill] sm:$0xff] %v9175_v54 }
 0x135   : > { %v885_v17 = vadd.f32 %v828_v20, %v722_v15  ;;  %v9181_v26 = vmul.f32 %v9007_v27, %v486_v30  ;;  %v1695_v14 = vadd.f32 %v9188_v49, %v8656_v28  ;;  %7986 = vmatpush3.msk.msra.mxu1 %vm2177_vm2, %v9175_v54  ;;  %v1740_v39 = vmax.f32 %v1712_v22, 0.0 }
 0x136   : > { %v9194_v10 = vadd.f32 %v1458_v18, %v1356_v56  ;;  %v995_v15 = vmul.f32 %v9029_v6, %v486_v30  ;;  %v10400_v11 = vmov 0.0   ;;  %v1697_v51 = vadd.f32 %v9188_v49, %v8694_v32 }
 0x137   : > { %7872 = vmatprep.mubr.msk.f32.mxu0 %vm8414_vm3, %v10400_v11  ;;  %7875 = vmatprep.subr.mxu0 %v10400_v11  ;;  %v931_v50 = vmul.f32 %v8986_v45, %v486_v30  ;;  %v1723_v28 = vmax.f32 %v1695_v14, 0.0  ;;  %v10401_v23 = vmax.f32 %v8680_v8, 0.0  ;;  %v10402_v22 = vmax.f32 %v8719_v3, 0.0 }
 0x138   : > { %10399 = vst [vmem:[#allocation15_spill] sm:$0xff] %v9194_v10  ;;  %7987 = vmatprep.mubr.msk.f32.mxu1 %vm8414_vm3, %v10400_v11  ;;  %7995 = vmatprep.subr.mxu1 %v10400_v11  ;;  %v1157_v61 = vmul.f32 %v9042_v52, %v486_v30  ;;  %v1327_v32 = vmul.f32 %v9070_v2, %v486_v30  ;;  %v1725_v57 = vmax.f32 %v1697_v51, 0.0  ;;  %v1062_v44 = vrot.slane %v995_v15, 1 }
 0x139   : > { %v1754_v36 = vmul.f32 %v8938_v48, %v10401_v23  ;;  %v1756_v56 = vmul.f32 %v8938_v48, %v10402_v22  ;;  %v1391_v20 = vmul.f32 %v9078_v53, %v486_v30  ;;  %v1755_v8 = vmul.f32 %v8938_v48, %v1723_v28 }
 0x13a   : > { %v1814_v23 = vlaneseq  ;;  %v1772_v22 = vmul.f32 %v8938_v48, %v1740_v39  ;;  %v959_v47 = vadd.f32 %v931_v50, %v885_v17  ;;  %v1757_v35 = vmul.f32 %v8938_v48, %v1725_v57 }
 0x13b   : > { %v1786_v14 = vadd.f32 %v9133_v29, %v1754_v36  ;;  %v1788_v3 = vadd.f32 %v9133_v29, %v1756_v56  ;;  %v9221_v25 = vmul.f32 %v9086_v37, %v486_v30  ;;  %v1787_v40 = vadd.f32 %v9133_v29, %v1755_v8 }
 0x13c   : > { %v9224_v10 = vshrl.u32 %v1814_v23, 7  ;;  %v1457_v56 = vrot.slane %v1391_v20, 1  ;;  %v1789_v54 = vadd.f32 %v9133_v29, %v1757_v35  ;;  %v1224_v39 = vrot.slane %v1157_v61, 2  ;;  %v9243_v61 = vpop.permute.xlu1 %500 }
 0x13d   : > { %v1816_v51 = vmax.f32 %v1786_v14, %v1788_v3  ;;  %v1355_v17 = vadd.f32 %v1327_v32, %v1281_v4  ;;  %v1804_v30 = vadd.f32 %v9133_v29, %v1772_v22  ;;  %v10403_v57 = vrot.slane %v9099_v13, 1  ;;  %v9258_v22 = vpop.permute.xlu0 %495 }
 0x13e   : > { %v9230_v50 = vsub.s32 0, %v9224_v10  ;;  %v1817_v14 = vmax.f32 %v1787_v40, %v1789_v54  ;;  %v9237_v3 = vsub.s32 2, %v9224_v10  ;;  %v1619_v20 = vrot.slane %v9221_v25, 2 }
 0x13f   : > { %v1819_v15 = vrot.slane %v1816_v51, 1  ;;  %v1064_v8 = vsel %vm629_vm0, %v1062_v44, %v10403_v57  ;;  %v9241_v4 = vsub.s32 4, %v9224_v10  ;;  %v1459_v32 = vsel %vm629_vm0, %v1457_v56, %v1458_v18 }
 0x140   : > { %v1121_v23 = vadd.f32 %v1064_v8, %v959_v47  ;;  %vm1822_vm4 = vcmp.eq.s32.totalorder %v9224_v10, 0  ;;  %v9248_v13 = vsub.s32 6, %v9224_v10  ;;  %v1855_v44 = vrot.slane %v1817_v14, 1 }
 0x141   : > { %v1821_v35 = vmax.f32 %v1816_v51, %v1819_v15  ;;  %v1517_v40 = vadd.f32 %v1459_v32, %v1355_v17  ;;  %vm1830_vm5 = vcmp.eq.s32.totalorder %v9224_v10, 1  ;;  %vm1838_vm6 = vcmp.eq.s32.totalorder %v9224_v10, 2 }
 0x142   : > { %v1857_v47 = vmax.f32 %v1817_v14, %v1855_v44  ;;  %v9256_v18 = vmul.f32 %v9078_v53, %v9243_v61  ;;  %vm1846_vm8 = vcmp.eq.s32.totalorder %v9224_v10, 3  ;;  %vm1858_vm9 = vcmp.eq.s32.totalorder %v9224_v10, 4 }
 0x143   : > { %v1828_v54 = vrot.slane %v1821_v35, %v9230_v50  ;;  %v1836_v25 = vrot.slane %v1821_v35, %v9237_v3  ;;  %v1844_v56 = vrot.slane %v1821_v35, %v9241_v4  ;;  %v1852_v15 = vrot.slane %v1821_v35, %v9248_v13 }
 0x144   : > { %vm1866_vm10 = vcmp.eq.s32.totalorder %v9224_v10, 5  ;;  %vm1874_vm11 = vcmp.eq.s32.totalorder %v9224_v10, 6  ;;  %v1864_v8 = vrot.slane %v1857_v47, %v9230_v50  ;;  %v10404_v14 = vrot.slane %v9116_v5, 2  ;;  %v8346_v10 = vld [vmem:[%s10356_s3 + $0x4] sm:$0xf] }
 0x145   : > { %v1829_v51 = vsel %vm1822_vm4, %v1828_v54, 0.0  ;;  %v1393_v44 = vmul.f32 %v9078_v53, %v9258_v22  ;;  %v1872_v35 = vrot.slane %v1857_v47, %v9237_v3 }
 0x146   : > { %v1837_v17 = vsel %vm1830_vm5, %v1836_v25, %v1829_v51  ;;  %v1226_v32 = vsel %vm792_vm1, %v1224_v39, %v10404_v14  ;;  %v10405_v25 = vrot.slane %v9111_v60, 1  ;;  %v1880_v39 = vrot.slane %v1857_v47, %v9241_v4 }
 0x147   : > { %v1845_v57 = vsel %vm1838_vm6, %v1844_v56, %v1837_v17  ;;  %v761_v56 = vmul.f32 %v9007_v27, %v9081_v31  ;;  %v1330_v17 = vmul.f32 %v9070_v2, %v9243_v61  ;;  %v1283_v14 = vadd.f32 %v1226_v32, %v1121_v23 }
 0x148   : > { %v1853_v54 = vsel %vm1846_vm8, %v1852_v15, %v1845_v57  ;;  %v725_v51 = vadd.f32 %v10405_v25, %v9147_v43  ;;  %v9296_v43 = vmul.f32 %v9086_v37, %v9243_v61  ;;  %v1329_v47 = vmul.f32 %v9070_v2, %v9258_v22 }
 0x149   : > { %v1865_v5 = vsel %vm1858_vm9, %v1864_v8, %v1853_v54  ;;  %v830_v25 = vrot.slane %v761_v56, 2  ;;  %v1460_v8 = vrot.slane %v1393_v44, 1  ;;  %v998_v23 = vmul.f32 %v9029_v6, %v9243_v61  ;;  %v9313_v56 = vld [vmem:[%s10356_s3] sm:$0xf] }
 0x14a   : > { %v1873_v15 = vsel %vm1866_vm10, %v1872_v35, %v1865_v5  ;;  %v10406_v32 = vrot.slane %v9125_v38, 2  ;;  %10407 = vst [vmem:[#allocation16_spill] sm:$0xff] %v9313_v56  ;;  %v9318_v44 = vmax.f32 %v9140_v0, %v1804_v30  ;;  %v9323_v36 = vadd.f32 %v1330_v17, %v9167_v16 }
 0x14b   : > { %v9300_v31 = vsel %vm1874_vm11, %v1880_v39, %v1873_v15  ;;  %v888_v5 = vadd.f32 %v830_v25, %v725_v51  ;;  %v934_v39 = vmul.f32 %v8986_v45, %v9243_v61  ;;  %v1160_v51 = vmul.f32 %v9042_v52, %v9243_v61 }
 0x14c   : > { %v1621_v54 = vsel %vm792_vm1, %v1619_v20, %v10406_v32  ;;  %v2173_v35 = vrot.slane %v9300_v31, 1  ;;  %10408 = vst [vmem:[#allocation17_spill] sm:$0xff] %v9318_v44  ;;  %v1357_v20 = vadd.f32 %v1329_v47, %v1283_v14  ;;  %v9325_v32 = vpop.permute.xlu1 %900  ;;  %v10409_v38 = vrot.slane %v9111_v60, 1 }
 0x14d   : > { %v9320_v15 = vadd.f32 %v1621_v54, %v1517_v40  ;;  %v962_v28 = vadd.f32 %v934_v39, %v888_v5  ;;  %v10410_v0 = vrot.slane %v9178_v62, 1  ;;  %v10411_v16 = vrot.slane %v9256_v18, 1  ;;  %v896_v62 = vpop.permute.xlu0 %895 }
 0x14e   : > { %7873 = vmatmul.mubr.msk.f32.vlgmr.msra.gmra.mrb[0].mxu0 %vm2174_vm7, %v2173_v35  ;;  %v9343_v17 = vmul.f32 %v9086_v37, %v9258_v22  ;;  %v1066_v14 = vrot.slane %v998_v23, 1  ;;  %v9356_v47 = vmul.f32 %v9078_v53, %v9325_v32  ;;  %v997_v23 = vmul.f32 %v9029_v6, %v9258_v22 }
 0x14f   : > { %v668_v30 = vsel %vm629_vm0, %v10410_v0, %v10409_v38  ;;  %7876 = vmatpush3.msk.msra.mxu0 %vm2177_vm2, %v9313_v56  ;;  %v1462_v40 = vsel %vm629_vm0, %v1460_v8, %v10411_v16  ;;  %7877 = vmatprep.mubr.msk.f32.mxu0 %vm8414_vm3, %v10400_v11  ;;  %v9352_v38 = vld [vmem:[%s10356_s3 + $0x8] sm:$0xf]  ;;  %v10413_v8 = vrot.slane %v9181_v26, 2  ;;  %v933_v0 = vmul.f32 %v8986_v45, %v9258_v22 }
 0x150   : > { %v724_v60 = vadd.f32 %v668_v30, %v9170_v41  ;;  %7880 = vmatprep.subr.mxu0 %v10400_v11  ;;  %10412 = vst [vmem:[#allocation18_spill] sm:$0xff] %v9352_v38  ;;  %v1159_v41 = vmul.f32 %v9042_v52, %v9258_v22  ;;  %v9365_v35 = vadd.f32 %v1462_v40, %v1357_v20  ;;  %v1228_v30 = vrot.slane %v1160_v51, 2  ;;  %v1299_v56 = vpop.permute.xlu1 %1298 }
 0x151   : > { %v831_v54 = vsel %vm792_vm1, %v10413_v8, %v830_v25  ;;  %v1124_v5 = vadd.f32 %v1066_v14, %v962_v28  ;;  %v1065_v26 = vrot.slane %v997_v23, 1  ;;  %v1395_v25 = vmul.f32 %v9078_v53, %v896_v62 }
 0x152   : > { %v887_v39 = vadd.f32 %v831_v54, %v724_v60  ;;  %7878 = vmatmul.mubr.msk.f32.vlgmr.msra.gmra.mrb[2].mxu0 %vm2174_vm7, %v9300_v31  ;;  %v1227_v16 = vrot.slane %v1159_v41, 2  ;;  %v936_v28 = vmul.f32 %v8986_v45, %v9325_v32  ;;  %v9379_v20 = vmul.f32 %v9086_v37, %v9325_v32 }
 0x153   : > { %7881 = vmatpush3.msk.msra.mxu0 %vm2177_vm2, %v9352_v38  ;;  %7882 = vmatprep.mubr.msk.f32.mxu0 %vm8414_vm3, %v10400_v11  ;;  %v9385_v51 = vmul.f32 %v9029_v6, %v9325_v32  ;;  %v1464_v60 = vrot.slane %v9356_v47, 1  ;;  %v1067_v54 = vsel %vm629_vm0, %v1065_v26, %v1066_v14  ;;  %v999_v23 = vmul.f32 %v9029_v6, %v896_v62 }
 0x154   : > { %v961_v40 = vadd.f32 %v933_v0, %v887_v39  ;;  %7885 = vmatprep.subr.mxu0 %v10400_v11  ;;  %v1286_v41 = vadd.f32 %v1228_v30, %v1124_v5  ;;  %v1557_v57 = vmul.f32 %v9086_v37, %v896_v62  ;;  %v2326_v39 = vrot.slane %v9300_v31, 2  ;;  %v9396_v0 = vld [vmem:[%s10356_s3 + $0xc] sm:$0xf] }
 0x155   : > { %10414 = vst [vmem:[#allocation19_spill] sm:$0xff] %v9396_v0  ;;  %v1229_v38 = vsel %vm792_vm1, %v1227_v16, %v1228_v30  ;;  %v1463_v47 = vrot.slane %v1395_v25, 1  ;;  %v600_v14 = vmul.f32 %v8969_v34, %v9243_v61  ;;  %v763_v6 = vmul.f32 %v9007_v27, %v9243_v61 }
 0x156   : > { %v1123_v8 = vadd.f32 %v1067_v54, %v961_v40  ;;  %v1332_v5 = vmul.f32 %v9070_v2, %v9325_v32  ;;  %v1331_v40 = vmul.f32 %v9070_v2, %v896_v62  ;;  %7883 = vmatmul.mubr.msk.f32.vlgmr.msra.gmra.mrb[4].mxu0 %vm2174_vm7, %v2326_v39  ;;  %v935_v54 = vmul.f32 %v8986_v45, %v896_v62 }
 0x157   : > { %v1161_v30 = vmul.f32 %v9042_v52, %v896_v62  ;;  %7886 = vmatpush3.msk.msra.mxu0 %vm2177_vm2, %v9396_v0  ;;  %v536_v16 = vmul.f32 %v9000_v19, %v9243_v61  ;;  %v670_v25 = vrot.slane %v600_v14, 1  ;;  %7887 = vmatprep.mubr.msk.f32.mxu0 %vm8414_vm3, %v10400_v11  ;;  %v1625_v44 = vrot.slane %v1557_v57, 2 }
 0x158   : > { %v1285_v31 = vadd.f32 %v1229_v38, %v1123_v8  ;;  %v1360_v38 = vadd.f32 %v1332_v5, %v1286_v41  ;;  %v1068_v8 = vrot.slane %v999_v23, 1  ;;  %7890 = vmatprep.subr.mxu0 %v10400_v11  ;;  %v1465_v45 = vsel %vm629_vm0, %v1463_v47, %v1464_v60 }
 0x159   : > { %v727_v62 = vadd.f32 %v670_v25, %v536_v16  ;;  %v833_v39 = vrot.slane %v763_v6, 2  ;;  %v599_v0 = vmul.f32 %v8969_v34, %v9258_v22  ;;  %v1162_v61 = vmul.f32 %v9042_v52, %v9325_v32 }
 0x15a   : > { %v1359_v26 = vadd.f32 %v1331_v40, %v1285_v31  ;;  %v9423_v14 = vmul.f32 %v9078_v53, %v1299_v56  ;;  %v9426_v41 = vmul.f32 %v9086_v37, %v1299_v56  ;;  %v762_v57 = vmul.f32 %v9007_v27, %v9258_v22 }
 0x15b   : > { %v1230_v23 = vrot.slane %v1161_v30, 2  ;;  %v890_v47 = vadd.f32 %v833_v39, %v727_v62  ;;  %v669_v31 = vrot.slane %v599_v0, 1  ;;  %v9430_v6 = vadd.f32 %v1464_v60, %v1360_v38 }
 0x15c   : > { %v1521_v5 = vadd.f32 %v1465_v45, %v1359_v26  ;;  %v1069_v34 = vrot.slane %v9385_v51, 1  ;;  %v535_v52 = vmul.f32 %v9000_v19, %v9258_v22  ;;  %v832_v32 = vrot.slane %v762_v57, 2  ;;  %v1294_v26 = vpop.permute.xlu0 %1293 }
 0x15d   : > { %v10415_v40 = vrot.slane %v9379_v20, 2  ;;  %v964_v1 = vadd.f32 %v936_v28, %v890_v47  ;;  %v1334_v42 = vmul.f32 %v9070_v2, %v1299_v56  ;;  %v671_v27 = vsel %vm629_vm0, %v669_v31, %v670_v25 }
 0x15e   : > { %v1231_v30 = vrot.slane %v1162_v61, 2  ;;  %v1467_v60 = vrot.slane %v9423_v14, 1  ;;  %v1629_v0 = vrot.slane %v9426_v41, 2  ;;  %v726_v51 = vadd.f32 %v671_v27, %v535_v52 }
 0x15f   : > { %v1627_v16 = vsel %vm792_vm1, %v1625_v44, %v10415_v40  ;;  %v1126_v45 = vadd.f32 %v1069_v34, %v964_v1  ;;  %v834_v19 = vsel %vm792_vm1, %v832_v32, %v833_v39  ;;  %v10416_v22 = vrot.slane %v8712_v63, 2 }
 0x160   : > { %v1683_v38 = vadd.f32 %v1627_v16, %v1521_v5  ;;  %v889_v28 = vadd.f32 %v834_v19, %v726_v51  ;;  %v1070_v56 = vsel %vm629_vm0, %v1068_v8, %v1069_v34  ;;  %v1397_v25 = vmul.f32 %v9078_v53, %v1294_v26 }
 0x161   : > { %v1664_v44 = vadd.f32 %v10416_v22, %v8734_v46  ;;  %v10417_v62 = vrot.slane %v8754_v9, 2  ;;  %v1288_v14 = vadd.f32 %v1231_v30, %v1126_v45  ;;  %v1559_v57 = vmul.f32 %v9086_v37, %v1294_v26 }
 0x162   : > { %v1726_v39 = vmax.f32 %v8762_v24, 0.0  ;;  %v963_v5 = vadd.f32 %v935_v54, %v889_v28  ;;  %v1232_v63 = vsel %vm792_vm1, %v1230_v23, %v1231_v30  ;;  %v1333_v46 = vmul.f32 %v9070_v2, %v1294_v26 }
 0x163   : > { %v1666_v61 = vadd.f32 %v10417_v62, %v8775_v55  ;;  %v1699_v1 = vadd.f32 %v9188_v49, %v1664_v44  ;;  %v1718_v53 = vadd.f32 %v9188_v49, %v1683_v38  ;;  %v1728_v9 = vmax.f32 %v8816_v7, 0.0  ;;  %v10420_v44 = vld [vmem:[#allocation5_spill] sm:$0xff] }
 0x164   : > { %v1758_v55 = vmul.f32 %v8938_v48, %v1726_v39  ;;  %v1125_v31 = vadd.f32 %v1070_v56, %v963_v5  ;;  %v1466_v37 = vrot.slane %v1397_v25, 1  ;;  %v10418_v24 = vrot.slane %v8797_v21, 2 }
 0x165   : > { %v1701_v8 = vadd.f32 %v9188_v49, %v1666_v61  ;;  %v1727_v47 = vmax.f32 %v1699_v1, 0.0  ;;  %v1362_v52 = vadd.f32 %v1334_v42, %v1288_v14  ;;  %v1628_v23 = vrot.slane %v1559_v57, 2 }
 0x166   : > { %v1668_v54 = vadd.f32 %v10418_v24, %v8819_v58  ;;  %v1760_v32 = vmul.f32 %v8938_v48, %v1728_v9  ;;  %v1287_v40 = vadd.f32 %v1232_v63, %v1125_v31  ;;  %v10419_v7 = vrot.slane %v8838_v59, 2 }
 0x167   : > { %v1729_v34 = vmax.f32 %v1701_v8, 0.0  ;;  %v1759_v2 = vmul.f32 %v8938_v48, %v1727_v47  ;;  %v1790_v30 = vadd.f32 %v9133_v29, %v1758_v55  ;;  %v1730_v42 = vmax.f32 %v8846_v12, 0.0 }
 0x168   : > { %v1670_v27 = vadd.f32 %v10419_v7, %v8851_v33  ;;  %v1703_v26 = vadd.f32 %v9188_v49, %v1668_v54  ;;  %v1792_v58 = vadd.f32 %v9133_v29, %v1760_v32  ;;  %v1361_v51 = vadd.f32 %v1333_v46, %v1287_v40 }
 0x169   : > { %v1761_v16 = vmul.f32 %v8938_v48, %v1729_v34  ;;  %v1791_v21 = vadd.f32 %v9133_v29, %v1759_v2  ;;  %v1746_v22 = vmax.f32 %v1718_v53, 0.0  ;;  %v1468_v59 = vsel %vm629_vm0, %v1466_v37, %v1467_v60 }
 0x16a   : > { %v1705_v45 = vadd.f32 %v9188_v49, %v1670_v27  ;;  %v1731_v19 = vmax.f32 %v1703_v26, 0.0  ;;  %v1882_v33 = vmax.f32 %v1790_v30, %v1792_v58  ;;  %v1732_v28 = vmax.f32 %v10420_v44, 0.0  ;;  %v10425_v27 = vld [vmem:[#allocation6_spill] sm:$0xff] }
 0x16b   : > { %v1793_v38 = vadd.f32 %v9133_v29, %v1761_v16  ;;  %v1523_v56 = vadd.f32 %v1468_v59, %v1361_v51  ;;  %v1762_v61 = vmul.f32 %v8938_v48, %v1730_v42  ;;  %v1524_v14 = vadd.f32 %v1467_v60, %v1362_v52 }
 0x16c   : > { %v1733_v62 = vmax.f32 %v1705_v45, 0.0  ;;  %v1630_v12 = vsel %vm792_vm1, %v1628_v23, %v1629_v0  ;;  %v1885_v57 = vrot.slane %v1882_v33, 1  ;;  %v1764_v1 = vmul.f32 %v8938_v48, %v1732_v28 }
 0x16d   : > { %v1883_v25 = vmax.f32 %v1791_v21, %v1793_v38  ;;  %v1685_v39 = vadd.f32 %v1630_v12, %v1523_v56  ;;  %v1763_v63 = vmul.f32 %v8938_v48, %v1731_v19  ;;  %v9487_v8 = vadd.f32 %v9188_v49, %v9320_v15 }
 0x16e   : > { %v1765_v46 = vmul.f32 %v8938_v48, %v1733_v62  ;;  %v10421_v53 = vrot.slane %v9296_v43, 2  ;;  %v10422_v60 = vrot.slane %v9343_v17, 2  ;;  %v1887_v9 = vmax.f32 %v1882_v33, %v1885_v57  ;;  %v10429_v33 = vld [vmem:[#allocation9_spill] sm:$0xff]  ;;  %v10430_v62 = vld [vmem:[#allocation7_spill] sm:$0xff] }
 0x16f   : > { %v1909_v5 = vrot.slane %v1883_v25, 1  ;;  %v1796_v55 = vadd.f32 %v9133_v29, %v1764_v1  ;;  %v10423_v31 = vrot.slane %v9256_v18, 1  ;;  %v1794_v24 = vadd.f32 %v9133_v29, %v1762_v61  ;;  %v9546_v57 = vld [vmem:[%s10356_s3 + $0x10] sm:$0xf] }
 0x170   : > { %v1624_v47 = vsel %vm792_vm1, %v10422_v60, %v10421_v53  ;;  %v1797_v15 = vadd.f32 %v9133_v29, %v1765_v46  ;;  %v1720_v54 = vadd.f32 %v9188_v49, %v1685_v39  ;;  %v1891_v17 = vrot.slane %v1887_v9, %v9230_v50 }
 0x171   : > { %v9498_v37 = vadd.f32 %v10423_v31, %v9323_v36  ;;  %v1681_v34 = vadd.f32 %v1624_v47, %v9365_v35  ;;  %v1896_v52 = vrot.slane %v1887_v9, %v9237_v3  ;;  %v1911_v23 = vmax.f32 %v1883_v25, %v1909_v5 }
 0x172   : > { %v10424_v2 = vrot.slane %v9379_v20, 2  ;;  %v1686_v36 = vadd.f32 %v1629_v0, %v1524_v14  ;;  %v1778_v18 = vmul.f32 %v8938_v48, %v1746_v22  ;;  %v1795_v35 = vadd.f32 %v9133_v29, %v1763_v63  ;;  %v10427_v0 = vld [vmem:[#allocation8_spill] sm:$0xff] }
 0x173   : > { %v1892_v40 = vsel %vm1822_vm4, %v1891_v17, 0.0  ;;  %v1901_v16 = vrot.slane %v1887_v9, %v9241_v4  ;;  %v1927_v7 = vmax.f32 %v1794_v24, %v1796_v55  ;;  %v10426_v26 = vmax.f32 %v10425_v27, 0.0 }
 0x174   : > { %v1684_v32 = vadd.f32 %v10424_v2, %v9430_v6  ;;  %v1897_v20 = vsel %vm1830_vm5, %v1896_v52, %v1892_v40  ;;  %v1906_v41 = vrot.slane %v1887_v9, %v9248_v13  ;;  %v1928_v6 = vmax.f32 %v1795_v35, %v1797_v15 }
 0x175   : > { %v1767_v30 = vmul.f32 %v8938_v48, %v10426_v26  ;;  %v10428_v21 = vmax.f32 %v10427_v0, 0.0  ;;  %v1748_v42 = vmax.f32 %v1720_v54, 0.0  ;;  %v1902_v51 = vsel %vm1838_vm6, %v1901_v16, %v1897_v20  ;;  %v10433_v26 = vld [vmem:[#allocation14_spill] sm:$0xff] }
 0x176   : > { %v1915_v38 = vrot.slane %v1911_v23, %v9230_v50  ;;  %v1930_v45 = vrot.slane %v1927_v7, 1  ;;  %v1907_v19 = vsel %vm1846_vm8, %v1906_v41, %v1902_v51  ;;  %v1920_v22 = vrot.slane %v1911_v23, %v9237_v3 }
 0x177   : > { %v1769_v58 = vmul.f32 %v8938_v48, %v10428_v21  ;;  %v1954_v59 = vrot.slane %v1928_v6, 1  ;;  %v1800_v44 = vadd.f32 %v9133_v29, %v10429_v33  ;;  %v1925_v56 = vrot.slane %v1911_v23, %v9241_v4  ;;  %v9606_v21 = vld [vmem:[%s10356_s3 + $0x18] sm:$0xf] }
 0x178   : > { %v1916_v28 = vsel %vm1858_vm9, %v1915_v38, %v1907_v19  ;;  %v1932_v25 = vmax.f32 %v1927_v7, %v1930_v45  ;;  %v1798_v61 = vadd.f32 %v9133_v29, %v10430_v62  ;;  %v9539_v14 = vadd.f32 %v9188_v49, %v1681_v34  ;;  %v10432_v7 = vld [vmem:[#allocation11_spill] sm:$0xff]  ;;  %v10436_v45 = vld [vmem:[#allocation10_spill] sm:$0xff] }
 0x179   : > { %v1921_v12 = vsel %vm1866_vm10, %v1920_v22, %v1916_v28  ;;  %v1956_v1 = vmax.f32 %v1928_v6, %v1954_v59  ;;  %v1801_v39 = vadd.f32 %v9133_v29, %v1769_v58  ;;  %v9556_v60 = vadd.f32 %v9188_v49, %v1684_v32  ;;  %v10434_v6 = vld [vmem:[#allocation17_spill] sm:$0xff]  ;;  %v10435_v38 = vld [vmem:[#allocation15_spill] sm:$0xff] }
 0x17a   : > { %v9551_v5 = vsel %vm1874_vm11, %v1925_v56, %v1921_v12  ;;  %v1936_v63 = vrot.slane %v1932_v25, %v9230_v50  ;;  %v1941_v46 = vrot.slane %v1932_v25, %v9237_v3  ;;  %v1972_v53 = vmax.f32 %v1798_v61, %v1800_v44 }
 0x17b   : > { %v9559_v47 = vadd.f32 %v9188_v49, %v1686_v36  ;;  %v9562_v9 = vadd.f32 %v9133_v29, %v1778_v18  ;;  %7888 = vmatmul.mubr.msk.f32.vlgmr.msra.gmra.mrb[6].mxu0 %vm2174_vm7, %v9551_v5  ;;  %v1799_v55 = vadd.f32 %v9133_v29, %v1767_v30  ;;  %v1780_v31 = vmul.f32 %v8938_v48, %v1748_v42  ;;  %v10431_v36 = vld [vmem:[#allocation12_spill] sm:$0xff] }
 0x17c   : > { %v2480_v34 = vrot.slane %v9551_v5, 1  ;;  %7891 = vmatpush3.msk.msra.mxu0 %vm2177_vm2, %v9546_v57  ;;  %7892 = vmatprep.mubr.msk.f32.mxu0 %vm8414_vm3, %v10400_v11  ;;  %v1937_v24 = vsel %vm1822_vm4, %v1936_v63, 0.0  ;;  %v1946_v15 = vrot.slane %v1932_v25, %v9241_v4  ;;  %v2557_v54 = vrot.slane %v9551_v5, 2  ;;  %v9642_v63 = vld [vmem:[%s10356_s3 + $0x1c] sm:$0xf] }
 0x17d   : > { %7895 = vmatprep.subr.mxu0 %v10400_v11  ;;  %v1942_v48 = vsel %vm1830_vm5, %v1941_v46, %v1937_v24  ;;  %v1951_v17 = vrot.slane %v1932_v25, %v9248_v13  ;;  %v1973_v52 = vmax.f32 %v1799_v55, %v1801_v39  ;;  %v1960_v2 = vrot.slane %v1956_v1, %v9230_v50 }
 0x17e   : > { %v1947_v23 = vsel %vm1838_vm6, %v1946_v15, %v1942_v48  ;;  %v1975_v32 = vrot.slane %v1972_v53, 1  ;;  %v1805_v18 = vadd.f32 %v9133_v29, %v10431_v36  ;;  %v1965_v40 = vrot.slane %v1956_v1, %v9237_v3 }
 0x17f   : > { %7893 = vmatmul.mubr.msk.f32.vlgmr.msra.gmra.mrb[8].mxu0 %vm2174_vm7, %v2480_v34  ;;  %v1952_v35 = vsel %vm1846_vm8, %v1951_v17, %v1947_v23  ;;  %v1999_v16 = vrot.slane %v1973_v52, 1  ;;  %v1803_v27 = vadd.f32 %v9133_v29, %v10432_v7  ;;  %v1970_v20 = vrot.slane %v1956_v1, %v9241_v4 }
 0x180   : > { %7896 = vmatpush3.msk.msra.mxu0 %vm2177_vm2, %v10433_v26  ;;  %7897 = vmatprep.mubr.msk.f32.mxu0 %vm8414_vm3, %v10400_v11  ;;  %v1961_v30 = vsel %vm1858_vm9, %v1960_v2, %v1952_v35  ;;  %v1977_v41 = vmax.f32 %v1972_v53, %v1975_v32  ;;  %v2020_v0 = vrot.slane %v10434_v6, 1  ;;  %v10437_v19 = vrot.slane %v10436_v45, 2 }
 0x181   : > { %7900 = vmatprep.subr.mxu0 %v10400_v11  ;;  %v1966_v58 = vsel %vm1866_vm10, %v1965_v40, %v1961_v30  ;;  %v2001_v42 = vmax.f32 %v1973_v52, %v1999_v16  ;;  %v2018_v51 = vmax.f32 %v1803_v27, %v1805_v18  ;;  %v10438_v28 = vrot.slane %v9296_v43, 2 }
 0x182   : > { %v1680_v22 = vadd.f32 %v10437_v19, %v10435_v38  ;;  %v9615_v59 = vsel %vm1874_vm11, %v1970_v20, %v1966_v58  ;;  %v1981_v33 = vrot.slane %v1977_v41, %v9230_v50  ;;  %v1986_v44 = vrot.slane %v1977_v41, %v9237_v3 }
 0x183   : > { %v1682_v56 = vadd.f32 %v10438_v28, %v9498_v37  ;;  %v1812_v25 = vadd.f32 %v9133_v29, %v1780_v31  ;;  %7898 = vmatmul.mubr.msk.f32.vlgmr.msra.gmra.mrb[10].mxu0 %vm2174_vm7, %v2557_v54  ;;  %v1991_v62 = vrot.slane %v1977_v41, %v9241_v4  ;;  %v1996_v61 = vrot.slane %v1977_v41, %v9248_v13 }
 0x184   : > { %v2005_v12 = vrot.slane %v2001_v42, %v9230_v50  ;;  %7901 = vmatpush3.msk.msra.mxu0 %vm2177_vm2, %v9606_v21  ;;  %7902 = vmatprep.mubr.msk.f32.mxu0 %vm8414_vm3, %v10400_v11  ;;  %v1982_v43 = vsel %vm1822_vm4, %v1981_v33, 0.0  ;;  %v2010_v37 = vrot.slane %v2001_v42, %v9237_v3  ;;  %v2015_v1 = vrot.slane %v2001_v42, %v9241_v4  ;;  %v8345_v42 = vld [vmem:[%s10355_s2 + $0x1] ss:$0 sm:$0xff] }
 0x185   : > { %v2022_v39 = vmax.f32 %v10434_v6, %v2020_v0  ;;  %7905 = vmatprep.subr.mxu0 %v10400_v11  ;;  %v1987_v46 = vsel %vm1830_vm5, %v1986_v44, %v1982_v43  ;;  %v9647_v53 = vrot.slane %v9615_v59, 1  ;;  %v2044_v55 = vrot.slane %v2018_v51, 1 }
 0x186   : > { %v1715_v31 = vadd.f32 %v9188_v49, %v1680_v22  ;;  %v1992_v24 = vsel %vm1838_vm6, %v1991_v62, %v1987_v46  ;;  %v1717_v17 = vadd.f32 %v9188_v49, %v1682_v56  ;;  %v1742_v32 = vmax.f32 %v9487_v8, 0.0  ;;  %v9676_v8 = vld [vmem:[%s10356_s3 + $0x20] sm:$0xf] }
 0x187   : > { %v2026_v15 = vrot.slane %v2022_v39, %v9230_v50  ;;  %v2031_v48 = vrot.slane %v2022_v39, %v9237_v3  ;;  %7903 = vmatmul.mubr.msk.f32.vlgmr.msra.gmra.mrb[12].mxu0 %vm2174_vm7, %v9615_v59  ;;  %v1997_v52 = vsel %vm1846_vm8, %v1996_v61, %v1992_v24  ;;  %v2036_v23 = vrot.slane %v2022_v39, %v9241_v4 }
 0x188   : > { %v2046_v2 = vmax.f32 %v2018_v51, %v2044_v55  ;;  %7906 = vmatpush3.msk.msra.mxu0 %vm2177_vm2, %v9642_v63  ;;  %v2006_v36 = vsel %vm1858_vm9, %v2005_v12, %v1997_v52  ;;  %7907 = vmatprep.mubr.msk.f32.mxu0 %vm8414_vm3, %v10400_v11  ;;  %v1743_v18 = vmax.f32 %v1715_v31, 0.0  ;;  %v1744_v35 = vmax.f32 %v9539_v14, 0.0 }
 0x189   : > { %v2027_v49 = vsel %vm1822_vm4, %v2026_v15, 0.0  ;;  %v2011_v40 = vsel %vm1866_vm10, %v2010_v37, %v2006_v36  ;;  %7910 = vmatprep.subr.mxu0 %v10400_v11  ;;  %v2041_v7 = vrot.slane %v2022_v39, %v9248_v13  ;;  %v1745_v41 = vmax.f32 %v1717_v17, 0.0  ;;  %v10439_v37 = vld [vmem:[#allocation13_spill] sm:$0xff]  ;;  %v10440_v15 = vld [vmem:[#allocation16_spill] sm:$0xff] }
 0x18a   : > { %v2032_v16 = vsel %vm1830_vm5, %v2031_v48, %v2027_v49  ;;  %v2050_v27 = vrot.slane %v2046_v2, %v9230_v50  ;;  %v9684_v14 = vsel %vm1874_vm11, %v2015_v1, %v2011_v40  ;;  %v2055_v20 = vrot.slane %v2046_v2, %v9237_v3 }
 0x18b   : > { %v2037_v30 = vsel %vm1838_vm6, %v2036_v23, %v2032_v16  ;;  %v9690_v6 = vrot.slane %v9684_v14, 2  ;;  %7908 = vmatmul.mubr.msk.f32.vlgmr.msra.gmra.mrb[14].mxu0 %vm2174_vm7, %v9647_v53  ;;  %v2060_v58 = vrot.slane %v2046_v2, %v9241_v4  ;;  %v1774_v51 = vmul.f32 %v8345_v42, %v1742_v32 }
 0x18c   : > { %v2042_v0 = vsel %vm1846_vm8, %v2041_v7, %v2037_v30  ;;  %7911 = vmatpush3.msk.msra.mxu0 %vm2177_vm2, %v9676_v8  ;;  %7912 = vmatprep.mubr.msk.f32.mxu0 %vm8414_vm3, %v10400_v11  ;;  %v1775_v45 = vmul.f32 %v8345_v42, %v1743_v18  ;;  %v1776_v19 = vmul.f32 %v8345_v42, %v1744_v35  ;;  %v9710_v33 = vrot.slane %v9615_v59, 2 }
 0x18d   : > { %v2051_v38 = vsel %vm1858_vm9, %v2050_v27, %v2042_v0  ;;  %v2107_v22 = vmax.f32 %v9562_v9, %v1812_v25  ;;  %7988 = vmatmul.mubr.msk.f32.vlgmr.msra.gmra.mrb[0].mxu1 %vm2174_vm7, %v9690_v6  ;;  %7915 = vmatprep.subr.mxu0 %v10400_v11  ;;  %v1777_v28 = vmul.f32 %v8345_v42, %v1745_v41  ;;  %v1749_v43 = vmax.f32 %v9559_v47, 0.0  ;;  %v10442_v0 = vld [vmem:[#allocation19_spill] sm:$0xff] }
 0x18e   : > { %v2056_v44 = vsel %vm1866_vm10, %v2055_v20, %v2051_v38  ;;  %7996 = vmatpush3.msk.msra.mxu1 %vm2177_vm2, %v9642_v63  ;;  %7997 = vmatprep.mubr.msk.f32.mxu1 %vm8414_vm3, %v10400_v11  ;;  %v1806_v56 = vadd.f32 %v9133_v29, %v1774_v51  ;;  %v1808_v25 = vadd.f32 %v9133_v29, %v1776_v19  ;;  %v1747_v39 = vmax.f32 %v9556_v60, 0.0 }
 0x18f   : > { %v9721_v9 = vsel %vm1874_vm11, %v2060_v58, %v2056_v44  ;;  %7913 = vmatmul.mubr.msk.f32.vlgmr.msra.gmra.mrb[16].mxu0 %vm2174_vm7, %v9710_v33  ;;  %8005 = vmatprep.subr.mxu1 %v10400_v11  ;;  %v1807_v61 = vadd.f32 %v9133_v29, %v1775_v45  ;;  %v1809_v12 = vadd.f32 %v9133_v29, %v1777_v28  ;;  %v2110_v46 = vrot.slane %v2107_v22, 1 }
 0x190   : > { %v9728_v62 = vrot.slane %v9721_v9, 1  ;;  %7916 = vmatpush3.msk.msra.mxu0 %vm2177_vm2, %v10439_v37  ;;  %7917 = vmatprep.mubr.msk.f32.mxu0 %vm8414_vm3, %v10400_v11  ;;  %v2062_v1 = vmax.f32 %v1806_v56, %v1808_v25  ;;  %v9750_v60 = vrot.slane %v9684_v14, 1  ;;  %v1781_v24 = vmul.f32 %v8345_v42, %v1749_v43 }
 0x191   : > { %7920 = vmatprep.subr.mxu0 %v10400_v11  ;;  %v2063_v55 = vmax.f32 %v1807_v61, %v1809_v12  ;;  %v1779_v17 = vmul.f32 %v8345_v42, %v1747_v39  ;;  %v9757_v52 = vmax.f32 %v2107_v22, %v2110_v46 }
 0x192   : > { %7998 = vmatmul.mubr.msk.f32.vlgmr.msra.gmra.mrb[2].mxu1 %vm2174_vm7, %v9728_v62  ;;  %v2065_v47 = vrot.slane %v2062_v1, 1  ;;  %v1813_v36 = vadd.f32 %v9133_v29, %v1781_v24 }
 0x193   : > { %8006 = vmatpush3.msk.msra.mxu1 %vm2177_vm2, %v10439_v37  ;;  %8007 = vmatprep.mubr.msk.f32.mxu1 %vm8414_vm3, %v10400_v11  ;;  %v2089_v31 = vrot.slane %v2063_v55, 1  ;;  %v1811_v35 = vadd.f32 %v9133_v29, %v1779_v17  ;;  %v2116_v7 = vrot.slane %v9757_v52, %v9230_v50  ;;  %v2126_v22 = vrot.slane %v9757_v52, %v9241_v4 }
 0x194   : > { %7918 = vmatmul.mubr.msk.f32.vlgmr.msra.gmra.mrb[18].mxu0 %vm2174_vm7, %v2480_v34  ;;  %8015 = vmatprep.subr.mxu1 %v10400_v11  ;;  %v2067_v48 = vmax.f32 %v2062_v1, %v2065_v47  ;;  %v10441_v34 = vld [vmem:[#allocation18_spill] sm:$0xff]  ;;  %v2131_v25 = vrot.slane %v9757_v52, %v9248_v13 }
 0x195   : > { %7921 = vmatpush3.msk.msra.mxu0 %vm2177_vm2, %v10440_v15  ;;  %7922 = vmatprep.mubr.msk.f32.mxu0 %vm8414_vm3, %v10400_v11  ;;  %v2091_v32 = vmax.f32 %v2063_v55, %v2089_v31  ;;  %v2108_v41 = vmax.f32 %v1811_v35, %v1813_v36  ;;  %v2117_v51 = vsel %vm1822_vm4, %v2116_v7, 0.0 }
 0x196   : > { %8008 = vmatmul.mubr.msk.f32.vlgmr.msra.gmra.mrb[4].mxu1 %vm2174_vm7, %v9750_v60  ;;  %7925 = vmatprep.subr.mxu0 %v10400_v11  ;;  %v2071_v23 = vrot.slane %v2067_v48, %v9230_v50  ;;  %v2076_v2 = vrot.slane %v2067_v48, %v9237_v3  ;;  %v2081_v18 = vrot.slane %v2067_v48, %v9241_v4 }
 0x197   : > { %8016 = vmatpush3.msk.msra.mxu1 %vm2177_vm2, %v10441_v34  ;;  %8017 = vmatprep.mubr.msk.f32.mxu1 %vm8414_vm3, %v10400_v11  ;;  %v2086_v16 = vrot.slane %v2067_v48, %v9248_v13  ;;  %v2095_v27 = vrot.slane %v2091_v32, %v9230_v50  ;;  %v2100_v20 = vrot.slane %v2091_v32, %v9237_v3  ;;  %v2134_v38 = vrot.slane %v2108_v41, 1 }
 0x198   : > { %7923 = vmatmul.mubr.msk.f32.vlgmr.msra.gmra.mrb[20].mxu0 %vm2174_vm7, %v9551_v5  ;;  %8025 = vmatprep.subr.mxu1 %v10400_v11  ;;  %v2072_v49 = vsel %vm1822_vm4, %v2071_v23, 0.0  ;;  %v2121_v5 = vrot.slane %v9757_v52, %v9237_v3  ;;  %v2105_v42 = vrot.slane %v2091_v32, %v9241_v4 }
 0x199   : > { %7926 = vmatpush3.msk.msra.mxu0 %vm2177_vm2, %v10441_v34  ;;  %7927 = vmatprep.mubr.msk.f32.mxu0 %vm8414_vm3, %v10400_v11  ;;  %v2077_v40 = vsel %vm1830_vm5, %v2076_v2, %v2072_v49  ;;  %v2136_v28 = vmax.f32 %v2108_v41, %v2134_v38 }
 0x19a   : > { %8018 = vmatmul.mubr.msk.f32.vlgmr.msra.gmra.mrb[6].mxu1 %vm2174_vm7, %v9690_v6  ;;  %7930 = vmatprep.subr.mxu0 %v10400_v11  ;;  %v2082_v29 = vsel %vm1838_vm6, %v2081_v18, %v2077_v40  ;;  %v2122_v19 = vsel %vm1830_vm5, %v2121_v5, %v2117_v51  ;;  %v10045_v18 = vld [vmem:[%s10357_s4] ss:$0 sm:$0xff] }
 0x19b   : > { %8026 = vmatpush3.msk.msra.mxu1 %vm2177_vm2, %v9546_v57  ;;  %8027 = vmatprep.mubr.msk.f32.mxu1 %vm8414_vm3, %v10400_v11  ;;  %v2087_v30 = vsel %vm1846_vm8, %v2086_v16, %v2082_v29  ;;  %v2127_v56 = vsel %vm1838_vm6, %v2126_v22, %v2122_v19  ;;  %v2140_v12 = vrot.slane %v2136_v28, %v9230_v50  ;;  %v7672_v22 = vld [vmem:[%s10358_s5 + $0x8] sm:$0xff] }
 0x19c   : > { %7928 = vmatmul.mubr.msk.f32.vlgmr.msra.gmra.mrb[22].mxu0 %vm2174_vm7, %v2557_v54  ;;  %8035 = vmatprep.subr.mxu1 %v10400_v11  ;;  %v2096_v58 = vsel %vm1858_vm9, %v2095_v27, %v2087_v30  ;;  %v2132_v61 = vsel %vm1846_vm8, %v2131_v25, %v2127_v56  ;;  %v2145_v13 = vrot.slane %v2136_v28, %v9237_v3  ;;  %v10053_v30 = vld [vmem:[%s10357_s4 + $0x1] ss:$0 sm:$0xff] }
 0x19d   : > { %7931 = vmatpush3.msk.msra.mxu0 %vm2177_vm2, %v10442_v0  ;;  %7932 = vmatprep.mubr.msk.f32.mxu0 %vm8414_vm3, %v10400_v11  ;;  %v2101_v54 = vsel %vm1866_vm10, %v2100_v20, %v2096_v58  ;;  %v2141_v50 = vsel %vm1858_vm9, %v2140_v12, %v2132_v61  ;;  %v2150_v3 = vrot.slane %v2136_v28, %v9241_v4  ;;  %v10058_v58 = vld [vmem:[%s10357_s4 + $0x2] ss:$0 sm:$0xff] }
 0x19e   : > { %8028 = vmatmul.mubr.msk.f32.vlgmr.msra.gmra.mrb[8].mxu1 %vm2174_vm7, %v9728_v62  ;;  %7935 = vmatprep.subr.mxu0 %v10400_v11  ;;  %v9827_v45 = vsel %vm1874_vm11, %v2105_v42, %v2101_v54  ;;  %v2146_v43 = vsel %vm1866_vm10, %v2145_v13, %v2141_v50 }
 0x19f   : > { %8036 = vmatpush3.msk.msra.mxu1 %vm2177_vm2, %v9606_v21  ;;  %8037 = vmatprep.mubr.msk.f32.mxu1 %vm8414_vm3, %v10400_v11  ;;  %v4753_v44 = vrot.slane %v9827_v45, 2  ;;  %v9908_v37 = vsel %vm1874_vm11, %v2150_v3, %v2146_v43 }
 0x1a0   : > { %7933 = vmatmul.mubr.msk.f32.vlgmr.msra.gmra.mrb[24].mxu0 %vm2174_vm7, %v9615_v59  ;;  %8045 = vmatprep.subr.mxu1 %v10400_v11  ;;  %v5329_v4 = vrot.slane %v9908_v37, 1 }
 0x1a1   : > { %7936 = vmatpush3.msk.msra.mxu0 %vm2177_vm2, %v9546_v57  ;;  %7937 = vmatprep.mubr.msk.f32.mxu0 %vm8414_vm3, %v10400_v11 }
 0x1a2   : > { %8038 = vmatmul.mubr.msk.f32.vlgmr.msra.gmra.mrb[10].mxu1 %vm2174_vm7, %v9827_v45  ;;  %7940 = vmatprep.subr.mxu0 %v10400_v11 }
 0x1a3   : > { %8046 = vmatpush3.msk.msra.mxu1 %vm2177_vm2, %v9676_v8  ;;  %8047 = vmatprep.mubr.msk.f32.mxu1 %vm8414_vm3, %v10400_v11 }
 0x1a4   : > { %7938 = vmatmul.mubr.msk.f32.vlgmr.msra.gmra.mrb[26].mxu0 %vm2174_vm7, %v9647_v53  ;;  %8055 = vmatprep.subr.mxu1 %v10400_v11 }
 0x1a5   : > { %7941 = vmatpush3.msk.msra.mxu0 %vm2177_vm2, %v10433_v26  ;;  %7942 = vmatprep.mubr.msk.f32.mxu0 %vm8414_vm3, %v10400_v11 }
 0x1a6   : > { %8048 = vmatmul.mubr.msk.f32.vlgmr.msra.gmra.mrb[12].mxu1 %vm2174_vm7, %v4753_v44  ;;  %7945 = vmatprep.subr.mxu0 %v10400_v11 }
 0x1a7   : > { %8056 = vmatpush3.msk.msra.mxu1 %vm2177_vm2, %v10440_v15  ;;  %8057 = vmatprep.mubr.msk.f32.mxu1 %vm8414_vm3, %v10400_v11 }
 0x1a8   : > { %7943 = vmatmul.mubr.msk.f32.vlgmr.msra.gmra.mrb[28].mxu0 %vm2174_vm7, %v9710_v33  ;;  %8065 = vmatprep.subr.mxu1 %v10400_v11 }
 0x1a9   : > { %7946 = vmatpush3.msk.msra.mxu0 %vm2177_vm2, %v9606_v21  ;;  %7947 = vmatprep.mubr.msk.f32.mxu0 %vm8414_vm3, %v10400_v11 }
 0x1aa   : > { %8058 = vmatmul.mubr.msk.f32.vlgmr.msra.gmra.mrb[14].mxu1 %vm2174_vm7, %v9721_v9  ;;  %7950 = vmatprep.subr.mxu0 %v10400_v11 }
 0x1ab   : > { %8066 = vmatpush3.msk.msra.mxu1 %vm2177_vm2, %v10442_v0  ;;  %8067 = vmatprep.mubr.msk.f32.mxu1 %vm8414_vm3, %v10400_v11 }
 0x1ac   : > { %7948 = vmatmul.mubr.msk.f32.vlgmr.msra.gmra.mrb[30].mxu0 %vm2174_vm7, %v9684_v14  ;;  %8075 = vmatprep.subr.mxu1 %v10400_v11 }
 0x1ad   : > { %7951 = vmatpush3.msk.msra.mxu0 %vm2177_vm2, %v9642_v63  ;;  %7952 = vmatprep.mubr.msk.f32.mxu0 %vm8414_vm3, %v10400_v11 }
 0x1ae   : > { %8068 = vmatmul.mubr.msk.f32.vlgmr.msra.gmra.mrb[16].mxu1 %vm2174_vm7, %v9827_v45  ;;  %7955 = vmatprep.subr.mxu0 %v10400_v11 }
 0x1af   : > { %8076 = vmatpush3.msk.msra.mxu1 %vm2177_vm2, %v10433_v26  ;;  %8077 = vmatprep.mubr.msk.f32.mxu1 %vm8414_vm3, %v10400_v11  ;;  %v4103_v26 = vrot.slane %v9721_v9, 2 }
 0x1b0   : > { %7953 = vmatmul.mubr.msk.f32.vlgmr.msra.gmra.mrb[32].mxu0 %vm2174_vm7, %v9750_v60  ;;  %8085 = vmatprep.subr.mxu1 %v10400_v11 }
 0x1b1   : > { %7956 = vmatpush3.msk.msra.mxu0 %vm2177_vm2, %v9676_v8  ;;  %7957 = vmatprep.mubr.msk.f32.mxu0 %vm8414_vm3, %v10400_v11 }
 0x1b2   : > { %8078 = vmatmul.mubr.msk.f32.vlgmr.msra.gmra.mrb[18].mxu1 %vm2174_vm7, %v4753_v44  ;;  %7960 = vmatprep.subr.mxu0 %v10400_v11 }
 0x1b3   : > { %8086 = vmatpush3.msk.msra.mxu1 %vm2177_vm2, %v9642_v63  ;;  %8087 = vmatprep.mubr.msk.f32.mxu1 %vm8414_vm3, %v10400_v11 }
 0x1b4   : > { %7958 = vmatmul.mubr.msk.f32.vlgmr.msra.gmra.mrb[34].mxu0 %vm2174_vm7, %v9690_v6  ;;  %8095 = vmatprep.subr.mxu1 %v10400_v11 }
 0x1b5   : > { %7961 = vmatpush3.msk.msra.mxu0 %vm2177_vm2, %v8346_v10  ;;  %7962 = vmatprep.mubr.msk.f32.mxu0 %vm8414_vm3, %v10400_v11 }
 0x1b6   : > { %8088 = vmatmul.mubr.msk.f32.vlgmr.msra.gmra.mrb[20].mxu1 %vm2174_vm7, %v5329_v4  ;;  %7965 = vmatprep.subr.mxu0 %v10400_v11  ;;  %v7674_v4 = vld [vmem:[%s10358_s5 + $0x10] sm:$0xff] }
 0x1b7   : > { %8097 = vmatprep.mubr.msk.f32.mxu1 %vm8414_vm3, %v10400_v11 }
 0x1b8   : > { %7963 = vmatmul.mubr.msk.f32.vlgmr.msra.gmra.mrb[36].mxu0 %vm2174_vm7, %v9647_v53  ;;  %v4679_v53 = vrot.slane %v9827_v45, 1 }
 0x1b9   : > { %7966 = vmatpush3.msk.msra.mxu0 %vm2177_vm2, %v10440_v15  ;;  %7967 = vmatprep.mubr.msk.f32.mxu0 %vm8414_vm3, %v10400_v11 }
 0x1ba   : > { %7970 = vmatprep.subr.mxu0 %v10400_v11 }
 0x1bc   : > { %7968 = vmatmul.mubr.msk.f32.vlgmr.msra.gmra.mrb[38].mxu0 %vm2174_vm7, %v9615_v59  ;;  %v8347_v59 = vld [vmem:[%s10356_s3 + $0x14] sm:$0xf] }
 0x1bd   : > { %7971 = vmatpush3.msk.msra.mxu0 %vm2177_vm2, %v10441_v34  ;;  %7972 = vmatprep.mubr.msk.f32.mxu0 %vm8414_vm3, %v10400_v11 }
 0x1be   : > { %7975 = vmatprep.subr.mxu0 %v10400_v11 }
 0x1c0   : > { %7973 = vmatmul.mubr.msk.f32.vlgmr.msra.gmra.mrb[40].mxu0 %vm2174_vm7, %v9710_v33 }
 0x1c1   : > { %7976 = vmatpush3.msk.msra.mxu0 %vm2177_vm2, %v10442_v0  ;;  %7977 = vmatprep.mubr.msk.f32.mxu0 %vm8414_vm3, %v10400_v11 }
 0x1c2   : > { %7980 = vmatprep.subr.mxu0 %v10400_v11 }
 0x1c4   : > { %7978 = vmatmul.mubr.msk.f32.vlgmr.msra.gmra.mrb[42].mxu0 %vm2174_vm7, %v9684_v14 }
 0x1c5   : > { %7981 = vmatpush3.msk.msra.mxu0 %vm2177_vm2, %v9546_v57  ;;  %7982 = vmatprep.mubr.msk.f32.mxu0 %vm8414_vm3, %v10400_v11 }
 0x1c6   : > { %7990 = vmatprep.subr.mxu0 %v10400_v11 }
 0x1c8   : > { %7983 = vmatmul.mubr.msk.f32.vlgmr.msra.gmra.mrb[44].mxu0 %vm2174_vm7, %v9750_v60 }
 0x1c9   : > { %7991 = vmatpush3.msk.msra.mxu0 %vm2177_vm2, %v9606_v21  ;;  %7992 = vmatprep.mubr.msk.f32.mxu0 %vm8414_vm3, %v10400_v11 }
 0x1ca   : > { %8000 = vmatprep.subr.mxu0 %v10400_v11 }
 0x1cc   : > { %7993 = vmatmul.mubr.msk.f32.vlgmr.msra.gmra.mrb[46].mxu0 %vm2174_vm7, %v9721_v9 }
 0x1cd   : > { %8001 = vmatpush3.msk.msra.mxu0 %vm2177_vm2, %v9676_v8  ;;  %8002 = vmatprep.mubr.msk.f32.mxu0 %vm8414_vm3, %v10400_v11 }
 0x1ce   : > { %8010 = vmatprep.subr.mxu0 %v10400_v11 }
 0x1d0   : > { %8003 = vmatmul.mubr.msk.f32.vlgmr.msra.gmra.mrb[48].mxu0 %vm2174_vm7, %v4103_v26 }
 0x1d1   : > { %8011 = vmatpush3.msk.msra.mxu0 %vm2177_vm2, %v10440_v15  ;;  %8012 = vmatprep.mubr.msk.f32.mxu0 %vm8414_vm3, %v10400_v11 }
 0x1d2   : > { %8020 = vmatprep.subr.mxu0 %v10400_v11 }
 0x1d4   : > { %8013 = vmatmul.mubr.msk.f32.vlgmr.msra.gmra.mrb[50].mxu0 %vm2174_vm7, %v9684_v14 }
 0x1d5   : > { %8021 = vmatpush3.msk.msra.mxu0 %vm2177_vm2, %v10442_v0  ;;  %8022 = vmatprep.mubr.msk.f32.mxu0 %vm8414_vm3, %v10400_v11 }
 0x1d6   : > { %8030 = vmatprep.subr.mxu0 %v10400_v11 }
 0x1d8   : > { %8023 = vmatmul.mubr.msk.f32.vlgmr.msra.gmra.mrb[52].mxu0 %vm2174_vm7, %v9721_v9 }
 0x1d9   : > { %8031 = vmatpush3.msk.msra.mxu0 %vm2177_vm2, %v8347_v59  ;;  %8032 = vmatprep.mubr.msk.f32.mxu0 %vm8414_vm3, %v10400_v11 }
 0x1da   : > { %8040 = vmatprep.subr.mxu0 %v10400_v11 }
 0x1dc   : > { %8033 = vmatmul.mubr.msk.f32.vlgmr.msra.gmra.mrb[54].mxu0 %vm2174_vm7, %v4103_v26 }
 0x1dd   : > { %8041 = vmatpush3.msk.msra.mxu0 %vm2177_vm2, %v9642_v63  ;;  %8042 = vmatprep.mubr.msk.f32.mxu0 %vm8414_vm3, %v10400_v11  ;;  %v5482_v63 = vld [vmem:[%s10358_s5] sm:$0xff] }
 0x1de   : > { %8050 = vmatprep.subr.mxu0 %v10400_v11  ;;  %8096 = vmatpush3.msra.mxu1 %v5482_v63 }
 0x1df   : > { %8100 = vmatprep.subr.mxu1 %v10400_v11 }
 0x1e0   : > { %8043 = vmatmul.mubr.msk.f32.vlgmr.msra.gmra.mrb[56].mxu0 %vm2174_vm7, %v4679_v53 }
 0x1e1   : > { %8051 = vmatpush3.msk.msra.mxu0 %vm2177_vm2, %v8346_v10  ;;  %8052 = vmatprep.mubr.msk.f32.mxu0 %vm8414_vm3, %v10400_v11 }
 0x1e2   : > { %8060 = vmatprep.subr.mxu0 %v10400_v11 }
 0x1e4   : > { %8053 = vmatmul.mubr.msk.f32.vlgmr.msra.gmra.mrb[58].mxu0 %vm2174_vm7, %v9728_v62 }
 0x1e5   : > { %8061 = vmatpush3.msk.msra.mxu0 %vm2177_vm2, %v10441_v34  ;;  %8062 = vmatprep.mubr.msk.f32.mxu0 %vm8414_vm3, %v10400_v11 }
 0x1e6   : > { %8070 = vmatprep.subr.mxu0 %v10400_v11 }
 0x1e8   : > { %8063 = vmatmul.mubr.msk.f32.vlgmr.msra.gmra.mrb[60].mxu0 %vm2174_vm7, %v4103_v26 }
 0x1e9   : > { %8071 = vmatpush3.msk.msra.mxu0 %vm2177_vm2, %v9546_v57  ;;  %8072 = vmatprep.mubr.msk.f32.mxu0 %vm8414_vm3, %v10400_v11  ;;  %v5403_v57 = vrot.slane %v9908_v37, 2 }
 0x1ea   : > { %8080 = vmatprep.subr.mxu0 %v10400_v11 }
 0x1ec   : > { %8073 = vmatmul.mubr.msk.f32.vlgmr.msra.gmra.mrb[62].mxu0 %vm2174_vm7, %v4679_v53 }
 0x1ed   : > { %8081 = vmatpush3.msk.msra.mxu0 %vm2177_vm2, %v9606_v21  ;;  %8082 = vmatprep.mubr.msk.f32.mxu0 %vm8414_vm3, %v10400_v11 }
 0x1ee   : > { %8090 = vmatprep.subr.mxu0 %v10400_v11 }
 0x1f0   : > { %8083 = vmatmul.mubr.msk.f32.vlgmr.msra.gmra.mrb[64].mxu0 %vm2174_vm7, %v9908_v37 }
 0x1f1   : > { %8091 = vmatpush3.msk.msra.mxu0 %vm2177_vm2, %v9676_v8  ;;  %8092 = vmatprep.mubr.msk.f32.mxu0 %vm8414_vm3, %v10400_v11 }
 0x1f4   : > { %8093 = vmatmul.mubr.msk.f32.vlgmr.msra.gmra.mrb[66].mxu0 %vm2174_vm7, %v5403_v57 }
 0x1f5   : > { %8228 = vmatprep.mubr.msk.f32.mxu0 %vm8414_vm3, %v10400_v11 }
 0x221   : > { %v2247_v21 = vpop.f32.mrb[0].mxu0 }
 0x222   : > { %v7874_v14 = vpop.f32.mrb[1].mxu0 }
 0x225   : > { %v2322_v6 = vpop.f32.mrb[2].mxu0 }
 0x226   : > { %v2323_v33 = vadd.f32 %v2322_v6, %v2247_v21  ;;  %v7879_v9 = vpop.f32.mrb[3].mxu0 }
 0x229   : > { %v2398_v62 = vpop.f32.mrb[4].mxu0 }
 0x22a   : > { %v2402_v1 = vadd.f32 %v2398_v62, %v2323_v33  ;;  %v7884_v39 = vpop.f32.mrb[5].mxu0  ;;  %v7676_v62 = vld [vmem:[%s10358_s5 + $0x18] sm:$0xff] }
 0x24e   : > { %v2475_v46 = vpop.f32.mrb[6].mxu0 }
 0x24f   : > { %v2479_v8 = vadd.f32 %v2475_v46, %v2402_v1  ;;  %v7889_v55 = vpop.f32.mrb[7].mxu0 }
 0x252   : > { %v2552_v47 = vpop.f32.mrb[8].mxu0 }
 0x253   : > { %v2556_v60 = vadd.f32 %v2552_v47, %v2479_v8  ;;  %v7894_v31 = vpop.f32.mrb[9].mxu0 }
 0x256   : > { %v2629_v24 = vpop.f32.mrb[10].mxu0 }
 0x257   : > { %v2633_v15 = vadd.f32 %v2629_v24, %v2556_v60  ;;  %v7899_v48 = vpop.f32.mrb[11].mxu0 }
 0x25a   : > { %v2706_v17 = vpop.f32.mrb[12].mxu0 }
 0x25b   : > { %v2710_v52 = vadd.f32 %v2706_v17, %v2633_v15  ;;  %v7904_v34 = vpop.f32.mrb[13].mxu0  ;;  %v7678_v17 = vld [vmem:[%s10358_s5 + $0x20] sm:$0xff] }
 0x25e   : > { %v2783_v23 = vpop.f32.mrb[14].mxu0 }
 0x25f   : > { %v2787_v2 = vadd.f32 %v2783_v23, %v2710_v52  ;;  %v7909_v32 = vpop.f32.mrb[15].mxu0 }
 0x260   : > { %v10040_v36 = vpop.f32.mrb[0].mxu1 }
 0x261   : > { %v7989_v49 = vpop.f32.mrb[1].mxu1 }
 0x262   : > { %v2860_v35 = vpop.f32.mrb[16].mxu0 }
 0x263   : > { %v2864_v40 = vadd.f32 %v2860_v35, %v2787_v2  ;;  %v7914_v16 = vpop.f32.mrb[17].mxu0 }
 0x265   : > { %v10047_v7 = vpop.f32.mrb[2].mxu1  ;;  %v2869_v29 = vadd.f32 %v10045_v18, %v2864_v40 }
 0x266   : > { %v7999_v27 = vpop.f32.mrb[3].mxu1 }
 0x267   : > { %v2947_v20 = vpop.f32.mrb[18].mxu0  ;;  %v2870_v41 = vmax.f32 %v2869_v29, 0.0 }
 0x268   : > { %v7919_v0 = vpop.f32.mrb[19].mxu0 }
 0x269   : > { %v10060_v5 = vpop.f32.mrb[4].mxu1  ;;  %v2875_v54 = vmul.f32 %v10053_v30, %v2870_v41  ;;  %v7680_v41 = vld [vmem:[%s10358_s5 + $0x28] sm:$0xff] }
 0x26a   : > { %v8009_v42 = vpop.f32.mrb[5].mxu1 }
 0x26b   : > { %v3017_v51 = vpop.f32.mrb[20].mxu0  ;;  %v10064_v38 = vadd.f32 %v10058_v58, %v2875_v54 }
 0x26c   : > { %v3018_v45 = vadd.f32 %v3017_v51, %v2947_v20  ;;  %v7924_v19 = vpop.f32.mrb[21].mxu0 }
 0x26d   : > { %v10069_v44 = vpop.f32.mrb[6].mxu1  ;;  %8098 = vmatmul.mubr.msk.f32.vlgmr.msra.gmra.mrb[22].mxu1 %vm5483_vm12, %v10064_v38  ;;  %v5560_v37 = vrot.slane %v10064_v38, 1  ;;  %v5636_v9 = vrot.slane %v10064_v38, 2  ;;  %v5712_v48 = vrot.slane %v10064_v38, 3  ;;  %v5788_v20 = vrot.slane %v10064_v38, 4 }
 0x26e   : > { %v8019_v28 = vpop.f32.mrb[7].mxu1  ;;  %8101 = vmatpush3.msra.mxu1 %v7672_v22  ;;  %8102 = vmatprep.mubr.msk.f32.mxu1 %vm8414_vm3, %v10400_v11 }
 0x26f   : > { %v3087_v56 = vpop.f32.mrb[22].mxu0  ;;  %8105 = vmatprep.subr.mxu1 %v10400_v11  ;;  %v7682_v28 = vld [vmem:[%s10358_s5 + $0x30] sm:$0xff] }
 0x270   : > { %v3091_v25 = vadd.f32 %v3087_v56, %v3018_v45  ;;  %v7929_v61 = vpop.f32.mrb[23].mxu0 }
 0x271   : > { %v10076_v12 = vpop.f32.mrb[8].mxu1 }
 0x272   : > { %v8029_v50 = vpop.f32.mrb[9].mxu1 }
 0x273   : > { %v3158_v13 = vpop.f32.mrb[24].mxu0 }
 0x274   : > { %v3162_v43 = vadd.f32 %v3158_v13, %v3091_v25  ;;  %v7934_v3 = vpop.f32.mrb[25].mxu0 }
 0x275   : > { %v10082_v10 = vpop.f32.mrb[10].mxu1  ;;  %8103 = vmatmul.mubr.msk.f32.vlgmr.msra.gmra.mrb[22].mxu1 %vm5483_vm12, %v5560_v37  ;;  %v7684_v37 = vld [vmem:[%s10358_s5 + $0x38] sm:$0xff] }
 0x276   : > { %v8039_v26 = vpop.f32.mrb[11].mxu1  ;;  %8106 = vmatpush3.msra.mxu1 %v7674_v4  ;;  %8107 = vmatprep.mubr.msk.f32.mxu1 %vm8414_vm3, %v10400_v11 }
 0x277   : > { %v3229_v59 = vpop.f32.mrb[26].mxu0  ;;  %8110 = vmatprep.subr.mxu1 %v10400_v11 }
 0x278   : > { %v3233_v53 = vadd.f32 %v3229_v59, %v3162_v43  ;;  %v7939_v63 = vpop.f32.mrb[27].mxu0 }
 0x279   : > { %v10088_v57 = vpop.f32.mrb[12].mxu1 }
 0x27a   : > { %v8049_v21 = vpop.f32.mrb[13].mxu1 }
 0x27b   : > { %v3300_v14 = vpop.f32.mrb[28].mxu0 }
 0x27c   : > { %v3304_v6 = vadd.f32 %v3300_v14, %v3233_v53  ;;  %v7944_v33 = vpop.f32.mrb[29].mxu0 }
 0x27d   : > { %v10094_v1 = vpop.f32.mrb[14].mxu1  ;;  %8108 = vmatmul.mubr.msk.f32.vlgmr.msra.gmra.mrb[22].mxu1 %vm5483_vm12, %v5636_v9 }
 0x27e   : > { %v8059_v39 = vpop.f32.mrb[15].mxu1  ;;  %8111 = vmatpush3.msra.mxu1 %v7676_v62  ;;  %8112 = vmatprep.mubr.msk.f32.mxu1 %vm8414_vm3, %v10400_v11 }
 0x27f   : > { %v3374_v46 = vpop.f32.mrb[30].mxu0  ;;  %8115 = vmatprep.subr.mxu1 %v10400_v11 }
 0x280   : > { %v3378_v8 = vadd.f32 %v3374_v46, %v3304_v6  ;;  %v7949_v55 = vpop.f32.mrb[31].mxu0 }
 0x281   : > { %v10100_v47 = vpop.f32.mrb[16].mxu1 }
 0x282   : > { %v8069_v60 = vpop.f32.mrb[17].mxu1 }
 0x283   : > { %v3448_v31 = vpop.f32.mrb[32].mxu0 }
 0x284   : > { %v3452_v24 = vadd.f32 %v3448_v31, %v3378_v8  ;;  %v7954_v15 = vpop.f32.mrb[33].mxu0  ;;  %v7688_v31 = vld [vmem:[%s10358_s5 + $0x48] sm:$0xff] }
 0x285   : > { %v10106_v52 = vpop.f32.mrb[18].mxu1  ;;  %8113 = vmatmul.mubr.msk.f32.vlgmr.msra.gmra.mrb[22].mxu1 %vm5483_vm12, %v5712_v48 }
 0x286   : > { %v8079_v34 = vpop.f32.mrb[19].mxu1  ;;  %8116 = vmatpush3.msra.mxu1 %v7678_v17  ;;  %8117 = vmatprep.mubr.msk.f32.mxu1 %vm8414_vm3, %v10400_v11 }
 0x287   : > { %v3522_v23 = vpop.f32.mrb[34].mxu0  ;;  %8120 = vmatprep.subr.mxu1 %v10400_v11 }
 0x288   : > { %v3526_v2 = vadd.f32 %v3522_v23, %v3452_v24  ;;  %v7959_v32 = vpop.f32.mrb[35].mxu0 }
 0x289   : > { %v10112_v49 = vpop.f32.mrb[20].mxu1 }
 0x28a   : > { %v3527_v35 = vadd.f32 %v10045_v18, %v3526_v2  ;;  %v8089_v40 = vpop.f32.mrb[21].mxu1 }
 0x28b   : > { %v3597_v16 = vpop.f32.mrb[36].mxu0 }
 0x28c   : > { %v3528_v29 = vmax.f32 %v3527_v35, 0.0  ;;  %v7964_v27 = vpop.f32.mrb[37].mxu0 }
 0x28d   : > { %8118 = vmatmul.mubr.msk.f32.vlgmr.msra.gmra.mrb[22].mxu1 %vm5483_vm12, %v5788_v20  ;;  %v7690_v27 = vld [vmem:[%s10358_s5 + $0x50] sm:$0xff] }
 0x28e   : > { %8121 = vmatpush3.msra.mxu1 %v7680_v41  ;;  %8122 = vmatprep.mubr.msk.f32.mxu1 %vm8414_vm3, %v10400_v11  ;;  %v3529_v54 = vmul.f32 %v10053_v30, %v3528_v29 }
 0x28f   : > { %v3667_v0 = vpop.f32.mrb[38].mxu0  ;;  %8125 = vmatprep.subr.mxu1 %v10400_v11 }
 0x290   : > { %v3668_v42 = vadd.f32 %v3667_v0, %v3597_v16  ;;  %v7969_v51 = vpop.f32.mrb[39].mxu0  ;;  %v10125_v38 = vadd.f32 %v10058_v58, %v3529_v54 }
 0x292   : > { %v5940_v3 = vrot.slane %v10125_v38, 1  ;;  %v6016_v33 = vrot.slane %v10125_v38, 2  ;;  %v6092_v60 = vrot.slane %v10125_v38, 3  ;;  %v6168_v29 = vrot.slane %v10125_v38, 4 }
 0x293   : > { %v3737_v45 = vpop.f32.mrb[40].mxu0 }
 0x294   : > { %v3741_v19 = vadd.f32 %v3737_v45, %v3668_v42  ;;  %v7974_v22 = vpop.f32.mrb[41].mxu0 }
 0x295   : > { %8123 = vmatmul.mubr.msk.f32.vlgmr.msra.gmra.mrb[22].mxu1 %vm5483_vm12, %v10125_v38 }
 0x296   : > { %8126 = vmatpush3.msra.mxu1 %v7682_v28  ;;  %8127 = vmatprep.mubr.msk.f32.mxu1 %vm8414_vm3, %v10400_v11 }
 0x297   : > { %v3808_v56 = vpop.f32.mrb[42].mxu0  ;;  %8130 = vmatprep.subr.mxu1 %v10400_v11 }
 0x298   : > { %v3812_v25 = vadd.f32 %v3808_v56, %v3741_v19  ;;  %v7979_v61 = vpop.f32.mrb[43].mxu0 }
 0x29b   : > { %v3879_v50 = vpop.f32.mrb[44].mxu0 }
 0x29c   : > { %v3883_v13 = vadd.f32 %v3879_v50, %v3812_v25  ;;  %v7984_v43 = vpop.f32.mrb[45].mxu0 }
 0x29d   : > { %8128 = vmatmul.mubr.msk.f32.vlgmr.msra.gmra.mrb[22].mxu1 %vm5483_vm12, %v5940_v3  ;;  %v7694_v43 = vld [vmem:[%s10358_s5 + $0x60] sm:$0xff] }
 0x29e   : > { %v3954_v4 = vadd.f32 %v10040_v36, %v3883_v13  ;;  %8131 = vmatpush3.msra.mxu1 %v7684_v37  ;;  %8132 = vmatprep.mubr.msk.f32.mxu1 %vm8414_vm3, %v10400_v11  ;;  %v7686_v36 = vld [vmem:[%s10358_s5 + $0x40] sm:$0xff] }
 0x29f   : > { %v4024_v26 = vpop.f32.mrb[46].mxu0  ;;  %8135 = vmatprep.subr.mxu1 %v10400_v11 }
 0x2a0   : > { %v4028_v59 = vadd.f32 %v4024_v26, %v3954_v4  ;;  %v7994_v53 = vpop.f32.mrb[47].mxu0  ;;  %v7696_v26 = vld [vmem:[%s10358_s5 + $0x68] sm:$0xff] }
 0x2a2   : > { %v4102_v63 = vadd.f32 %v10047_v7, %v4028_v59  ;;  %v7698_v59 = vld [vmem:[%s10358_s5 + $0x70] sm:$0xff] }
 0x2a3   : > { %v4172_v21 = vpop.f32.mrb[48].mxu0 }
 0x2a4   : > { %v4176_v14 = vadd.f32 %v4172_v21, %v4102_v63  ;;  %v8004_v6 = vpop.f32.mrb[49].mxu0 }
 0x2a5   : > { %8133 = vmatmul.mubr.msk.f32.vlgmr.msra.gmra.mrb[22].mxu1 %vm5483_vm12, %v6016_v33 }
 0x2a6   : > { %8136 = vmatpush3.msra.mxu1 %v7686_v36  ;;  %8137 = vmatprep.mubr.msk.f32.mxu1 %vm8414_vm3, %v10400_v11  ;;  %v4177_v17 = vadd.f32 %v10045_v18, %v4176_v14  ;;  %v7700_v14 = vld [vmem:[%s10358_s5 + $0x78] sm:$0xff]  ;;  %v7702_v36 = vld [vmem:[%s10358_s5 + $0x80] sm:$0xff] }
 0x2a7   : > { %v4317_v9 = vpop.f32.mrb[50].mxu0  ;;  %8140 = vmatprep.subr.mxu1 %v10400_v11 }
 0x2a8   : > { %v4318_v62 = vadd.f32 %v4317_v9, %v10060_v5  ;;  %v8014_v39 = vpop.f32.mrb[51].mxu0  ;;  %v7383_v5 = vld [vmem:[%s10360_s7] sm:$0xff]  ;;  %v4178_v35 = vmax.f32 %v4177_v17, 0.0 }
 0x2aa   : > { %v4391_v7 = vadd.f32 %v10069_v44, %v4318_v62  ;;  %v7384_v44 = vld [vmem:[%s10360_s7 + $0x8] sm:$0xff] }
 0x2ab   : > { %v4458_v46 = vpop.f32.mrb[52].mxu0  ;;  %v8232_v48 = vpack.c.bf16 %v7384_v44, %v7383_v5  ;;  %v7704_v62 = vld [vmem:[%s10358_s5 + $0x88] sm:$0xff] }
 0x2ac   : > { %v4462_v8 = vadd.f32 %v4458_v46, %v4391_v7  ;;  %v8024_v55 = vpop.f32.mrb[53].mxu0  ;;  %v7706_v7 = vld [vmem:[%s10358_s5 + $0x90] sm:$0xff]  ;;  %v7712_v44 = vld [vmem:[%s10358_s5 + $0xa8] sm:$0xff] }
 0x2ad   : > { %8138 = vmatmul.mubr.msk.f32.vlgmr.msra.gmra.mrb[22].mxu1 %vm5483_vm12, %v6092_v60 }
 0x2ae   : > { %v4533_v24 = vadd.f32 %v10076_v12, %v4462_v8  ;;  %8141 = vmatpush3.msra.mxu1 %v7688_v31  ;;  %8142 = vmatprep.mubr.msk.f32.mxu1 %vm8414_vm3, %v10400_v11  ;;  %v8415_v12 = vmov 0.0|0.0   ;;  %v7708_v8 = vld [vmem:[%s10358_s5 + $0x98] sm:$0xff] }
 0x2af   : > { %v4600_v15 = vpop.f32.mrb[54].mxu0  ;;  %8145 = vmatprep.subr.mxu1 %v10400_v11  ;;  %8231 = vmatprep.subr.bf16.mxu0 %v8415_v12 }
 0x2b0   : > { %v4604_v34 = vadd.f32 %v4600_v15, %v4533_v24  ;;  %v8034_v23 = vpop.f32.mrb[55].mxu0  ;;  %8233 = vmatpush3.bf16.msra.mxu0 %v8232_v48  ;;  %v7710_v24 = vld [vmem:[%s10358_s5 + $0xa0] sm:$0xff]  ;;  %v7716_v48 = vld [vmem:[%s10358_s5 + $0xb8] sm:$0xff] }
 0x2b1   : > { %8234 = vmatprep.subr.bf16.mxu0 %v8415_v12  ;;  %v7385_v12 = vld [vmem:[%s10360_s7 + $0x10] sm:$0xff] }
 0x2b2   : > { %v4678_v2 = vadd.f32 %v10082_v10, %v4604_v34  ;;  %v4179_v10 = vmul.f32 %v10053_v30, %v4178_v35  ;;  %v7718_v34 = vld [vmem:[%s10358_s5 + $0xc0] sm:$0xff] }
 0x2b3   : > { %v4748_v32 = vpop.f32.mrb[56].mxu0  ;;  %v5481_v35 = vld [vmem:[%s10359_s6] sm:$0x1] }
 0x2b4   : > { %v4752_v40 = vadd.f32 %v4748_v32, %v4678_v2  ;;  %v8044_v16 = vpop.f32.mrb[57].mxu0  ;;  %v4180_v51 = vadd.f32 %v10058_v58, %v4179_v10  ;;  %v7386_v2 = vld [vmem:[%s10360_s7 + $0x18] sm:$0xff] }
 0x2b5   : > { %8143 = vmatmul.mubr.msk.f32.vlgmr.msra.gmra.mrb[22].mxu1 %vm5483_vm12, %v6168_v29  ;;  %v8235_v32 = vpack.c.bf16 %v7386_v2, %v7385_v12 }
 0x2b6   : > { %v4826_v20 = vadd.f32 %v10088_v57, %v4752_v40  ;;  %8146 = vmatpush3.msra.mxu1 %v7690_v27  ;;  %8147 = vmatprep.mubr.msk.f32.mxu1 %vm8414_vm3, %v10400_v11  ;;  %v7692_v57 = vld [vmem:[%s10358_s5 + $0x58] sm:$0xff]  ;;  %v6320_v13 = vrot.slane %v4180_v51, 1  ;;  %v6548_v21 = vrot.slane %v4180_v51, 4  ;;  %v7387_v27 = vld [vmem:[%s10361_s8] sm:$0x1] }
 0x2b7   : > { %v4897_v41 = vpop.f32.mrb[58].mxu0  ;;  %8150 = vmatprep.subr.mxu1 %v10400_v11  ;;  %8236 = vmatpush3.bf16.msra.mxu0 %v8235_v32 }
 0x2b8   : > { %v4968_v0 = vadd.f32 %v10094_v1, %v4897_v41  ;;  %v8054_v54 = vpop.f32.mrb[59].mxu0  ;;  %v4827_v53 = vadd.f32 %v10045_v18, %v4826_v20 }
 0x2ba   : > { %v4828_v63 = vmax.f32 %v4827_v53, 0.0 }
 0x2bb   : > { %v5037_v42 = vpop.f32.mrb[60].mxu0 }
 0x2bc   : > { %v5041_v45 = vadd.f32 %v5037_v42, %v4968_v0  ;;  %v8064_v38 = vpop.f32.mrb[61].mxu0  ;;  %v4829_v6 = vmul.f32 %v10053_v30, %v4828_v63 }
 0x2bd   : > { %8148 = vmatmul.mubr.msk.f32.vlgmr.msra.gmra.mrb[22].mxu1 %vm5483_vm12, %v4180_v51 }
 0x2be   : > { %v5112_v19 = vadd.f32 %v10100_v47, %v5041_v45  ;;  %8151 = vmatpush3.msra.mxu1 %v7692_v57  ;;  %8152 = vmatprep.mubr.msk.f32.mxu1 %vm8414_vm3, %v10400_v11  ;;  %v4830_v33 = vadd.f32 %v10058_v58, %v4829_v6 }
 0x2bf   : > { %v5179_v22 = vpop.f32.mrb[62].mxu0  ;;  %8155 = vmatprep.subr.mxu1 %v10400_v11 }
 0x2c0   : > { %v5183_v1 = vadd.f32 %v5179_v22, %v5112_v19  ;;  %v8074_v28 = vpop.f32.mrb[63].mxu0  ;;  %v6700_v9 = vrot.slane %v4830_v33, 1  ;;  %v6776_v39 = vrot.slane %v4830_v33, 2  ;;  %v6852_v46 = vrot.slane %v4830_v33, 3 }
 0x2c1   : > { %v6928_v31 = vrot.slane %v4830_v33, 4 }
 0x2c2   : > { %v5254_v56 = vadd.f32 %v10106_v52, %v5183_v1  ;;  %v6396_v52 = vrot.slane %v4180_v51, 2 }
 0x2c3   : > { %v5324_v25 = vpop.f32.mrb[64].mxu0 }
 0x2c4   : > { %v5328_v61 = vadd.f32 %v5324_v25, %v5254_v56  ;;  %v8084_v50 = vpop.f32.mrb[65].mxu0 }
 0x2c5   : > { %8153 = vmatmul.mubr.msk.f32.vlgmr.msra.gmra.mrb[22].mxu1 %vm5483_vm12, %v6320_v13 }
 0x2c6   : > { %v5402_v47 = vadd.f32 %v10112_v49, %v5328_v61  ;;  %8156 = vmatpush3.msra.mxu1 %v7694_v43  ;;  %8157 = vmatprep.mubr.msk.f32.mxu1 %vm8414_vm3, %v10400_v11  ;;  %v6472_v49 = vrot.slane %v4180_v51, 3 }
 0x2c7   : > { %v5472_v3 = vpop.f32.mrb[66].mxu0  ;;  %8160 = vmatprep.subr.mxu1 %v10400_v11 }
 0x2c8   : > { %v5476_v37 = vadd.f32 %v5472_v3, %v5402_v47  ;;  %v8094_v4 = vpop.f32.mrb[67].mxu0 }
 0x2ca   : > { %v5477_v55 = vadd.f32 %v10045_v18, %v5476_v37 }
 0x2cc   : > { %v5478_v60 = vmax.f32 %v5477_v55, 0.0 }
 0x2cd   : > { %8158 = vmatmul.mubr.msk.f32.vlgmr.msra.gmra.mrb[22].mxu1 %vm5483_vm12, %v6396_v52 }
 0x2ce   : > { %8161 = vmatpush3.msra.mxu1 %v7696_v26  ;;  %8162 = vmatprep.mubr.msk.f32.mxu1 %vm8414_vm3, %v10400_v11  ;;  %v5479_v5 = vmul.f32 %v10053_v30, %v5478_v60  ;;  %v7714_v30 = vld [vmem:[%s10358_s5 + $0xb0] sm:$0xff] }
 0x2cf   : > { %8165 = vmatprep.subr.mxu1 %v10400_v11 }
 0x2d0   : > { %v5480_v18 = vadd.f32 %v10058_v58, %v5479_v5 }
 0x2d2   : > { %v7080_v15 = vrot.slane %v5480_v18, 1  ;;  %v7156_v58 = vrot.slane %v5480_v18, 2  ;;  %v7232_v17 = vrot.slane %v5480_v18, 3  ;;  %v7308_v23 = vrot.slane %v5480_v18, 4 }
 0x2d5   : > { %8163 = vmatmul.mubr.msk.f32.vlgmr.msra.gmra.mrb[22].mxu1 %vm5483_vm12, %v6472_v49 }
 0x2d6   : > { %8166 = vmatpush3.msra.mxu1 %v7698_v59  ;;  %8167 = vmatprep.mubr.msk.f32.mxu1 %vm8414_vm3, %v10400_v11 }
 0x2d7   : > { %8170 = vmatprep.subr.mxu1 %v10400_v11 }
 0x2dd   : > { %8168 = vmatmul.mubr.msk.f32.vlgmr.msra.gmra.mrb[22].mxu1 %vm5483_vm12, %v6548_v21 }
 0x2de   : > { %8171 = vmatpush3.msra.mxu1 %v7700_v14  ;;  %8172 = vmatprep.mubr.msk.f32.mxu1 %vm8414_vm3, %v10400_v11 }
 0x2df   : > { %8175 = vmatprep.subr.mxu1 %v10400_v11 }
 0x2e5   : > { %8173 = vmatmul.mubr.msk.f32.vlgmr.msra.gmra.mrb[22].mxu1 %vm5483_vm12, %v4830_v33 }
 0x2e6   : > { %8176 = vmatpush3.msra.mxu1 %v7702_v36  ;;  %8177 = vmatprep.mubr.msk.f32.mxu1 %vm8414_vm3, %v10400_v11 }
 0x2e7   : > { %8180 = vmatprep.subr.mxu1 %v10400_v11 }
 0x2ed   : > { %8178 = vmatmul.mubr.msk.f32.vlgmr.msra.gmra.mrb[22].mxu1 %vm5483_vm12, %v6700_v9 }
 0x2ee   : > { %8181 = vmatpush3.msra.mxu1 %v7704_v62  ;;  %8182 = vmatprep.mubr.msk.f32.mxu1 %vm8414_vm3, %v10400_v11 }
 0x2ef   : > { %8185 = vmatprep.subr.mxu1 %v10400_v11 }
 0x2f5   : > { %8183 = vmatmul.mubr.msk.f32.vlgmr.msra.gmra.mrb[22].mxu1 %vm5483_vm12, %v6776_v39 }
 0x2f6   : > { %8186 = vmatpush3.msra.mxu1 %v7706_v7  ;;  %8187 = vmatprep.mubr.msk.f32.mxu1 %vm8414_vm3, %v10400_v11 }
 0x2f7   : > { %8190 = vmatprep.subr.mxu1 %v10400_v11 }
 0x2fd   : > { %8188 = vmatmul.mubr.msk.f32.vlgmr.msra.gmra.mrb[22].mxu1 %vm5483_vm12, %v6852_v46 }
 0x2fe   : > { %8191 = vmatpush3.msra.mxu1 %v7708_v8  ;;  %8192 = vmatprep.mubr.msk.f32.mxu1 %vm8414_vm3, %v10400_v11 }
 0x2ff   : > { %8195 = vmatprep.subr.mxu1 %v10400_v11 }
 0x305   : > { %8193 = vmatmul.mubr.msk.f32.vlgmr.msra.gmra.mrb[22].mxu1 %vm5483_vm12, %v6928_v31 }
 0x306   : > { %8196 = vmatpush3.msra.mxu1 %v7710_v24  ;;  %8197 = vmatprep.mubr.msk.f32.mxu1 %vm8414_vm3, %v10400_v11 }
 0x307   : > { %8200 = vmatprep.subr.mxu1 %v10400_v11 }
 0x30d   : > { %8198 = vmatmul.mubr.msk.f32.vlgmr.msra.gmra.mrb[22].mxu1 %vm5483_vm12, %v5480_v18 }
 0x30e   : > { %8201 = vmatpush3.msra.mxu1 %v7712_v44  ;;  %8202 = vmatprep.mubr.msk.f32.mxu1 %vm8414_vm3, %v10400_v11 }
 0x30f   : > { %8205 = vmatprep.subr.mxu1 %v10400_v11 }
 0x315   : > { %8203 = vmatmul.mubr.msk.f32.vlgmr.msra.gmra.mrb[22].mxu1 %vm5483_vm12, %v7080_v15 }
 0x316   : > { %8206 = vmatpush3.msra.mxu1 %v7714_v30  ;;  %8207 = vmatprep.mubr.msk.f32.mxu1 %vm8414_vm3, %v10400_v11 }
 0x317   : > { %8210 = vmatprep.subr.mxu1 %v10400_v11 }
 0x31d   : > { %8208 = vmatmul.mubr.msk.f32.vlgmr.msra.gmra.mrb[22].mxu1 %vm5483_vm12, %v7156_v58 }
 0x31e   : > { %8211 = vmatpush3.msra.mxu1 %v7716_v48  ;;  %8212 = vmatprep.mubr.msk.f32.mxu1 %vm8414_vm3, %v10400_v11 }
 0x31f   : > { %8215 = vmatprep.subr.mxu1 %v10400_v11 }
 0x325   : > { %8213 = vmatmul.mubr.msk.f32.vlgmr.msra.gmra.mrb[22].mxu1 %vm5483_vm12, %v7232_v17 }
 0x326   : > { %8216 = vmatpush3.msra.mxu1 %v7718_v34  ;;  %8217 = vmatprep.mubr.msk.f32.mxu1 %vm8414_vm3, %v10400_v11 }
 0x32d   : > { %8218 = vmatmul.mubr.msk.f32.vlgmr.msra.gmra.mrb[22].mxu1 %vm5483_vm12, %v7308_v23 }
 0x400   : > { %v7377_v40 = vpop.f32.mrb[22].mxu1 }
 0x401   : > { %v8237_v16 = vadd.f32 %v7377_v40, %v5481_v35  ;;  %v8219_v11 = vpop.f32.mrb[23].mxu1 }
 0x403   : > { %v7382_v29 = vmax.f32 %v8237_v16, 0.0 }
 0x405   : > { %8229 = vmatmul.mubr.msk.f32.vlgmr.msra.gmra.mrb[68].mxu0 %vm7388_vm13, %v7382_v29 }
 0x4d8   : > { %v7458_v20 = vpop.f32.mrb[68].mxu0 }
 0x4d9   : > { %v7459_v41 = vadd.f32 %v7458_v20, %v7387_v27  ;;  %v8230_v10 = vpop.f32.mrb[69].mxu0 }
 0x4db   : > { %v7463_v0 = vsel %vm7462_vm14, %v7459_v41, -inf }
 0x4dc   : > { %7464 = vmax.xlane.f32.xlu0 %v7463_v0 }
 0x569   : > { %v7465_v54 = vpop.xlane.xlu0 %7464 }
 0x56a   : > { %v7466_v42 = vsub.f32 %v7459_v41, %v7465_v54 }
 0x56c   : > { %v7467_v51 = vmul.f32 1.442695, %v7466_v42 }
 0x56e   : > { %8331 = vpow2.f32 %v7467_v51 }
 0x578   : > { %v8332_v45 = vpop.eup %8331 }
 0x579   : > { %v7469_v38 = vsel %vm7462_vm14, %v8332_v45, 0.0 }
 0x57a   : > { %7470 = vadd.xlane.f32.xlu1 %v7469_v38 }
 0x607   : > { %v7471_v57 = vpop.xlane.xlu1 %7470 }
 0x608   : > { %8333 = vlog2.f32 %v7471_v57 }
 0x612   : > { %v8334_v19 = vpop.eup %8333 }
 0x613   : > { %v7473_v22 = vmul.f32 0.6931472, %v8334_v19 }
 0x615   : > { %v7474_v1 = vsub.f32 %v7466_v42, %v7473_v22 }
 0x617   : > { %7475 = vst.msk [vmem:[%s324_s17] sm:$0x1] %vm7462_vm14, %v7474_v1 }
 0x618   : > { %8361 = shalt.err (!%p8358_p3)
}
 0x619   : > { %s8362_s29 = scalar_lea.hbm %s10310_s24, 16  ;;  %s8366_s17 = scalar_lea.hbm %s10362_s9, 32 }
 0x61a   : > { %p8363_p4 = scmp.ne.s32.totalorder %s10310_s24, %s8362_s29  ;;  %p8367_p9 = scmp.lt.u32.totalorder %s10310_s24, %s10362_s9 }
 0x61b   : > { %p8368_p10 = scmp.lt.u32.totalorder %s8366_s17, %s8362_s29  ;;  %p8370_p12 = scmp.lt.u32.totalorder %s8362_s29, %s10310_s24 }
 0x61c   : > { %p8364_p7 = pnand %p8363_p4, %p8505_p5 }
 0x61d   : > { %p8369_p11 = por %p8368_p10, %p8367_p9 }
 0x61e   : > { %p8365_p8 = pneg %p8364_p7 }
 0x61f   : > { %p8371_p13 = por %p8370_p12, %p8369_p11 }
 0x621   : > { %p8372_p0 = pnand %p8371_p13, %p8365_p8 }
 0x623   : > { %8375 = shalt.err (!%p8372_p0)
}
 0x624   : > { %8286 = dma.vmem_to_hbm [thread:$0]  (%p8505_p5), %s10312_s21, 16, %s10310_s24, %s7477_s25  }
 0x625 PF: > { %p8292_p1 = scmp.ge.s32.totalorder %s8410_s12, 2  ;;  %s7501_s26 = sand.u32 1, %s8398_s30  }
 0x626   : > { %s7502_s13 = scalar_lea.sflag [#allocation3], %s7501_s26 }
 0x627   : > { %p8289_p2 = pnand %p8292_p1, %p8509_p6 }
 0x629   : > { %8393 = dma.done.wait (!%p8289_p2), %s7502_s13, 16  }
 0x62a   : > { %8395 = vsyncadd (!%p8289_p2), %s7502_s13, 4294967280  ;;  %p19_p3 = scmp.ge.s32.totalorder %s8492_s15, 4   ;;  %s10443_s30 = smov %s8402_s10 }
 0x62b   : > { %s10444_s10 = smov %s8406_s11  ;;  %s10445_s11 = smov %s8503_s18 }
 0x62c   : > { %s10446_s12 = smov %s8492_s15  ;;  %21 = sbr.rel (!%p19_p3) target bundleno = 3 (0x3), region = 131 }
 0x633   :  { %7506 = vsyncpa [#allocation3], 1 }
 0x634   :  { %7508 = vsyncpa [#allocation3 + $0x1], 1 }

</bundles_post_ra>
